<compile_context>
chip_gen: v7x
topology: tpu7x:2x2x1
jax: 0.10.0
libtpu: 0.0.40
codegen_flags: <defaults>
</compile_context>

<pallas_src>
import functools

import jax
import jax.numpy as jnp
from jax.experimental import pallas as pl
from jax.experimental.pallas import tpu as pltpu

GATE_PAD = 128    # each gate block padded to 128 lanes (lane-aligned slices)
H1, H2, H3 = 128, 64, 32
D_MID = 16        # dense1 width
OUT_PAD = 128     # dense2 output padded to a lane-dense 128-wide slab


# ----------------------------------------------------------------------------
# Fused kernel: entire forward pass, everything in VMEM.
# ----------------------------------------------------------------------------
def _fused_kernel(x_ref,
                  wih1_ref, whh1_ref, b1_ref, g1_ref, be1_ref,
                  wih2_ref, whh2_ref, b2_ref, g2_ref, be2_ref,
                  wih3_ref, whh3_ref, b3_ref, g3_ref, be3_ref,
                  wd1_ref, bd1_ref, gd_ref, bed_ref,
                  wd2_ref, bd2_ref,
                  out_ref, h1_scr,
                  *, T, B, n_out):
    f32 = jnp.float32

    def ln(x, g, b):
        mean = jnp.mean(x, axis=-1, keepdims=True)
        var = jnp.mean((x - mean) ** 2, axis=-1, keepdims=True)
        return (x - mean) * jax.lax.rsqrt(var + 1e-5) * g + b

    def lstm_step(x_proj, h_prev, c_prev, whh_ref, hidden):
        # Only the recurrent matmul is loop-carried; bias + input projection
        # were folded into x_proj outside the loop.
        gates = x_proj + jnp.dot(h_prev, whh_ref[...],
                                 preferred_element_type=f32)
        i_g = jax.nn.sigmoid(gates[:, 0 * GATE_PAD:0 * GATE_PAD + hidden])
        f_g = jax.nn.sigmoid(gates[:, 1 * GATE_PAD:1 * GATE_PAD + hidden])
        g_g = jnp.tanh(gates[:, 2 * GATE_PAD:2 * GATE_PAD + hidden])
        o_g = jax.nn.sigmoid(gates[:, 3 * GATE_PAD:3 * GATE_PAD + hidden])
        c_new = f_g * c_prev + i_g * g_g
        h_new = o_g * jnp.tanh(c_new)
        return h_new, c_new

    # ---- LSTM1: input projection for ALL timesteps in one matmul (bias
    #      folded in here, hoisted out of the recurrence).
    xp1 = (jnp.dot(x_ref[...], wih1_ref[...], preferred_element_type=f32)
           + b1_ref[...])                                  # (T*B, 4*GATE_PAD)
    h1 = jnp.zeros((B, H1), f32)
    c1 = jnp.zeros((B, H1), f32)
    for t in range(T):                                     # static unroll
        h1, c1 = lstm_step(xp1[t * B:(t + 1) * B, :], h1, c1, whh1_ref, H1)
        h1_scr[t * B:(t + 1) * B, :] = h1

    # ---- LayerNorm1 + LSTM2 input projection, batched over all timesteps.
    z1 = ln(h1_scr[...], g1_ref[...], be1_ref[...])        # (T*B, H1)
    xp2 = (jnp.dot(z1, wih2_ref[...], preferred_element_type=f32)
           + b2_ref[...])                                  # (T*B, 4*GATE_PAD)
    h2 = jnp.zeros((B, H2), f32)
    c2 = jnp.zeros((B, H2), f32)
    for t in range(T):
        h2, c2 = lstm_step(xp2[t * B:(t + 1) * B, :], h2, c2, whh2_ref, H2)

    # ---- Take last timestep (LN commutes with slicing positions), then the
    #      repeated lstm3 input is identical each step -> project exactly once.
    z2 = ln(h2, g2_ref[...], be2_ref[...])                 # (B, H2)
    xp3 = (jnp.dot(z2, wih3_ref[...], preferred_element_type=f32)
           + b3_ref[...])                                  # (B, 4*GATE_PAD)

    h3 = jnp.zeros((B, H3), f32)
    c3 = jnp.zeros((B, H3), f32)
    for s in range(n_out):                                 # static unroll
        h3, c3 = lstm_step(xp3, h3, c3, whh3_ref, H3)
        # Head: LN3 -> dense1 -> tanh -> LN -> dense2 (lane-padded output).
        z3 = ln(h3, g3_ref[...], be3_ref[...])             # (B, H3)
        d1 = jnp.tanh(jnp.dot(z3, wd1_ref[...], preferred_element_type=f32)
                      + bd1_ref[...])                      # (B, D_MID)
        zd = ln(d1, gd_ref[...], bed_ref[...])
        y = (jnp.dot(zd, wd2_ref[...], preferred_element_type=f32)
             + bd2_ref[...])                               # (B, OUT_PAD)
        out_ref[s * B:(s + 1) * B, :] = y


def _full_spec(a):
    return pl.BlockSpec(a.shape, lambda: (0,) * a.ndim)


# ----------------------------------------------------------------------------
# Wrapper: single pallas_call; only cheap transposes/slices live in XLA.
# ----------------------------------------------------------------------------
@functools.partial(jax.jit, static_argnames=("n_outputs",))
def forward(x, params, n_outputs):
    B, T, F = x.shape
    x2d = jnp.transpose(x, (1, 0, 2)).reshape(T * B, F)    # time-major rows

    p = params
    inputs = [
        x2d,
        p["lstm1"]["wih"], p["lstm1"]["whh"], p["lstm1"]["bias"],
        p["ln1"]["gamma"], p["ln1"]["beta"],
        p["lstm2"]["wih"], p["lstm2"]["whh"], p["lstm2"]["bias"],
        p["ln2"]["gamma"], p["ln2"]["beta"],
        p["lstm3"]["wih"], p["lstm3"]["whh"], p["lstm3"]["bias"],
        p["ln3"]["gamma"], p["ln3"]["beta"],
        p["dense1"]["w_t"], p["dense1"]["b"],
        p["ln_dense"]["gamma"], p["ln_dense"]["beta"],
        p["dense2"]["w_t"], p["dense2"]["b"],
    ]

    kernel = functools.partial(_fused_kernel, T=T, B=B, n_out=n_outputs)
    out = pl.pallas_call(
        kernel,
        out_shape=jax.ShapeDtypeStruct((n_outputs * B, OUT_PAD), jnp.float32),
        in_specs=[_full_spec(a) for a in inputs],
        out_specs=pl.BlockSpec((n_outputs * B, OUT_PAD), lambda: (0, 0)),
        scratch_shapes=[pltpu.VMEM((T * B, H1), jnp.float32)],
    )(*inputs)

    # (n_out*B, OUT_PAD) -> (B, n_out, F)
    return out[:, :F].reshape(n_outputs, B, F).transpose(1, 0, 2)


# ----------------------------------------------------------------------------
# Parameter init (PyTorch-style uniform bounds) in the packed kernel layout:
#   * LSTM weights transposed to (in, 4*GATE_PAD), each gate zero-padded to a
#     128-lane block; b_ih + b_hh combined into one (1, 4*GATE_PAD) bias.
#   * dense2 padded to OUT_PAD output lanes (zeros), sliced in the wrapper.
# ----------------------------------------------------------------------------
def _uniform(key, shape, bound):
    return jax.random.uniform(key, shape, jnp.float32, -bound, bound)


def init_params(key, n_features, n_outputs):
    del n_outputs
    keys = iter(jax.random.split(key, 16))

    def lstm_params(in_dim, hidden):
        k = 1.0 / float(hidden) ** 0.5
        w_ih = _uniform(next(keys), (4 * hidden, in_dim), k)   # PyTorch (4H, in)
        w_hh = _uniform(next(keys), (4 * hidden, hidden), k)   # PyTorch (4H, H)
        b_ih = _uniform(next(keys), (4 * hidden,), k)
        b_hh = _uniform(next(keys), (4 * hidden,), k)
        pad = GATE_PAD - hidden

        def pack(w):   # (4H, in) -> (in, 4*GATE_PAD), per-gate lane-padded
            blocks = [jnp.pad(w[g * hidden:(g + 1) * hidden, :].T,
                              ((0, 0), (0, pad))) for g in range(4)]
            return jnp.concatenate(blocks, axis=1)

        b = b_ih + b_hh
        bias = jnp.concatenate(
            [jnp.pad(b[g * hidden:(g + 1) * hidden], (0, pad))
             for g in range(4)])[None, :]
        return {"wih": pack(w_ih), "whh": pack(w_hh), "bias": bias}

    def linear_params(in_dim, out_dim, pad_to=None):
        k = 1.0 / float(in_dim) ** 0.5
        w = _uniform(next(keys), (out_dim, in_dim), k)
        b = _uniform(next(keys), (out_dim,), k)
        w_t, b_row = w.T, b[None, :]
        if pad_to is not None:
            w_t = jnp.pad(w_t, ((0, 0), (0, pad_to - out_dim)))
            b_row = jnp.pad(b_row, ((0, 0), (0, pad_to - out_dim)))
        return {"w_t": w_t, "b": b_row}

    def ln_params(dim):
        return {"gamma": jnp.ones((1, dim), jnp.float32),
                "beta": jnp.zeros((1, dim), jnp.float32)}

    return {
        "lstm1": lstm_params(n_features, H1), "ln1": ln_params(H1),
        "lstm2": lstm_params(H1, H2),         "ln2": ln_params(H2),
        "lstm3": lstm_params(H2, H3),         "ln3": ln_params(H3),
        "dense1": linear_params(H3, D_MID),   "ln_dense": ln_params(D_MID),
        "dense2": linear_params(D_MID, n_features, pad_to=OUT_PAD),
    }


if __name__ == "__main__":
    n_features = 4
    n_outputs = 3
    batch = 2
    seq = 8

    key = jax.random.PRNGKey(0)
    k_x, k_p = jax.random.split(key)
    x = jax.random.normal(k_x, (batch, seq, n_features), dtype=jnp.float32)
    params = init_params(k_p, n_features, n_outputs)

    y = forward(x, params, n_outputs)
    y = jax.block_until_ready(y)
    assert y.shape == (batch, n_outputs, n_features)
    assert bool(jnp.all(jnp.isfinite(y)))
    print("KERNEL_OK")
</pallas_src>

<mosaic_0001>
module attributes {stable_mosaic.version = 11 : i64} {
  func.func @_fused_kernel(%arg0: memref<16x4xf32, #tpu.memory_space<vmem>>, %arg1: memref<4x512xf32, #tpu.memory_space<vmem>>, %arg2: memref<128x512xf32, #tpu.memory_space<vmem>>, %arg3: memref<1x512xf32, #tpu.memory_space<vmem>>, %arg4: memref<1x128xf32, #tpu.memory_space<vmem>>, %arg5: memref<1x128xf32, #tpu.memory_space<vmem>>, %arg6: memref<128x512xf32, #tpu.memory_space<vmem>>, %arg7: memref<64x512xf32, #tpu.memory_space<vmem>>, %arg8: memref<1x512xf32, #tpu.memory_space<vmem>>, %arg9: memref<1x64xf32, #tpu.memory_space<vmem>>, %arg10: memref<1x64xf32, #tpu.memory_space<vmem>>, %arg11: memref<64x512xf32, #tpu.memory_space<vmem>>, %arg12: memref<32x512xf32, #tpu.memory_space<vmem>>, %arg13: memref<1x512xf32, #tpu.memory_space<vmem>>, %arg14: memref<1x32xf32, #tpu.memory_space<vmem>>, %arg15: memref<1x32xf32, #tpu.memory_space<vmem>>, %arg16: memref<32x16xf32, #tpu.memory_space<vmem>>, %arg17: memref<1x16xf32, #tpu.memory_space<vmem>>, %arg18: memref<1x16xf32, #tpu.memory_space<vmem>>, %arg19: memref<1x16xf32, #tpu.memory_space<vmem>>, %arg20: memref<16x128xf32, #tpu.memory_space<vmem>>, %arg21: memref<1x128xf32, #tpu.memory_space<vmem>>, %arg22: memref<6x128xf32, #tpu.memory_space<vmem>>, %arg23: memref<16x128xf32, #tpu.memory_space<vmem>>) attributes {dimension_semantics = [], scalar_prefetch = 0 : i64, scratch_operands = 1 : i64, tpu.core_type = #tpu.core_type<tc>} {
    %c0 = arith.constant 0 : index
    %c0_0 = arith.constant 0 : index
    %0 = vector.load %arg0[%c0, %c0_0] : memref<16x4xf32, #tpu.memory_space<vmem>>, vector<16x4xf32>
    %c0_1 = arith.constant 0 : index
    %c0_2 = arith.constant 0 : index
    %1 = vector.load %arg1[%c0_1, %c0_2] : memref<4x512xf32, #tpu.memory_space<vmem>>, vector<4x512xf32>
    %cst = arith.constant dense<0.000000e+00> : vector<16x512xf32>
    %2 = tpu.matmul %0, %1, %cst {dimension_numbers = #tpu.dot_dimension_numbers<[1], [0], [0], [1], [0, 0, 1, 1], [], []>} : vector<16x4xf32>, vector<4x512xf32>, vector<16x512xf32> -> vector<16x512xf32>
    %c0_3 = arith.constant 0 : index
    %c0_4 = arith.constant 0 : index
    %3 = vector.load %arg3[%c0_3, %c0_4] : memref<1x512xf32, #tpu.memory_space<vmem>>, vector<1x512xf32>
    %4 = vector.broadcast %3 : vector<1x512xf32> to vector<16x512xf32>
    %5 = arith.addf %2, %4 : vector<16x512xf32>
    %cst_5 = arith.constant 0.000000e+00 : f32
    %6 = vector.broadcast %cst_5 : f32 to vector<2x128xf32>
    %cst_6 = arith.constant 0.000000e+00 : f32
    %7 = vector.broadcast %cst_6 : f32 to vector<2x128xf32>
    %8 = vector.extract_strided_slice %5 {offsets = [0, 0], sizes = [2, 512], strides = [1, 1]} : vector<16x512xf32> to vector<2x512xf32>
    %c0_7 = arith.constant 0 : index
    %c0_8 = arith.constant 0 : index
    %9 = vector.load %arg2[%c0_7, %c0_8] : memref<128x512xf32, #tpu.memory_space<vmem>>, vector<128x512xf32>
    %cst_9 = arith.constant dense<0.000000e+00> : vector<2x512xf32>
    %10 = tpu.matmul %6, %9, %cst_9 {dimension_numbers = #tpu.dot_dimension_numbers<[1], [0], [0], [1], [0, 0, 1, 1], [], []>} : vector<2x128xf32>, vector<128x512xf32>, vector<2x512xf32> -> vector<2x512xf32>
    %11 = arith.addf %8, %10 : vector<2x512xf32>
    %12 = vector.extract_strided_slice %11 {offsets = [0, 0], sizes = [2, 128], strides = [1, 1]} : vector<2x512xf32> to vector<2x128xf32>
    %13 = arith.negf %12 : vector<2x128xf32>
    %14 = math.exp %13 : vector<2x128xf32>
    %cst_10 = arith.constant 1.000000e+00 : f32
    %15 = vector.broadcast %cst_10 : f32 to vector<2x128xf32>
    %16 = arith.addf %15, %14 : vector<2x128xf32>
    %17 = arith.divf %15, %16 : vector<2x128xf32>
    %18 = vector.extract_strided_slice %11 {offsets = [0, 128], sizes = [2, 128], strides = [1, 1]} : vector<2x512xf32> to vector<2x128xf32>
    %19 = arith.negf %18 : vector<2x128xf32>
    %20 = math.exp %19 : vector<2x128xf32>
    %cst_11 = arith.constant 1.000000e+00 : f32
    %21 = vector.broadcast %cst_11 : f32 to vector<2x128xf32>
    %22 = arith.addf %21, %20 : vector<2x128xf32>
    %23 = arith.divf %21, %22 : vector<2x128xf32>
    %24 = vector.extract_strided_slice %11 {offsets = [0, 256], sizes = [2, 128], strides = [1, 1]} : vector<2x512xf32> to vector<2x128xf32>
    %25 = math.tanh %24 : vector<2x128xf32>
    %26 = vector.extract_strided_slice %11 {offsets = [0, 384], sizes = [2, 128], strides = [1, 1]} : vector<2x512xf32> to vector<2x128xf32>
    %27 = arith.negf %26 : vector<2x128xf32>
    %28 = math.exp %27 : vector<2x128xf32>
    %cst_12 = arith.constant 1.000000e+00 : f32
    %29 = vector.broadcast %cst_12 : f32 to vector<2x128xf32>
    %30 = arith.addf %29, %28 : vector<2x128xf32>
    %31 = arith.divf %29, %30 : vector<2x128xf32>
    %32 = arith.mulf %23, %7 : vector<2x128xf32>
    %33 = arith.mulf %17, %25 : vector<2x128xf32>
    %34 = arith.addf %32, %33 : vector<2x128xf32>
    %35 = math.tanh %34 : vector<2x128xf32>
    %36 = arith.mulf %31, %35 : vector<2x128xf32>
    %c0_13 = arith.constant 0 : index
    %c0_14 = arith.constant 0 : index
    %37 = vector.load %arg23[%c0_13, %c0_14] : memref<16x128xf32, #tpu.memory_space<vmem>>, vector<2x128xf32>
    tpu.vector_store %arg23[%c0_13, %c0_14], %36 {strides = array<i32>} : memref<16x128xf32, #tpu.memory_space<vmem>>, vector<2x128xf32>,
    %38 = vector.extract_strided_slice %5 {offsets = [2, 0], sizes = [2, 512], strides = [1, 1]} : vector<16x512xf32> to vector<2x512xf32>
    %c0_15 = arith.constant 0 : index
    %c0_16 = arith.constant 0 : index
    %39 = vector.load %arg2[%c0_15, %c0_16] : memref<128x512xf32, #tpu.memory_space<vmem>>, vector<128x512xf32>
    %cst_17 = arith.constant dense<0.000000e+00> : vector<2x512xf32>
    %40 = tpu.matmul %36, %39, %cst_17 {dimension_numbers = #tpu.dot_dimension_numbers<[1], [0], [0], [1], [0, 0, 1, 1], [], []>} : vector<2x128xf32>, vector<128x512xf32>, vector<2x512xf32> -> vector<2x512xf32>
    %41 = arith.addf %38, %40 : vector<2x512xf32>
    %42 = vector.extract_strided_slice %41 {offsets = [0, 0], sizes = [2, 128], strides = [1, 1]} : vector<2x512xf32> to vector<2x128xf32>
    %43 = arith.negf %42 : vector<2x128xf32>
    %44 = math.exp %43 : vector<2x128xf32>
    %cst_18 = arith.constant 1.000000e+00 : f32
    %45 = vector.broadcast %cst_18 : f32 to vector<2x128xf32>
    %46 = arith.addf %45, %44 : vector<2x128xf32>
    %47 = arith.divf %45, %46 : vector<2x128xf32>
    %48 = vector.extract_strided_slice %41 {offsets = [0, 128], sizes = [2, 128], strides = [1, 1]} : vector<2x512xf32> to vector<2x128xf32>
    %49 = arith.negf %48 : vector<2x128xf32>
    %50 = math.exp %49 : vector<2x128xf32>
    %cst_19 = arith.constant 1.000000e+00 : f32
    %51 = vector.broadcast %cst_19 : f32 to vector<2x128xf32>
    %52 = arith.addf %51, %50 : vector<2x128xf32>
    %53 = arith.divf %51, %52 : vector<2x128xf32>
    %54 = vector.extract_strided_slice %41 {offsets = [0, 256], sizes = [2, 128], strides = [1, 1]} : vector<2x512xf32> to vector<2x128xf32>
    %55 = math.tanh %54 : vector<2x128xf32>
    %56 = vector.extract_strided_slice %41 {offsets = [0, 384], sizes = [2, 128], strides = [1, 1]} : vector<2x512xf32> to vector<2x128xf32>
    %57 = arith.negf %56 : vector<2x128xf32>
    %58 = math.exp %57 : vector<2x128xf32>
    %cst_20 = arith.constant 1.000000e+00 : f32
    %59 = vector.broadcast %cst_20 : f32 to vector<2x128xf32>
    %60 = arith.addf %59, %58 : vector<2x128xf32>
    %61 = arith.divf %59, %60 : vector<2x128xf32>
    %62 = arith.mulf %53, %34 : vector<2x128xf32>
    %63 = arith.mulf %47, %55 : vector<2x128xf32>
    %64 = arith.addf %62, %63 : vector<2x128xf32>
    %65 = math.tanh %64 : vector<2x128xf32>
    %66 = arith.mulf %61, %65 : vector<2x128xf32>
    %c2 = arith.constant 2 : index
    %c0_21 = arith.constant 0 : index
    %67 = vector.load %arg23[%c2, %c0_21] : memref<16x128xf32, #tpu.memory_space<vmem>>, vector<2x128xf32>
    tpu.vector_store %arg23[%c2, %c0_21], %66 {strides = array<i32>} : memref<16x128xf32, #tpu.memory_space<vmem>>, vector<2x128xf32>,
    %68 = vector.extract_strided_slice %5 {offsets = [4, 0], sizes = [2, 512], strides = [1, 1]} : vector<16x512xf32> to vector<2x512xf32>
    %c0_22 = arith.constant 0 : index
    %c0_23 = arith.constant 0 : index
    %69 = vector.load %arg2[%c0_22, %c0_23] : memref<128x512xf32, #tpu.memory_space<vmem>>, vector<128x512xf32>
    %cst_24 = arith.constant dense<0.000000e+00> : vector<2x512xf32>
    %70 = tpu.matmul %66, %69, %cst_24 {dimension_numbers = #tpu.dot_dimension_numbers<[1], [0], [0], [1], [0, 0, 1, 1], [], []>} : vector<2x128xf32>, vector<128x512xf32>, vector<2x512xf32> -> vector<2x512xf32>
    %71 = arith.addf %68, %70 : vector<2x512xf32>
    %72 = vector.extract_strided_slice %71 {offsets = [0, 0], sizes = [2, 128], strides = [1, 1]} : vector<2x512xf32> to vector<2x128xf32>
    %73 = arith.negf %72 : vector<2x128xf32>
    %74 = math.exp %73 : vector<2x128xf32>
    %cst_25 = arith.constant 1.000000e+00 : f32
    %75 = vector.broadcast %cst_25 : f32 to vector<2x128xf32>
    %76 = arith.addf %75, %74 : vector<2x128xf32>
    %77 = arith.divf %75, %76 : vector<2x128xf32>
    %78 = vector.extract_strided_slice %71 {offsets = [0, 128], sizes = [2, 128], strides = [1, 1]} : vector<2x512xf32> to vector<2x128xf32>
    %79 = arith.negf %78 : vector<2x128xf32>
    %80 = math.exp %79 : vector<2x128xf32>
    %cst_26 = arith.constant 1.000000e+00 : f32
    %81 = vector.broadcast %cst_26 : f32 to vector<2x128xf32>
    %82 = arith.addf %81, %80 : vector<2x128xf32>
    %83 = arith.divf %81, %82 : vector<2x128xf32>
    %84 = vector.extract_strided_slice %71 {offsets = [0, 256], sizes = [2, 128], strides = [1, 1]} : vector<2x512xf32> to vector<2x128xf32>
    %85 = math.tanh %84 : vector<2x128xf32>
    %86 = vector.extract_strided_slice %71 {offsets = [0, 384], sizes = [2, 128], strides = [1, 1]} : vector<2x512xf32> to vector<2x128xf32>
    %87 = arith.negf %86 : vector<2x128xf32>
    %88 = math.exp %87 : vector<2x128xf32>
    %cst_27 = arith.constant 1.000000e+00 : f32
    %89 = vector.broadcast %cst_27 : f32 to vector<2x128xf32>
    %90 = arith.addf %89, %88 : vector<2x128xf32>
    %91 = arith.divf %89, %90 : vector<2x128xf32>
    %92 = arith.mulf %83, %64 : vector<2x128xf32>
    %93 = arith.mulf %77, %85 : vector<2x128xf32>
    %94 = arith.addf %92, %93 : vector<2x128xf32>
    %95 = math.tanh %94 : vector<2x128xf32>
    %96 = arith.mulf %91, %95 : vector<2x128xf32>
    %c4 = arith.constant 4 : index
    %c0_28 = arith.constant 0 : index
    %97 = vector.load %arg23[%c4, %c0_28] : memref<16x128xf32, #tpu.memory_space<vmem>>, vector<2x128xf32>
    tpu.vector_store %arg23[%c4, %c0_28], %96 {strides = array<i32>} : memref<16x128xf32, #tpu.memory_space<vmem>>, vector<2x128xf32>,
    %98 = vector.extract_strided_slice %5 {offsets = [6, 0], sizes = [2, 512], strides = [1, 1]} : vector<16x512xf32> to vector<2x512xf32>
    %c0_29 = arith.constant 0 : index
    %c0_30 = arith.constant 0 : index
    %99 = vector.load %arg2[%c0_29, %c0_30] : memref<128x512xf32, #tpu.memory_space<vmem>>, vector<128x512xf32>
    %cst_31 = arith.constant dense<0.000000e+00> : vector<2x512xf32>
    %100 = tpu.matmul %96, %99, %cst_31 {dimension_numbers = #tpu.dot_dimension_numbers<[1], [0], [0], [1], [0, 0, 1, 1], [], []>} : vector<2x128xf32>, vector<128x512xf32>, vector<2x512xf32> -> vector<2x512xf32>
    %101 = arith.addf %98, %100 : vector<2x512xf32>
    %102 = vector.extract_strided_slice %101 {offsets = [0, 0], sizes = [2, 128], strides = [1, 1]} : vector<2x512xf32> to vector<2x128xf32>
    %103 = arith.negf %102 : vector<2x128xf32>
    %104 = math.exp %103 : vector<2x128xf32>
    %cst_32 = arith.constant 1.000000e+00 : f32
    %105 = vector.broadcast %cst_32 : f32 to vector<2x128xf32>
    %106 = arith.addf %105, %104 : vector<2x128xf32>
    %107 = arith.divf %105, %106 : vector<2x128xf32>
    %108 = vector.extract_strided_slice %101 {offsets = [0, 128], sizes = [2, 128], strides = [1, 1]} : vector<2x512xf32> to vector<2x128xf32>
    %109 = arith.negf %108 : vector<2x128xf32>
    %110 = math.exp %109 : vector<2x128xf32>
    %cst_33 = arith.constant 1.000000e+00 : f32
    %111 = vector.broadcast %cst_33 : f32 to vector<2x128xf32>
    %112 = arith.addf %111, %110 : vector<2x128xf32>
    %113 = arith.divf %111, %112 : vector<2x128xf32>
    %114 = vector.extract_strided_slice %101 {offsets = [0, 256], sizes = [2, 128], strides = [1, 1]} : vector<2x512xf32> to vector<2x128xf32>
    %115 = math.tanh %114 : vector<2x128xf32>
    %116 = vector.extract_strided_slice %101 {offsets = [0, 384], sizes = [2, 128], strides = [1, 1]} : vector<2x512xf32> to vector<2x128xf32>
    %117 = arith.negf %116 : vector<2x128xf32>
    %118 = math.exp %117 : vector<2x128xf32>
    %cst_34 = arith.constant 1.000000e+00 : f32
    %119 = vector.broadcast %cst_34 : f32 to vector<2x128xf32>
    %120 = arith.addf %119, %118 : vector<2x128xf32>
    %121 = arith.divf %119, %120 : vector<2x128xf32>
    %122 = arith.mulf %113, %94 : vector<2x128xf32>
    %123 = arith.mulf %107, %115 : vector<2x128xf32>
    %124 = arith.addf %122, %123 : vector<2x128xf32>
    %125 = math.tanh %124 : vector<2x128xf32>
    %126 = arith.mulf %121, %125 : vector<2x128xf32>
    %c6 = arith.constant 6 : index
    %c0_35 = arith.constant 0 : index
    %127 = vector.load %arg23[%c6, %c0_35] : memref<16x128xf32, #tpu.memory_space<vmem>>, vector<2x128xf32>
    tpu.vector_store %arg23[%c6, %c0_35], %126 {strides = array<i32>} : memref<16x128xf32, #tpu.memory_space<vmem>>, vector<2x128xf32>,
    %128 = vector.extract_strided_slice %5 {offsets = [8, 0], sizes = [2, 512], strides = [1, 1]} : vector<16x512xf32> to vector<2x512xf32>
    %c0_36 = arith.constant 0 : index
    %c0_37 = arith.constant 0 : index
    %129 = vector.load %arg2[%c0_36, %c0_37] : memref<128x512xf32, #tpu.memory_space<vmem>>, vector<128x512xf32>
    %cst_38 = arith.constant dense<0.000000e+00> : vector<2x512xf32>
    %130 = tpu.matmul %126, %129, %cst_38 {dimension_numbers = #tpu.dot_dimension_numbers<[1], [0], [0], [1], [0, 0, 1, 1], [], []>} : vector<2x128xf32>, vector<128x512xf32>, vector<2x512xf32> -> vector<2x512xf32>
    %131 = arith.addf %128, %130 : vector<2x512xf32>
    %132 = vector.extract_strided_slice %131 {offsets = [0, 0], sizes = [2, 128], strides = [1, 1]} : vector<2x512xf32> to vector<2x128xf32>
    %133 = arith.negf %132 : vector<2x128xf32>
    %134 = math.exp %133 : vector<2x128xf32>
    %cst_39 = arith.constant 1.000000e+00 : f32
    %135 = vector.broadcast %cst_39 : f32 to vector<2x128xf32>
    %136 = arith.addf %135, %134 : vector<2x128xf32>
    %137 = arith.divf %135, %136 : vector<2x128xf32>
    %138 = vector.extract_strided_slice %131 {offsets = [0, 128], sizes = [2, 128], strides = [1, 1]} : vector<2x512xf32> to vector<2x128xf32>
    %139 = arith.negf %138 : vector<2x128xf32>
    %140 = math.exp %139 : vector<2x128xf32>
    %cst_40 = arith.constant 1.000000e+00 : f32
    %141 = vector.broadcast %cst_40 : f32 to vector<2x128xf32>
    %142 = arith.addf %141, %140 : vector<2x128xf32>
    %143 = arith.divf %141, %142 : vector<2x128xf32>
    %144 = vector.extract_strided_slice %131 {offsets = [0, 256], sizes = [2, 128], strides = [1, 1]} : vector<2x512xf32> to vector<2x128xf32>
    %145 = math.tanh %144 : vector<2x128xf32>
    %146 = vector.extract_strided_slice %131 {offsets = [0, 384], sizes = [2, 128], strides = [1, 1]} : vector<2x512xf32> to vector<2x128xf32>
    %147 = arith.negf %146 : vector<2x128xf32>
    %148 = math.exp %147 : vector<2x128xf32>
    %cst_41 = arith.constant 1.000000e+00 : f32
    %149 = vector.broadcast %cst_41 : f32 to vector<2x128xf32>
    %150 = arith.addf %149, %148 : vector<2x128xf32>
    %151 = arith.divf %149, %150 : vector<2x128xf32>
    %152 = arith.mulf %143, %124 : vector<2x128xf32>
    %153 = arith.mulf %137, %145 : vector<2x128xf32>
    %154 = arith.addf %152, %153 : vector<2x128xf32>
    %155 = math.tanh %154 : vector<2x128xf32>
    %156 = arith.mulf %151, %155 : vector<2x128xf32>
    %c8 = arith.constant 8 : index
    %c0_42 = arith.constant 0 : index
    %157 = vector.load %arg23[%c8, %c0_42] : memref<16x128xf32, #tpu.memory_space<vmem>>, vector<2x128xf32>
    tpu.vector_store %arg23[%c8, %c0_42], %156 {strides = array<i32>} : memref<16x128xf32, #tpu.memory_space<vmem>>, vector<2x128xf32>,
    %158 = vector.extract_strided_slice %5 {offsets = [10, 0], sizes = [2, 512], strides = [1, 1]} : vector<16x512xf32> to vector<2x512xf32>
    %c0_43 = arith.constant 0 : index
    %c0_44 = arith.constant 0 : index
    %159 = vector.load %arg2[%c0_43, %c0_44] : memref<128x512xf32, #tpu.memory_space<vmem>>, vector<128x512xf32>
    %cst_45 = arith.constant dense<0.000000e+00> : vector<2x512xf32>
    %160 = tpu.matmul %156, %159, %cst_45 {dimension_numbers = #tpu.dot_dimension_numbers<[1], [0], [0], [1], [0, 0, 1, 1], [], []>} : vector<2x128xf32>, vector<128x512xf32>, vector<2x512xf32> -> vector<2x512xf32>
    %161 = arith.addf %158, %160 : vector<2x512xf32>
    %162 = vector.extract_strided_slice %161 {offsets = [0, 0], sizes = [2, 128], strides = [1, 1]} : vector<2x512xf32> to vector<2x128xf32>
    %163 = arith.negf %162 : vector<2x128xf32>
    %164 = math.exp %163 : vector<2x128xf32>
    %cst_46 = arith.constant 1.000000e+00 : f32
    %165 = vector.broadcast %cst_46 : f32 to vector<2x128xf32>
    %166 = arith.addf %165, %164 : vector<2x128xf32>
    %167 = arith.divf %165, %166 : vector<2x128xf32>
    %168 = vector.extract_strided_slice %161 {offsets = [0, 128], sizes = [2, 128], strides = [1, 1]} : vector<2x512xf32> to vector<2x128xf32>
    %169 = arith.negf %168 : vector<2x128xf32>
    %170 = math.exp %169 : vector<2x128xf32>
    %cst_47 = arith.constant 1.000000e+00 : f32
    %171 = vector.broadcast %cst_47 : f32 to vector<2x128xf32>
    %172 = arith.addf %171, %170 : vector<2x128xf32>
    %173 = arith.divf %171, %172 : vector<2x128xf32>
    %174 = vector.extract_strided_slice %161 {offsets = [0, 256], sizes = [2, 128], strides = [1, 1]} : vector<2x512xf32> to vector<2x128xf32>
    %175 = math.tanh %174 : vector<2x128xf32>
    %176 = vector.extract_strided_slice %161 {offsets = [0, 384], sizes = [2, 128], strides = [1, 1]} : vector<2x512xf32> to vector<2x128xf32>
    %177 = arith.negf %176 : vector<2x128xf32>
    %178 = math.exp %177 : vector<2x128xf32>
    %cst_48 = arith.constant 1.000000e+00 : f32
    %179 = vector.broadcast %cst_48 : f32 to vector<2x128xf32>
    %180 = arith.addf %179, %178 : vector<2x128xf32>
    %181 = arith.divf %179, %180 : vector<2x128xf32>
    %182 = arith.mulf %173, %154 : vector<2x128xf32>
    %183 = arith.mulf %167, %175 : vector<2x128xf32>
    %184 = arith.addf %182, %183 : vector<2x128xf32>
    %185 = math.tanh %184 : vector<2x128xf32>
    %186 = arith.mulf %181, %185 : vector<2x128xf32>
    %c10 = arith.constant 10 : index
    %c0_49 = arith.constant 0 : index
    %187 = vector.load %arg23[%c10, %c0_49] : memref<16x128xf32, #tpu.memory_space<vmem>>, vector<2x128xf32>
    tpu.vector_store %arg23[%c10, %c0_49], %186 {strides = array<i32>} : memref<16x128xf32, #tpu.memory_space<vmem>>, vector<2x128xf32>,
    %188 = vector.extract_strided_slice %5 {offsets = [12, 0], sizes = [2, 512], strides = [1, 1]} : vector<16x512xf32> to vector<2x512xf32>
    %c0_50 = arith.constant 0 : index
    %c0_51 = arith.constant 0 : index
    %189 = vector.load %arg2[%c0_50, %c0_51] : memref<128x512xf32, #tpu.memory_space<vmem>>, vector<128x512xf32>
    %cst_52 = arith.constant dense<0.000000e+00> : vector<2x512xf32>
    %190 = tpu.matmul %186, %189, %cst_52 {dimension_numbers = #tpu.dot_dimension_numbers<[1], [0], [0], [1], [0, 0, 1, 1], [], []>} : vector<2x128xf32>, vector<128x512xf32>, vector<2x512xf32> -> vector<2x512xf32>
    %191 = arith.addf %188, %190 : vector<2x512xf32>
    %192 = vector.extract_strided_slice %191 {offsets = [0, 0], sizes = [2, 128], strides = [1, 1]} : vector<2x512xf32> to vector<2x128xf32>
    %193 = arith.negf %192 : vector<2x128xf32>
    %194 = math.exp %193 : vector<2x128xf32>
    %cst_53 = arith.constant 1.000000e+00 : f32
    %195 = vector.broadcast %cst_53 : f32 to vector<2x128xf32>
    %196 = arith.addf %195, %194 : vector<2x128xf32>
    %197 = arith.divf %195, %196 : vector<2x128xf32>
    %198 = vector.extract_strided_slice %191 {offsets = [0, 128], sizes = [2, 128], strides = [1, 1]} : vector<2x512xf32> to vector<2x128xf32>
    %199 = arith.negf %198 : vector<2x128xf32>
    %200 = math.exp %199 : vector<2x128xf32>
    %cst_54 = arith.constant 1.000000e+00 : f32
    %201 = vector.broadcast %cst_54 : f32 to vector<2x128xf32>
    %202 = arith.addf %201, %200 : vector<2x128xf32>
    %203 = arith.divf %201, %202 : vector<2x128xf32>
    %204 = vector.extract_strided_slice %191 {offsets = [0, 256], sizes = [2, 128], strides = [1, 1]} : vector<2x512xf32> to vector<2x128xf32>
    %205 = math.tanh %204 : vector<2x128xf32>
    %206 = vector.extract_strided_slice %191 {offsets = [0, 384], sizes = [2, 128], strides = [1, 1]} : vector<2x512xf32> to vector<2x128xf32>
    %207 = arith.negf %206 : vector<2x128xf32>
    %208 = math.exp %207 : vector<2x128xf32>
    %cst_55 = arith.constant 1.000000e+00 : f32
    %209 = vector.broadcast %cst_55 : f32 to vector<2x128xf32>
    %210 = arith.addf %209, %208 : vector<2x128xf32>
    %211 = arith.divf %209, %210 : vector<2x128xf32>
    %212 = arith.mulf %203, %184 : vector<2x128xf32>
    %213 = arith.mulf %197, %205 : vector<2x128xf32>
    %214 = arith.addf %212, %213 : vector<2x128xf32>
    %215 = math.tanh %214 : vector<2x128xf32>
    %216 = arith.mulf %211, %215 : vector<2x128xf32>
    %c12 = arith.constant 12 : index
    %c0_56 = arith.constant 0 : index
    %217 = vector.load %arg23[%c12, %c0_56] : memref<16x128xf32, #tpu.memory_space<vmem>>, vector<2x128xf32>
    tpu.vector_store %arg23[%c12, %c0_56], %216 {strides = array<i32>} : memref<16x128xf32, #tpu.memory_space<vmem>>, vector<2x128xf32>,
    %218 = vector.extract_strided_slice %5 {offsets = [14, 0], sizes = [2, 512], strides = [1, 1]} : vector<16x512xf32> to vector<2x512xf32>
    %c0_57 = arith.constant 0 : index
    %c0_58 = arith.constant 0 : index
    %219 = vector.load %arg2[%c0_57, %c0_58] : memref<128x512xf32, #tpu.memory_space<vmem>>, vector<128x512xf32>
    %cst_59 = arith.constant dense<0.000000e+00> : vector<2x512xf32>
    %220 = tpu.matmul %216, %219, %cst_59 {dimension_numbers = #tpu.dot_dimension_numbers<[1], [0], [0], [1], [0, 0, 1, 1], [], []>} : vector<2x128xf32>, vector<128x512xf32>, vector<2x512xf32> -> vector<2x512xf32>
    %221 = arith.addf %218, %220 : vector<2x512xf32>
    %222 = vector.extract_strided_slice %221 {offsets = [0, 0], sizes = [2, 128], strides = [1, 1]} : vector<2x512xf32> to vector<2x128xf32>
    %223 = arith.negf %222 : vector<2x128xf32>
    %224 = math.exp %223 : vector<2x128xf32>
    %cst_60 = arith.constant 1.000000e+00 : f32
    %225 = vector.broadcast %cst_60 : f32 to vector<2x128xf32>
    %226 = arith.addf %225, %224 : vector<2x128xf32>
    %227 = arith.divf %225, %226 : vector<2x128xf32>
    %228 = vector.extract_strided_slice %221 {offsets = [0, 128], sizes = [2, 128], strides = [1, 1]} : vector<2x512xf32> to vector<2x128xf32>
    %229 = arith.negf %228 : vector<2x128xf32>
    %230 = math.exp %229 : vector<2x128xf32>
    %cst_61 = arith.constant 1.000000e+00 : f32
    %231 = vector.broadcast %cst_61 : f32 to vector<2x128xf32>
    %232 = arith.addf %231, %230 : vector<2x128xf32>
    %233 = arith.divf %231, %232 : vector<2x128xf32>
    %234 = vector.extract_strided_slice %221 {offsets = [0, 256], sizes = [2, 128], strides = [1, 1]} : vector<2x512xf32> to vector<2x128xf32>
    %235 = math.tanh %234 : vector<2x128xf32>
    %236 = vector.extract_strided_slice %221 {offsets = [0, 384], sizes = [2, 128], strides = [1, 1]} : vector<2x512xf32> to vector<2x128xf32>
    %237 = arith.negf %236 : vector<2x128xf32>
    %238 = math.exp %237 : vector<2x128xf32>
    %cst_62 = arith.constant 1.000000e+00 : f32
    %239 = vector.broadcast %cst_62 : f32 to vector<2x128xf32>
    %240 = arith.addf %239, %238 : vector<2x128xf32>
    %241 = arith.divf %239, %240 : vector<2x128xf32>
    %242 = arith.mulf %233, %214 : vector<2x128xf32>
    %243 = arith.mulf %227, %235 : vector<2x128xf32>
    %244 = arith.addf %242, %243 : vector<2x128xf32>
    %245 = math.tanh %244 : vector<2x128xf32>
    %246 = arith.mulf %241, %245 : vector<2x128xf32>
    %c14 = arith.constant 14 : index
    %c0_63 = arith.constant 0 : index
    %247 = vector.load %arg23[%c14, %c0_63] : memref<16x128xf32, #tpu.memory_space<vmem>>, vector<2x128xf32>
    tpu.vector_store %arg23[%c14, %c0_63], %246 {strides = array<i32>} : memref<16x128xf32, #tpu.memory_space<vmem>>, vector<2x128xf32>,
    %c0_64 = arith.constant 0 : index
    %c0_65 = arith.constant 0 : index
    %248 = vector.load %arg23[%c0_64, %c0_65] : memref<16x128xf32, #tpu.memory_space<vmem>>, vector<16x128xf32>
    %c0_66 = arith.constant 0 : index
    %c0_67 = arith.constant 0 : index
    %249 = vector.load %arg4[%c0_66, %c0_67] : memref<1x128xf32, #tpu.memory_space<vmem>>, vector<1x128xf32>
    %c0_68 = arith.constant 0 : index
    %c0_69 = arith.constant 0 : index
    %250 = vector.load %arg5[%c0_68, %c0_69] : memref<1x128xf32, #tpu.memory_space<vmem>>, vector<1x128xf32>
    %cst_70 = arith.constant dense<0.000000e+00> : vector<16xf32>
    %251 = vector.multi_reduction <add>, %248, %cst_70 [1] : vector<16x128xf32> to vector<16xf32>
    %252 = vector.shape_cast %251 : vector<16xf32> to vector<16x1xf32>
    %cst_71 = arith.constant 1.280000e+02 : f32
    %253 = vector.broadcast %cst_71 : f32 to vector<16x1xf32>
    %254 = arith.divf %252, %253 : vector<16x1xf32>
    %255 = vector.broadcast %254 : vector<16x1xf32> to vector<16x128xf32>
    %256 = arith.subf %248, %255 : vector<16x128xf32>
    %257 = arith.mulf %256, %256 : vector<16x128xf32>
    %cst_72 = arith.constant dense<0.000000e+00> : vector<16xf32>
    %258 = vector.multi_reduction <add>, %257, %cst_72 [1] : vector<16x128xf32> to vector<16xf32>
    %259 = vector.shape_cast %258 : vector<16xf32> to vector<16x1xf32>
    %cst_73 = arith.constant 1.280000e+02 : f32
    %260 = vector.broadcast %cst_73 : f32 to vector<16x1xf32>
    %261 = arith.divf %259, %260 : vector<16x1xf32>
    %262 = vector.broadcast %254 : vector<16x1xf32> to vector<16x128xf32>
    %263 = arith.subf %248, %262 : vector<16x128xf32>
    %cst_74 = arith.constant 9.99999974E-6 : f32
    %264 = vector.broadcast %cst_74 : f32 to vector<16x1xf32>
    %265 = arith.addf %261, %264 : vector<16x1xf32>
    %266 = math.rsqrt %265 : vector<16x1xf32>
    %267 = vector.broadcast %266 : vector<16x1xf32> to vector<16x128xf32>
    %268 = arith.mulf %263, %267 : vector<16x128xf32>
    %269 = vector.broadcast %249 : vector<1x128xf32> to vector<16x128xf32>
    %270 = arith.mulf %268, %269 : vector<16x128xf32>
    %271 = vector.broadcast %250 : vector<1x128xf32> to vector<16x128xf32>
    %272 = arith.addf %270, %271 : vector<16x128xf32>
    %c0_75 = arith.constant 0 : index
    %c0_76 = arith.constant 0 : index
    %273 = vector.load %arg6[%c0_75, %c0_76] : memref<128x512xf32, #tpu.memory_space<vmem>>, vector<128x512xf32>
    %cst_77 = arith.constant dense<0.000000e+00> : vector<16x512xf32>
    %274 = tpu.matmul %272, %273, %cst_77 {dimension_numbers = #tpu.dot_dimension_numbers<[1], [0], [0], [1], [0, 0, 1, 1], [], []>} : vector<16x128xf32>, vector<128x512xf32>, vector<16x512xf32> -> vector<16x512xf32>
    %c0_78 = arith.constant 0 : index
    %c0_79 = arith.constant 0 : index
    %275 = vector.load %arg8[%c0_78, %c0_79] : memref<1x512xf32, #tpu.memory_space<vmem>>, vector<1x512xf32>
    %276 = vector.broadcast %275 : vector<1x512xf32> to vector<16x512xf32>
    %277 = arith.addf %274, %276 : vector<16x512xf32>
    %cst_80 = arith.constant 0.000000e+00 : f32
    %278 = vector.broadcast %cst_80 : f32 to vector<2x64xf32>
    %cst_81 = arith.constant 0.000000e+00 : f32
    %279 = vector.broadcast %cst_81 : f32 to vector<2x64xf32>
    %280 = vector.extract_strided_slice %277 {offsets = [0, 0], sizes = [2, 512], strides = [1, 1]} : vector<16x512xf32> to vector<2x512xf32>
    %c0_82 = arith.constant 0 : index
    %c0_83 = arith.constant 0 : index
    %281 = vector.load %arg7[%c0_82, %c0_83] : memref<64x512xf32, #tpu.memory_space<vmem>>, vector<64x512xf32>
    %cst_84 = arith.constant dense<0.000000e+00> : vector<2x512xf32>
    %282 = tpu.matmul %278, %281, %cst_84 {dimension_numbers = #tpu.dot_dimension_numbers<[1], [0], [0], [1], [0, 0, 1, 1], [], []>} : vector<2x64xf32>, vector<64x512xf32>, vector<2x512xf32> -> vector<2x512xf32>
    %283 = arith.addf %280, %282 : vector<2x512xf32>
    %284 = vector.extract_strided_slice %283 {offsets = [0, 0], sizes = [2, 64], strides = [1, 1]} : vector<2x512xf32> to vector<2x64xf32>
    %285 = arith.negf %284 : vector<2x64xf32>
    %286 = math.exp %285 : vector<2x64xf32>
    %cst_85 = arith.constant 1.000000e+00 : f32
    %287 = vector.broadcast %cst_85 : f32 to vector<2x64xf32>
    %288 = arith.addf %287, %286 : vector<2x64xf32>
    %289 = arith.divf %287, %288 : vector<2x64xf32>
    %290 = vector.extract_strided_slice %283 {offsets = [0, 128], sizes = [2, 64], strides = [1, 1]} : vector<2x512xf32> to vector<2x64xf32>
    %291 = arith.negf %290 : vector<2x64xf32>
    %292 = math.exp %291 : vector<2x64xf32>
    %cst_86 = arith.constant 1.000000e+00 : f32
    %293 = vector.broadcast %cst_86 : f32 to vector<2x64xf32>
    %294 = arith.addf %293, %292 : vector<2x64xf32>
    %295 = arith.divf %293, %294 : vector<2x64xf32>
    %296 = vector.extract_strided_slice %283 {offsets = [0, 256], sizes = [2, 64], strides = [1, 1]} : vector<2x512xf32> to vector<2x64xf32>
    %297 = math.tanh %296 : vector<2x64xf32>
    %298 = vector.extract_strided_slice %283 {offsets = [0, 384], sizes = [2, 64], strides = [1, 1]} : vector<2x512xf32> to vector<2x64xf32>
    %299 = arith.negf %298 : vector<2x64xf32>
    %300 = math.exp %299 : vector<2x64xf32>
    %cst_87 = arith.constant 1.000000e+00 : f32
    %301 = vector.broadcast %cst_87 : f32 to vector<2x64xf32>
    %302 = arith.addf %301, %300 : vector<2x64xf32>
    %303 = arith.divf %301, %302 : vector<2x64xf32>
    %304 = arith.mulf %295, %279 : vector<2x64xf32>
    %305 = arith.mulf %289, %297 : vector<2x64xf32>
    %306 = arith.addf %304, %305 : vector<2x64xf32>
    %307 = math.tanh %306 : vector<2x64xf32>
    %308 = arith.mulf %303, %307 : vector<2x64xf32>
    %309 = vector.extract_strided_slice %277 {offsets = [2, 0], sizes = [2, 512], strides = [1, 1]} : vector<16x512xf32> to vector<2x512xf32>
    %c0_88 = arith.constant 0 : index
    %c0_89 = arith.constant 0 : index
    %310 = vector.load %arg7[%c0_88, %c0_89] : memref<64x512xf32, #tpu.memory_space<vmem>>, vector<64x512xf32>
    %cst_90 = arith.constant dense<0.000000e+00> : vector<2x512xf32>
    %311 = tpu.matmul %308, %310, %cst_90 {dimension_numbers = #tpu.dot_dimension_numbers<[1], [0], [0], [1], [0, 0, 1, 1], [], []>} : vector<2x64xf32>, vector<64x512xf32>, vector<2x512xf32> -> vector<2x512xf32>
    %312 = arith.addf %309, %311 : vector<2x512xf32>
    %313 = vector.extract_strided_slice %312 {offsets = [0, 0], sizes = [2, 64], strides = [1, 1]} : vector<2x512xf32> to vector<2x64xf32>
    %314 = arith.negf %313 : vector<2x64xf32>
    %315 = math.exp %314 : vector<2x64xf32>
    %cst_91 = arith.constant 1.000000e+00 : f32
    %316 = vector.broadcast %cst_91 : f32 to vector<2x64xf32>
    %317 = arith.addf %316, %315 : vector<2x64xf32>
    %318 = arith.divf %316, %317 : vector<2x64xf32>
    %319 = vector.extract_strided_slice %312 {offsets = [0, 128], sizes = [2, 64], strides = [1, 1]} : vector<2x512xf32> to vector<2x64xf32>
    %320 = arith.negf %319 : vector<2x64xf32>
    %321 = math.exp %320 : vector<2x64xf32>
    %cst_92 = arith.constant 1.000000e+00 : f32
    %322 = vector.broadcast %cst_92 : f32 to vector<2x64xf32>
    %323 = arith.addf %322, %321 : vector<2x64xf32>
    %324 = arith.divf %322, %323 : vector<2x64xf32>
    %325 = vector.extract_strided_slice %312 {offsets = [0, 256], sizes = [2, 64], strides = [1, 1]} : vector<2x512xf32> to vector<2x64xf32>
    %326 = math.tanh %325 : vector<2x64xf32>
    %327 = vector.extract_strided_slice %312 {offsets = [0, 384], sizes = [2, 64], strides = [1, 1]} : vector<2x512xf32> to vector<2x64xf32>
    %328 = arith.negf %327 : vector<2x64xf32>
    %329 = math.exp %328 : vector<2x64xf32>
    %cst_93 = arith.constant 1.000000e+00 : f32
    %330 = vector.broadcast %cst_93 : f32 to vector<2x64xf32>
    %331 = arith.addf %330, %329 : vector<2x64xf32>
    %332 = arith.divf %330, %331 : vector<2x64xf32>
    %333 = arith.mulf %324, %306 : vector<2x64xf32>
    %334 = arith.mulf %318, %326 : vector<2x64xf32>
    %335 = arith.addf %333, %334 : vector<2x64xf32>
    %336 = math.tanh %335 : vector<2x64xf32>
    %337 = arith.mulf %332, %336 : vector<2x64xf32>
    %338 = vector.extract_strided_slice %277 {offsets = [4, 0], sizes = [2, 512], strides = [1, 1]} : vector<16x512xf32> to vector<2x512xf32>
    %c0_94 = arith.constant 0 : index
    %c0_95 = arith.constant 0 : index
    %339 = vector.load %arg7[%c0_94, %c0_95] : memref<64x512xf32, #tpu.memory_space<vmem>>, vector<64x512xf32>
    %cst_96 = arith.constant dense<0.000000e+00> : vector<2x512xf32>
    %340 = tpu.matmul %337, %339, %cst_96 {dimension_numbers = #tpu.dot_dimension_numbers<[1], [0], [0], [1], [0, 0, 1, 1], [], []>} : vector<2x64xf32>, vector<64x512xf32>, vector<2x512xf32> -> vector<2x512xf32>
    %341 = arith.addf %338, %340 : vector<2x512xf32>
    %342 = vector.extract_strided_slice %341 {offsets = [0, 0], sizes = [2, 64], strides = [1, 1]} : vector<2x512xf32> to vector<2x64xf32>
    %343 = arith.negf %342 : vector<2x64xf32>
    %344 = math.exp %343 : vector<2x64xf32>
    %cst_97 = arith.constant 1.000000e+00 : f32
    %345 = vector.broadcast %cst_97 : f32 to vector<2x64xf32>
    %346 = arith.addf %345, %344 : vector<2x64xf32>
    %347 = arith.divf %345, %346 : vector<2x64xf32>
    %348 = vector.extract_strided_slice %341 {offsets = [0, 128], sizes = [2, 64], strides = [1, 1]} : vector<2x512xf32> to vector<2x64xf32>
    %349 = arith.negf %348 : vector<2x64xf32>
    %350 = math.exp %349 : vector<2x64xf32>
    %cst_98 = arith.constant 1.000000e+00 : f32
    %351 = vector.broadcast %cst_98 : f32 to vector<2x64xf32>
    %352 = arith.addf %351, %350 : vector<2x64xf32>
    %353 = arith.divf %351, %352 : vector<2x64xf32>
    %354 = vector.extract_strided_slice %341 {offsets = [0, 256], sizes = [2, 64], strides = [1, 1]} : vector<2x512xf32> to vector<2x64xf32>
    %355 = math.tanh %354 : vector<2x64xf32>
    %356 = vector.extract_strided_slice %341 {offsets = [0, 384], sizes = [2, 64], strides = [1, 1]} : vector<2x512xf32> to vector<2x64xf32>
    %357 = arith.negf %356 : vector<2x64xf32>
    %358 = math.exp %357 : vector<2x64xf32>
    %cst_99 = arith.constant 1.000000e+00 : f32
    %359 = vector.broadcast %cst_99 : f32 to vector<2x64xf32>
    %360 = arith.addf %359, %358 : vector<2x64xf32>
    %361 = arith.divf %359, %360 : vector<2x64xf32>
    %362 = arith.mulf %353, %335 : vector<2x64xf32>
    %363 = arith.mulf %347, %355 : vector<2x64xf32>
    %364 = arith.addf %362, %363 : vector<2x64xf32>
    %365 = math.tanh %364 : vector<2x64xf32>
    %366 = arith.mulf %361, %365 : vector<2x64xf32>
    %367 = vector.extract_strided_slice %277 {offsets = [6, 0], sizes = [2, 512], strides = [1, 1]} : vector<16x512xf32> to vector<2x512xf32>
    %c0_100 = arith.constant 0 : index
    %c0_101 = arith.constant 0 : index
    %368 = vector.load %arg7[%c0_100, %c0_101] : memref<64x512xf32, #tpu.memory_space<vmem>>, vector<64x512xf32>
    %cst_102 = arith.constant dense<0.000000e+00> : vector<2x512xf32>
    %369 = tpu.matmul %366, %368, %cst_102 {dimension_numbers = #tpu.dot_dimension_numbers<[1], [0], [0], [1], [0, 0, 1, 1], [], []>} : vector<2x64xf32>, vector<64x512xf32>, vector<2x512xf32> -> vector<2x512xf32>
    %370 = arith.addf %367, %369 : vector<2x512xf32>
    %371 = vector.extract_strided_slice %370 {offsets = [0, 0], sizes = [2, 64], strides = [1, 1]} : vector<2x512xf32> to vector<2x64xf32>
    %372 = arith.negf %371 : vector<2x64xf32>
    %373 = math.exp %372 : vector<2x64xf32>
    %cst_103 = arith.constant 1.000000e+00 : f32
    %374 = vector.broadcast %cst_103 : f32 to vector<2x64xf32>
    %375 = arith.addf %374, %373 : vector<2x64xf32>
    %376 = arith.divf %374, %375 : vector<2x64xf32>
    %377 = vector.extract_strided_slice %370 {offsets = [0, 128], sizes = [2, 64], strides = [1, 1]} : vector<2x512xf32> to vector<2x64xf32>
    %378 = arith.negf %377 : vector<2x64xf32>
    %379 = math.exp %378 : vector<2x64xf32>
    %cst_104 = arith.constant 1.000000e+00 : f32
    %380 = vector.broadcast %cst_104 : f32 to vector<2x64xf32>
    %381 = arith.addf %380, %379 : vector<2x64xf32>
    %382 = arith.divf %380, %381 : vector<2x64xf32>
    %383 = vector.extract_strided_slice %370 {offsets = [0, 256], sizes = [2, 64], strides = [1, 1]} : vector<2x512xf32> to vector<2x64xf32>
    %384 = math.tanh %383 : vector<2x64xf32>
    %385 = vector.extract_strided_slice %370 {offsets = [0, 384], sizes = [2, 64], strides = [1, 1]} : vector<2x512xf32> to vector<2x64xf32>
    %386 = arith.negf %385 : vector<2x64xf32>
    %387 = math.exp %386 : vector<2x64xf32>
    %cst_105 = arith.constant 1.000000e+00 : f32
    %388 = vector.broadcast %cst_105 : f32 to vector<2x64xf32>
    %389 = arith.addf %388, %387 : vector<2x64xf32>
    %390 = arith.divf %388, %389 : vector<2x64xf32>
    %391 = arith.mulf %382, %364 : vector<2x64xf32>
    %392 = arith.mulf %376, %384 : vector<2x64xf32>
    %393 = arith.addf %391, %392 : vector<2x64xf32>
    %394 = math.tanh %393 : vector<2x64xf32>
    %395 = arith.mulf %390, %394 : vector<2x64xf32>
    %396 = vector.extract_strided_slice %277 {offsets = [8, 0], sizes = [2, 512], strides = [1, 1]} : vector<16x512xf32> to vector<2x512xf32>
    %c0_106 = arith.constant 0 : index
    %c0_107 = arith.constant 0 : index
    %397 = vector.load %arg7[%c0_106, %c0_107] : memref<64x512xf32, #tpu.memory_space<vmem>>, vector<64x512xf32>
    %cst_108 = arith.constant dense<0.000000e+00> : vector<2x512xf32>
    %398 = tpu.matmul %395, %397, %cst_108 {dimension_numbers = #tpu.dot_dimension_numbers<[1], [0], [0], [1], [0, 0, 1, 1], [], []>} : vector<2x64xf32>, vector<64x512xf32>, vector<2x512xf32> -> vector<2x512xf32>
    %399 = arith.addf %396, %398 : vector<2x512xf32>
    %400 = vector.extract_strided_slice %399 {offsets = [0, 0], sizes = [2, 64], strides = [1, 1]} : vector<2x512xf32> to vector<2x64xf32>
    %401 = arith.negf %400 : vector<2x64xf32>
    %402 = math.exp %401 : vector<2x64xf32>
    %cst_109 = arith.constant 1.000000e+00 : f32
    %403 = vector.broadcast %cst_109 : f32 to vector<2x64xf32>
    %404 = arith.addf %403, %402 : vector<2x64xf32>
    %405 = arith.divf %403, %404 : vector<2x64xf32>
    %406 = vector.extract_strided_slice %399 {offsets = [0, 128], sizes = [2, 64], strides = [1, 1]} : vector<2x512xf32> to vector<2x64xf32>
    %407 = arith.negf %406 : vector<2x64xf32>
    %408 = math.exp %407 : vector<2x64xf32>
    %cst_110 = arith.constant 1.000000e+00 : f32
    %409 = vector.broadcast %cst_110 : f32 to vector<2x64xf32>
    %410 = arith.addf %409, %408 : vector<2x64xf32>
    %411 = arith.divf %409, %410 : vector<2x64xf32>
    %412 = vector.extract_strided_slice %399 {offsets = [0, 256], sizes = [2, 64], strides = [1, 1]} : vector<2x512xf32> to vector<2x64xf32>
    %413 = math.tanh %412 : vector<2x64xf32>
    %414 = vector.extract_strided_slice %399 {offsets = [0, 384], sizes = [2, 64], strides = [1, 1]} : vector<2x512xf32> to vector<2x64xf32>
    %415 = arith.negf %414 : vector<2x64xf32>
    %416 = math.exp %415 : vector<2x64xf32>
    %cst_111 = arith.constant 1.000000e+00 : f32
    %417 = vector.broadcast %cst_111 : f32 to vector<2x64xf32>
    %418 = arith.addf %417, %416 : vector<2x64xf32>
    %419 = arith.divf %417, %418 : vector<2x64xf32>
    %420 = arith.mulf %411, %393 : vector<2x64xf32>
    %421 = arith.mulf %405, %413 : vector<2x64xf32>
    %422 = arith.addf %420, %421 : vector<2x64xf32>
    %423 = math.tanh %422 : vector<2x64xf32>
    %424 = arith.mulf %419, %423 : vector<2x64xf32>
    %425 = vector.extract_strided_slice %277 {offsets = [10, 0], sizes = [2, 512], strides = [1, 1]} : vector<16x512xf32> to vector<2x512xf32>
    %c0_112 = arith.constant 0 : index
    %c0_113 = arith.constant 0 : index
    %426 = vector.load %arg7[%c0_112, %c0_113] : memref<64x512xf32, #tpu.memory_space<vmem>>, vector<64x512xf32>
    %cst_114 = arith.constant dense<0.000000e+00> : vector<2x512xf32>
    %427 = tpu.matmul %424, %426, %cst_114 {dimension_numbers = #tpu.dot_dimension_numbers<[1], [0], [0], [1], [0, 0, 1, 1], [], []>} : vector<2x64xf32>, vector<64x512xf32>, vector<2x512xf32> -> vector<2x512xf32>
    %428 = arith.addf %425, %427 : vector<2x512xf32>
    %429 = vector.extract_strided_slice %428 {offsets = [0, 0], sizes = [2, 64], strides = [1, 1]} : vector<2x512xf32> to vector<2x64xf32>
    %430 = arith.negf %429 : vector<2x64xf32>
    %431 = math.exp %430 : vector<2x64xf32>
    %cst_115 = arith.constant 1.000000e+00 : f32
    %432 = vector.broadcast %cst_115 : f32 to vector<2x64xf32>
    %433 = arith.addf %432, %431 : vector<2x64xf32>
    %434 = arith.divf %432, %433 : vector<2x64xf32>
    %435 = vector.extract_strided_slice %428 {offsets = [0, 128], sizes = [2, 64], strides = [1, 1]} : vector<2x512xf32> to vector<2x64xf32>
    %436 = arith.negf %435 : vector<2x64xf32>
    %437 = math.exp %436 : vector<2x64xf32>
    %cst_116 = arith.constant 1.000000e+00 : f32
    %438 = vector.broadcast %cst_116 : f32 to vector<2x64xf32>
    %439 = arith.addf %438, %437 : vector<2x64xf32>
    %440 = arith.divf %438, %439 : vector<2x64xf32>
    %441 = vector.extract_strided_slice %428 {offsets = [0, 256], sizes = [2, 64], strides = [1, 1]} : vector<2x512xf32> to vector<2x64xf32>
    %442 = math.tanh %441 : vector<2x64xf32>
    %443 = vector.extract_strided_slice %428 {offsets = [0, 384], sizes = [2, 64], strides = [1, 1]} : vector<2x512xf32> to vector<2x64xf32>
    %444 = arith.negf %443 : vector<2x64xf32>
    %445 = math.exp %444 : vector<2x64xf32>
    %cst_117 = arith.constant 1.000000e+00 : f32
    %446 = vector.broadcast %cst_117 : f32 to vector<2x64xf32>
    %447 = arith.addf %446, %445 : vector<2x64xf32>
    %448 = arith.divf %446, %447 : vector<2x64xf32>
    %449 = arith.mulf %440, %422 : vector<2x64xf32>
    %450 = arith.mulf %434, %442 : vector<2x64xf32>
    %451 = arith.addf %449, %450 : vector<2x64xf32>
    %452 = math.tanh %451 : vector<2x64xf32>
    %453 = arith.mulf %448, %452 : vector<2x64xf32>
    %454 = vector.extract_strided_slice %277 {offsets = [12, 0], sizes = [2, 512], strides = [1, 1]} : vector<16x512xf32> to vector<2x512xf32>
    %c0_118 = arith.constant 0 : index
    %c0_119 = arith.constant 0 : index
    %455 = vector.load %arg7[%c0_118, %c0_119] : memref<64x512xf32, #tpu.memory_space<vmem>>, vector<64x512xf32>
    %cst_120 = arith.constant dense<0.000000e+00> : vector<2x512xf32>
    %456 = tpu.matmul %453, %455, %cst_120 {dimension_numbers = #tpu.dot_dimension_numbers<[1], [0], [0], [1], [0, 0, 1, 1], [], []>} : vector<2x64xf32>, vector<64x512xf32>, vector<2x512xf32> -> vector<2x512xf32>
    %457 = arith.addf %454, %456 : vector<2x512xf32>
    %458 = vector.extract_strided_slice %457 {offsets = [0, 0], sizes = [2, 64], strides = [1, 1]} : vector<2x512xf32> to vector<2x64xf32>
    %459 = arith.negf %458 : vector<2x64xf32>
    %460 = math.exp %459 : vector<2x64xf32>
    %cst_121 = arith.constant 1.000000e+00 : f32
    %461 = vector.broadcast %cst_121 : f32 to vector<2x64xf32>
    %462 = arith.addf %461, %460 : vector<2x64xf32>
    %463 = arith.divf %461, %462 : vector<2x64xf32>
    %464 = vector.extract_strided_slice %457 {offsets = [0, 128], sizes = [2, 64], strides = [1, 1]} : vector<2x512xf32> to vector<2x64xf32>
    %465 = arith.negf %464 : vector<2x64xf32>
    %466 = math.exp %465 : vector<2x64xf32>
    %cst_122 = arith.constant 1.000000e+00 : f32
    %467 = vector.broadcast %cst_122 : f32 to vector<2x64xf32>
    %468 = arith.addf %467, %466 : vector<2x64xf32>
    %469 = arith.divf %467, %468 : vector<2x64xf32>
    %470 = vector.extract_strided_slice %457 {offsets = [0, 256], sizes = [2, 64], strides = [1, 1]} : vector<2x512xf32> to vector<2x64xf32>
    %471 = math.tanh %470 : vector<2x64xf32>
    %472 = vector.extract_strided_slice %457 {offsets = [0, 384], sizes = [2, 64], strides = [1, 1]} : vector<2x512xf32> to vector<2x64xf32>
    %473 = arith.negf %472 : vector<2x64xf32>
    %474 = math.exp %473 : vector<2x64xf32>
    %cst_123 = arith.constant 1.000000e+00 : f32
    %475 = vector.broadcast %cst_123 : f32 to vector<2x64xf32>
    %476 = arith.addf %475, %474 : vector<2x64xf32>
    %477 = arith.divf %475, %476 : vector<2x64xf32>
    %478 = arith.mulf %469, %451 : vector<2x64xf32>
    %479 = arith.mulf %463, %471 : vector<2x64xf32>
    %480 = arith.addf %478, %479 : vector<2x64xf32>
    %481 = math.tanh %480 : vector<2x64xf32>
    %482 = arith.mulf %477, %481 : vector<2x64xf32>
    %483 = vector.extract_strided_slice %277 {offsets = [14, 0], sizes = [2, 512], strides = [1, 1]} : vector<16x512xf32> to vector<2x512xf32>
    %c0_124 = arith.constant 0 : index
    %c0_125 = arith.constant 0 : index
    %484 = vector.load %arg7[%c0_124, %c0_125] : memref<64x512xf32, #tpu.memory_space<vmem>>, vector<64x512xf32>
    %cst_126 = arith.constant dense<0.000000e+00> : vector<2x512xf32>
    %485 = tpu.matmul %482, %484, %cst_126 {dimension_numbers = #tpu.dot_dimension_numbers<[1], [0], [0], [1], [0, 0, 1, 1], [], []>} : vector<2x64xf32>, vector<64x512xf32>, vector<2x512xf32> -> vector<2x512xf32>
    %486 = arith.addf %483, %485 : vector<2x512xf32>
    %487 = vector.extract_strided_slice %486 {offsets = [0, 0], sizes = [2, 64], strides = [1, 1]} : vector<2x512xf32> to vector<2x64xf32>
    %488 = arith.negf %487 : vector<2x64xf32>
    %489 = math.exp %488 : vector<2x64xf32>
    %cst_127 = arith.constant 1.000000e+00 : f32
    %490 = vector.broadcast %cst_127 : f32 to vector<2x64xf32>
    %491 = arith.addf %490, %489 : vector<2x64xf32>
    %492 = arith.divf %490, %491 : vector<2x64xf32>
    %493 = vector.extract_strided_slice %486 {offsets = [0, 128], sizes = [2, 64], strides = [1, 1]} : vector<2x512xf32> to vector<2x64xf32>
    %494 = arith.negf %493 : vector<2x64xf32>
    %495 = math.exp %494 : vector<2x64xf32>
    %cst_128 = arith.constant 1.000000e+00 : f32
    %496 = vector.broadcast %cst_128 : f32 to vector<2x64xf32>
    %497 = arith.addf %496, %495 : vector<2x64xf32>
    %498 = arith.divf %496, %497 : vector<2x64xf32>
    %499 = vector.extract_strided_slice %486 {offsets = [0, 256], sizes = [2, 64], strides = [1, 1]} : vector<2x512xf32> to vector<2x64xf32>
    %500 = math.tanh %499 : vector<2x64xf32>
    %501 = vector.extract_strided_slice %486 {offsets = [0, 384], sizes = [2, 64], strides = [1, 1]} : vector<2x512xf32> to vector<2x64xf32>
    %502 = arith.negf %501 : vector<2x64xf32>
    %503 = math.exp %502 : vector<2x64xf32>
    %cst_129 = arith.constant 1.000000e+00 : f32
    %504 = vector.broadcast %cst_129 : f32 to vector<2x64xf32>
    %505 = arith.addf %504, %503 : vector<2x64xf32>
    %506 = arith.divf %504, %505 : vector<2x64xf32>
    %507 = arith.mulf %498, %480 : vector<2x64xf32>
    %508 = arith.mulf %492, %500 : vector<2x64xf32>
    %509 = arith.addf %507, %508 : vector<2x64xf32>
    %510 = math.tanh %509 : vector<2x64xf32>
    %511 = arith.mulf %506, %510 : vector<2x64xf32>
    %c0_130 = arith.constant 0 : index
    %c0_131 = arith.constant 0 : index
    %512 = vector.load %arg9[%c0_130, %c0_131] : memref<1x64xf32, #tpu.memory_space<vmem>>, vector<1x64xf32>
    %c0_132 = arith.constant 0 : index
    %c0_133 = arith.constant 0 : index
    %513 = vector.load %arg10[%c0_132, %c0_133] : memref<1x64xf32, #tpu.memory_space<vmem>>, vector<1x64xf32>
    %cst_134 = arith.constant dense<0.000000e+00> : vector<2xf32>
    %514 = vector.multi_reduction <add>, %511, %cst_134 [1] : vector<2x64xf32> to vector<2xf32>
    %515 = vector.shape_cast %514 : vector<2xf32> to vector<2x1xf32>
    %cst_135 = arith.constant 6.400000e+01 : f32
    %516 = vector.broadcast %cst_135 : f32 to vector<2x1xf32>
    %517 = arith.divf %515, %516 : vector<2x1xf32>
    %518 = vector.broadcast %517 : vector<2x1xf32> to vector<2x64xf32>
    %519 = arith.subf %511, %518 : vector<2x64xf32>
    %520 = arith.mulf %519, %519 : vector<2x64xf32>
    %cst_136 = arith.constant dense<0.000000e+00> : vector<2xf32>
    %521 = vector.multi_reduction <add>, %520, %cst_136 [1] : vector<2x64xf32> to vector<2xf32>
    %522 = vector.shape_cast %521 : vector<2xf32> to vector<2x1xf32>
    %cst_137 = arith.constant 6.400000e+01 : f32
    %523 = vector.broadcast %cst_137 : f32 to vector<2x1xf32>
    %524 = arith.divf %522, %523 : vector<2x1xf32>
    %525 = vector.broadcast %517 : vector<2x1xf32> to vector<2x64xf32>
    %526 = arith.subf %511, %525 : vector<2x64xf32>
    %cst_138 = arith.constant 9.99999974E-6 : f32
    %527 = vector.broadcast %cst_138 : f32 to vector<2x1xf32>
    %528 = arith.addf %524, %527 : vector<2x1xf32>
    %529 = math.rsqrt %528 : vector<2x1xf32>
    %530 = vector.broadcast %529 : vector<2x1xf32> to vector<2x64xf32>
    %531 = arith.mulf %526, %530 : vector<2x64xf32>
    %532 = vector.broadcast %512 : vector<1x64xf32> to vector<2x64xf32>
    %533 = arith.mulf %531, %532 : vector<2x64xf32>
    %534 = vector.broadcast %513 : vector<1x64xf32> to vector<2x64xf32>
    %535 = arith.addf %533, %534 : vector<2x64xf32>
    %c0_139 = arith.constant 0 : index
    %c0_140 = arith.constant 0 : index
    %536 = vector.load %arg11[%c0_139, %c0_140] : memref<64x512xf32, #tpu.memory_space<vmem>>, vector<64x512xf32>
    %cst_141 = arith.constant dense<0.000000e+00> : vector<2x512xf32>
    %537 = tpu.matmul %535, %536, %cst_141 {dimension_numbers = #tpu.dot_dimension_numbers<[1], [0], [0], [1], [0, 0, 1, 1], [], []>} : vector<2x64xf32>, vector<64x512xf32>, vector<2x512xf32> -> vector<2x512xf32>
    %c0_142 = arith.constant 0 : index
    %c0_143 = arith.constant 0 : index
    %538 = vector.load %arg13[%c0_142, %c0_143] : memref<1x512xf32, #tpu.memory_space<vmem>>, vector<1x512xf32>
    %539 = vector.broadcast %538 : vector<1x512xf32> to vector<2x512xf32>
    %540 = arith.addf %537, %539 : vector<2x512xf32>
    %cst_144 = arith.constant 0.000000e+00 : f32
    %541 = vector.broadcast %cst_144 : f32 to vector<2x32xf32>
    %cst_145 = arith.constant 0.000000e+00 : f32
    %542 = vector.broadcast %cst_145 : f32 to vector<2x32xf32>
    %c0_146 = arith.constant 0 : index
    %c0_147 = arith.constant 0 : index
    %543 = vector.load %arg12[%c0_146, %c0_147] : memref<32x512xf32, #tpu.memory_space<vmem>>, vector<32x512xf32>
    %cst_148 = arith.constant dense<0.000000e+00> : vector<2x512xf32>
    %544 = tpu.matmul %541, %543, %cst_148 {dimension_numbers = #tpu.dot_dimension_numbers<[1], [0], [0], [1], [0, 0, 1, 1], [], []>} : vector<2x32xf32>, vector<32x512xf32>, vector<2x512xf32> -> vector<2x512xf32>
    %545 = arith.addf %540, %544 : vector<2x512xf32>
    %546 = vector.extract_strided_slice %545 {offsets = [0, 0], sizes = [2, 32], strides = [1, 1]} : vector<2x512xf32> to vector<2x32xf32>
    %547 = arith.negf %546 : vector<2x32xf32>
    %548 = math.exp %547 : vector<2x32xf32>
    %cst_149 = arith.constant 1.000000e+00 : f32
    %549 = vector.broadcast %cst_149 : f32 to vector<2x32xf32>
    %550 = arith.addf %549, %548 : vector<2x32xf32>
    %551 = arith.divf %549, %550 : vector<2x32xf32>
    %552 = vector.extract_strided_slice %545 {offsets = [0, 128], sizes = [2, 32], strides = [1, 1]} : vector<2x512xf32> to vector<2x32xf32>
    %553 = arith.negf %552 : vector<2x32xf32>
    %554 = math.exp %553 : vector<2x32xf32>
    %cst_150 = arith.constant 1.000000e+00 : f32
    %555 = vector.broadcast %cst_150 : f32 to vector<2x32xf32>
    %556 = arith.addf %555, %554 : vector<2x32xf32>
    %557 = arith.divf %555, %556 : vector<2x32xf32>
    %558 = vector.extract_strided_slice %545 {offsets = [0, 256], sizes = [2, 32], strides = [1, 1]} : vector<2x512xf32> to vector<2x32xf32>
    %559 = math.tanh %558 : vector<2x32xf32>
    %560 = vector.extract_strided_slice %545 {offsets = [0, 384], sizes = [2, 32], strides = [1, 1]} : vector<2x512xf32> to vector<2x32xf32>
    %561 = arith.negf %560 : vector<2x32xf32>
    %562 = math.exp %561 : vector<2x32xf32>
    %cst_151 = arith.constant 1.000000e+00 : f32
    %563 = vector.broadcast %cst_151 : f32 to vector<2x32xf32>
    %564 = arith.addf %563, %562 : vector<2x32xf32>
    %565 = arith.divf %563, %564 : vector<2x32xf32>
    %566 = arith.mulf %557, %542 : vector<2x32xf32>
    %567 = arith.mulf %551, %559 : vector<2x32xf32>
    %568 = arith.addf %566, %567 : vector<2x32xf32>
    %569 = math.tanh %568 : vector<2x32xf32>
    %570 = arith.mulf %565, %569 : vector<2x32xf32>
    %c0_152 = arith.constant 0 : index
    %c0_153 = arith.constant 0 : index
    %571 = vector.load %arg14[%c0_152, %c0_153] : memref<1x32xf32, #tpu.memory_space<vmem>>, vector<1x32xf32>
    %c0_154 = arith.constant 0 : index
    %c0_155 = arith.constant 0 : index
    %572 = vector.load %arg15[%c0_154, %c0_155] : memref<1x32xf32, #tpu.memory_space<vmem>>, vector<1x32xf32>
    %cst_156 = arith.constant dense<0.000000e+00> : vector<2xf32>
    %573 = vector.multi_reduction <add>, %570, %cst_156 [1] : vector<2x32xf32> to vector<2xf32>
    %574 = vector.shape_cast %573 : vector<2xf32> to vector<2x1xf32>
    %cst_157 = arith.constant 3.200000e+01 : f32
    %575 = vector.broadcast %cst_157 : f32 to vector<2x1xf32>
    %576 = arith.divf %574, %575 : vector<2x1xf32>
    %577 = vector.broadcast %576 : vector<2x1xf32> to vector<2x32xf32>
    %578 = arith.subf %570, %577 : vector<2x32xf32>
    %579 = arith.mulf %578, %578 : vector<2x32xf32>
    %cst_158 = arith.constant dense<0.000000e+00> : vector<2xf32>
    %580 = vector.multi_reduction <add>, %579, %cst_158 [1] : vector<2x32xf32> to vector<2xf32>
    %581 = vector.shape_cast %580 : vector<2xf32> to vector<2x1xf32>
    %cst_159 = arith.constant 3.200000e+01 : f32
    %582 = vector.broadcast %cst_159 : f32 to vector<2x1xf32>
    %583 = arith.divf %581, %582 : vector<2x1xf32>
    %584 = vector.broadcast %576 : vector<2x1xf32> to vector<2x32xf32>
    %585 = arith.subf %570, %584 : vector<2x32xf32>
    %cst_160 = arith.constant 9.99999974E-6 : f32
    %586 = vector.broadcast %cst_160 : f32 to vector<2x1xf32>
    %587 = arith.addf %583, %586 : vector<2x1xf32>
    %588 = math.rsqrt %587 : vector<2x1xf32>
    %589 = vector.broadcast %588 : vector<2x1xf32> to vector<2x32xf32>
    %590 = arith.mulf %585, %589 : vector<2x32xf32>
    %591 = vector.broadcast %571 : vector<1x32xf32> to vector<2x32xf32>
    %592 = arith.mulf %590, %591 : vector<2x32xf32>
    %593 = vector.broadcast %572 : vector<1x32xf32> to vector<2x32xf32>
    %594 = arith.addf %592, %593 : vector<2x32xf32>
    %c0_161 = arith.constant 0 : index
    %c0_162 = arith.constant 0 : index
    %595 = vector.load %arg16[%c0_161, %c0_162] : memref<32x16xf32, #tpu.memory_space<vmem>>, vector<32x16xf32>
    %cst_163 = arith.constant dense<0.000000e+00> : vector<2x16xf32>
    %596 = tpu.matmul %594, %595, %cst_163 {dimension_numbers = #tpu.dot_dimension_numbers<[1], [0], [0], [1], [0, 0, 1, 1], [], []>} : vector<2x32xf32>, vector<32x16xf32>, vector<2x16xf32> -> vector<2x16xf32>
    %c0_164 = arith.constant 0 : index
    %c0_165 = arith.constant 0 : index
    %597 = vector.load %arg17[%c0_164, %c0_165] : memref<1x16xf32, #tpu.memory_space<vmem>>, vector<1x16xf32>
    %598 = vector.broadcast %597 : vector<1x16xf32> to vector<2x16xf32>
    %599 = arith.addf %596, %598 : vector<2x16xf32>
    %600 = math.tanh %599 : vector<2x16xf32>
    %c0_166 = arith.constant 0 : index
    %c0_167 = arith.constant 0 : index
    %601 = vector.load %arg18[%c0_166, %c0_167] : memref<1x16xf32, #tpu.memory_space<vmem>>, vector<1x16xf32>
    %c0_168 = arith.constant 0 : index
    %c0_169 = arith.constant 0 : index
    %602 = vector.load %arg19[%c0_168, %c0_169] : memref<1x16xf32, #tpu.memory_space<vmem>>, vector<1x16xf32>
    %cst_170 = arith.constant dense<0.000000e+00> : vector<2xf32>
    %603 = vector.multi_reduction <add>, %600, %cst_170 [1] : vector<2x16xf32> to vector<2xf32>
    %604 = vector.shape_cast %603 : vector<2xf32> to vector<2x1xf32>
    %cst_171 = arith.constant 1.600000e+01 : f32
    %605 = vector.broadcast %cst_171 : f32 to vector<2x1xf32>
    %606 = arith.divf %604, %605 : vector<2x1xf32>
    %607 = vector.broadcast %606 : vector<2x1xf32> to vector<2x16xf32>
    %608 = arith.subf %600, %607 : vector<2x16xf32>
    %609 = arith.mulf %608, %608 : vector<2x16xf32>
    %cst_172 = arith.constant dense<0.000000e+00> : vector<2xf32>
    %610 = vector.multi_reduction <add>, %609, %cst_172 [1] : vector<2x16xf32> to vector<2xf32>
    %611 = vector.shape_cast %610 : vector<2xf32> to vector<2x1xf32>
    %cst_173 = arith.constant 1.600000e+01 : f32
    %612 = vector.broadcast %cst_173 : f32 to vector<2x1xf32>
    %613 = arith.divf %611, %612 : vector<2x1xf32>
    %614 = vector.broadcast %606 : vector<2x1xf32> to vector<2x16xf32>
    %615 = arith.subf %600, %614 : vector<2x16xf32>
    %cst_174 = arith.constant 9.99999974E-6 : f32
    %616 = vector.broadcast %cst_174 : f32 to vector<2x1xf32>
    %617 = arith.addf %613, %616 : vector<2x1xf32>
    %618 = math.rsqrt %617 : vector<2x1xf32>
    %619 = vector.broadcast %618 : vector<2x1xf32> to vector<2x16xf32>
    %620 = arith.mulf %615, %619 : vector<2x16xf32>
    %621 = vector.broadcast %601 : vector<1x16xf32> to vector<2x16xf32>
    %622 = arith.mulf %620, %621 : vector<2x16xf32>
    %623 = vector.broadcast %602 : vector<1x16xf32> to vector<2x16xf32>
    %624 = arith.addf %622, %623 : vector<2x16xf32>
    %c0_175 = arith.constant 0 : index
    %c0_176 = arith.constant 0 : index
    %625 = vector.load %arg20[%c0_175, %c0_176] : memref<16x128xf32, #tpu.memory_space<vmem>>, vector<16x128xf32>
    %cst_177 = arith.constant dense<0.000000e+00> : vector<2x128xf32>
    %626 = tpu.matmul %624, %625, %cst_177 {dimension_numbers = #tpu.dot_dimension_numbers<[1], [0], [0], [1], [0, 0, 1, 1], [], []>} : vector<2x16xf32>, vector<16x128xf32>, vector<2x128xf32> -> vector<2x128xf32>
    %c0_178 = arith.constant 0 : index
    %c0_179 = arith.constant 0 : index
    %627 = vector.load %arg21[%c0_178, %c0_179] : memref<1x128xf32, #tpu.memory_space<vmem>>, vector<1x128xf32>
    %628 = vector.broadcast %627 : vector<1x128xf32> to vector<2x128xf32>
    %629 = arith.addf %626, %628 : vector<2x128xf32>
    %c0_180 = arith.constant 0 : index
    %c0_181 = arith.constant 0 : index
    %630 = vector.load %arg22[%c0_180, %c0_181] : memref<6x128xf32, #tpu.memory_space<vmem>>, vector<2x128xf32>
    tpu.vector_store %arg22[%c0_180, %c0_181], %629 {strides = array<i32>} : memref<6x128xf32, #tpu.memory_space<vmem>>, vector<2x128xf32>,
    %c0_182 = arith.constant 0 : index
    %c0_183 = arith.constant 0 : index
    %631 = vector.load %arg12[%c0_182, %c0_183] : memref<32x512xf32, #tpu.memory_space<vmem>>, vector<32x512xf32>
    %cst_184 = arith.constant dense<0.000000e+00> : vector<2x512xf32>
    %632 = tpu.matmul %570, %631, %cst_184 {dimension_numbers = #tpu.dot_dimension_numbers<[1], [0], [0], [1], [0, 0, 1, 1], [], []>} : vector<2x32xf32>, vector<32x512xf32>, vector<2x512xf32> -> vector<2x512xf32>
    %633 = arith.addf %540, %632 : vector<2x512xf32>
    %634 = vector.extract_strided_slice %633 {offsets = [0, 0], sizes = [2, 32], strides = [1, 1]} : vector<2x512xf32> to vector<2x32xf32>
    %635 = arith.negf %634 : vector<2x32xf32>
    %636 = math.exp %635 : vector<2x32xf32>
    %cst_185 = arith.constant 1.000000e+00 : f32
    %637 = vector.broadcast %cst_185 : f32 to vector<2x32xf32>
    %638 = arith.addf %637, %636 : vector<2x32xf32>
    %639 = arith.divf %637, %638 : vector<2x32xf32>
    %640 = vector.extract_strided_slice %633 {offsets = [0, 128], sizes = [2, 32], strides = [1, 1]} : vector<2x512xf32> to vector<2x32xf32>
    %641 = arith.negf %640 : vector<2x32xf32>
    %642 = math.exp %641 : vector<2x32xf32>
    %cst_186 = arith.constant 1.000000e+00 : f32
    %643 = vector.broadcast %cst_186 : f32 to vector<2x32xf32>
    %644 = arith.addf %643, %642 : vector<2x32xf32>
    %645 = arith.divf %643, %644 : vector<2x32xf32>
    %646 = vector.extract_strided_slice %633 {offsets = [0, 256], sizes = [2, 32], strides = [1, 1]} : vector<2x512xf32> to vector<2x32xf32>
    %647 = math.tanh %646 : vector<2x32xf32>
    %648 = vector.extract_strided_slice %633 {offsets = [0, 384], sizes = [2, 32], strides = [1, 1]} : vector<2x512xf32> to vector<2x32xf32>
    %649 = arith.negf %648 : vector<2x32xf32>
    %650 = math.exp %649 : vector<2x32xf32>
    %cst_187 = arith.constant 1.000000e+00 : f32
    %651 = vector.broadcast %cst_187 : f32 to vector<2x32xf32>
    %652 = arith.addf %651, %650 : vector<2x32xf32>
    %653 = arith.divf %651, %652 : vector<2x32xf32>
    %654 = arith.mulf %645, %568 : vector<2x32xf32>
    %655 = arith.mulf %639, %647 : vector<2x32xf32>
    %656 = arith.addf %654, %655 : vector<2x32xf32>
    %657 = math.tanh %656 : vector<2x32xf32>
    %658 = arith.mulf %653, %657 : vector<2x32xf32>
    %c0_188 = arith.constant 0 : index
    %c0_189 = arith.constant 0 : index
    %659 = vector.load %arg14[%c0_188, %c0_189] : memref<1x32xf32, #tpu.memory_space<vmem>>, vector<1x32xf32>
    %c0_190 = arith.constant 0 : index
    %c0_191 = arith.constant 0 : index
    %660 = vector.load %arg15[%c0_190, %c0_191] : memref<1x32xf32, #tpu.memory_space<vmem>>, vector<1x32xf32>
    %cst_192 = arith.constant dense<0.000000e+00> : vector<2xf32>
    %661 = vector.multi_reduction <add>, %658, %cst_192 [1] : vector<2x32xf32> to vector<2xf32>
    %662 = vector.shape_cast %661 : vector<2xf32> to vector<2x1xf32>
    %cst_193 = arith.constant 3.200000e+01 : f32
    %663 = vector.broadcast %cst_193 : f32 to vector<2x1xf32>
    %664 = arith.divf %662, %663 : vector<2x1xf32>
    %665 = vector.broadcast %664 : vector<2x1xf32> to vector<2x32xf32>
    %666 = arith.subf %658, %665 : vector<2x32xf32>
    %667 = arith.mulf %666, %666 : vector<2x32xf32>
    %cst_194 = arith.constant dense<0.000000e+00> : vector<2xf32>
    %668 = vector.multi_reduction <add>, %667, %cst_194 [1] : vector<2x32xf32> to vector<2xf32>
    %669 = vector.shape_cast %668 : vector<2xf32> to vector<2x1xf32>
    %cst_195 = arith.constant 3.200000e+01 : f32
    %670 = vector.broadcast %cst_195 : f32 to vector<2x1xf32>
    %671 = arith.divf %669, %670 : vector<2x1xf32>
    %672 = vector.broadcast %664 : vector<2x1xf32> to vector<2x32xf32>
    %673 = arith.subf %658, %672 : vector<2x32xf32>
    %cst_196 = arith.constant 9.99999974E-6 : f32
    %674 = vector.broadcast %cst_196 : f32 to vector<2x1xf32>
    %675 = arith.addf %671, %674 : vector<2x1xf32>
    %676 = math.rsqrt %675 : vector<2x1xf32>
    %677 = vector.broadcast %676 : vector<2x1xf32> to vector<2x32xf32>
    %678 = arith.mulf %673, %677 : vector<2x32xf32>
    %679 = vector.broadcast %659 : vector<1x32xf32> to vector<2x32xf32>
    %680 = arith.mulf %678, %679 : vector<2x32xf32>
    %681 = vector.broadcast %660 : vector<1x32xf32> to vector<2x32xf32>
    %682 = arith.addf %680, %681 : vector<2x32xf32>
    %c0_197 = arith.constant 0 : index
    %c0_198 = arith.constant 0 : index
    %683 = vector.load %arg16[%c0_197, %c0_198] : memref<32x16xf32, #tpu.memory_space<vmem>>, vector<32x16xf32>
    %cst_199 = arith.constant dense<0.000000e+00> : vector<2x16xf32>
    %684 = tpu.matmul %682, %683, %cst_199 {dimension_numbers = #tpu.dot_dimension_numbers<[1], [0], [0], [1], [0, 0, 1, 1], [], []>} : vector<2x32xf32>, vector<32x16xf32>, vector<2x16xf32> -> vector<2x16xf32>
    %c0_200 = arith.constant 0 : index
    %c0_201 = arith.constant 0 : index
    %685 = vector.load %arg17[%c0_200, %c0_201] : memref<1x16xf32, #tpu.memory_space<vmem>>, vector<1x16xf32>
    %686 = vector.broadcast %685 : vector<1x16xf32> to vector<2x16xf32>
    %687 = arith.addf %684, %686 : vector<2x16xf32>
    %688 = math.tanh %687 : vector<2x16xf32>
    %c0_202 = arith.constant 0 : index
    %c0_203 = arith.constant 0 : index
    %689 = vector.load %arg18[%c0_202, %c0_203] : memref<1x16xf32, #tpu.memory_space<vmem>>, vector<1x16xf32>
    %c0_204 = arith.constant 0 : index
    %c0_205 = arith.constant 0 : index
    %690 = vector.load %arg19[%c0_204, %c0_205] : memref<1x16xf32, #tpu.memory_space<vmem>>, vector<1x16xf32>
    %cst_206 = arith.constant dense<0.000000e+00> : vector<2xf32>
    %691 = vector.multi_reduction <add>, %688, %cst_206 [1] : vector<2x16xf32> to vector<2xf32>
    %692 = vector.shape_cast %691 : vector<2xf32> to vector<2x1xf32>
    %cst_207 = arith.constant 1.600000e+01 : f32
    %693 = vector.broadcast %cst_207 : f32 to vector<2x1xf32>
    %694 = arith.divf %692, %693 : vector<2x1xf32>
    %695 = vector.broadcast %694 : vector<2x1xf32> to vector<2x16xf32>
    %696 = arith.subf %688, %695 : vector<2x16xf32>
    %697 = arith.mulf %696, %696 : vector<2x16xf32>
    %cst_208 = arith.constant dense<0.000000e+00> : vector<2xf32>
    %698 = vector.multi_reduction <add>, %697, %cst_208 [1] : vector<2x16xf32> to vector<2xf32>
    %699 = vector.shape_cast %698 : vector<2xf32> to vector<2x1xf32>
    %cst_209 = arith.constant 1.600000e+01 : f32
    %700 = vector.broadcast %cst_209 : f32 to vector<2x1xf32>
    %701 = arith.divf %699, %700 : vector<2x1xf32>
    %702 = vector.broadcast %694 : vector<2x1xf32> to vector<2x16xf32>
    %703 = arith.subf %688, %702 : vector<2x16xf32>
    %cst_210 = arith.constant 9.99999974E-6 : f32
    %704 = vector.broadcast %cst_210 : f32 to vector<2x1xf32>
    %705 = arith.addf %701, %704 : vector<2x1xf32>
    %706 = math.rsqrt %705 : vector<2x1xf32>
    %707 = vector.broadcast %706 : vector<2x1xf32> to vector<2x16xf32>
    %708 = arith.mulf %703, %707 : vector<2x16xf32>
    %709 = vector.broadcast %689 : vector<1x16xf32> to vector<2x16xf32>
    %710 = arith.mulf %708, %709 : vector<2x16xf32>
    %711 = vector.broadcast %690 : vector<1x16xf32> to vector<2x16xf32>
    %712 = arith.addf %710, %711 : vector<2x16xf32>
    %c0_211 = arith.constant 0 : index
    %c0_212 = arith.constant 0 : index
    %713 = vector.load %arg20[%c0_211, %c0_212] : memref<16x128xf32, #tpu.memory_space<vmem>>, vector<16x128xf32>
    %cst_213 = arith.constant dense<0.000000e+00> : vector<2x128xf32>
    %714 = tpu.matmul %712, %713, %cst_213 {dimension_numbers = #tpu.dot_dimension_numbers<[1], [0], [0], [1], [0, 0, 1, 1], [], []>} : vector<2x16xf32>, vector<16x128xf32>, vector<2x128xf32> -> vector<2x128xf32>
    %c0_214 = arith.constant 0 : index
    %c0_215 = arith.constant 0 : index
    %715 = vector.load %arg21[%c0_214, %c0_215] : memref<1x128xf32, #tpu.memory_space<vmem>>, vector<1x128xf32>
    %716 = vector.broadcast %715 : vector<1x128xf32> to vector<2x128xf32>
    %717 = arith.addf %714, %716 : vector<2x128xf32>
    %c2_216 = arith.constant 2 : index
    %c0_217 = arith.constant 0 : index
    %718 = vector.load %arg22[%c2_216, %c0_217] : memref<6x128xf32, #tpu.memory_space<vmem>>, vector<2x128xf32>
    tpu.vector_store %arg22[%c2_216, %c0_217], %717 {strides = array<i32>} : memref<6x128xf32, #tpu.memory_space<vmem>>, vector<2x128xf32>,
    %c0_218 = arith.constant 0 : index
    %c0_219 = arith.constant 0 : index
    %719 = vector.load %arg12[%c0_218, %c0_219] : memref<32x512xf32, #tpu.memory_space<vmem>>, vector<32x512xf32>
    %cst_220 = arith.constant dense<0.000000e+00> : vector<2x512xf32>
    %720 = tpu.matmul %658, %719, %cst_220 {dimension_numbers = #tpu.dot_dimension_numbers<[1], [0], [0], [1], [0, 0, 1, 1], [], []>} : vector<2x32xf32>, vector<32x512xf32>, vector<2x512xf32> -> vector<2x512xf32>
    %721 = arith.addf %540, %720 : vector<2x512xf32>
    %722 = vector.extract_strided_slice %721 {offsets = [0, 0], sizes = [2, 32], strides = [1, 1]} : vector<2x512xf32> to vector<2x32xf32>
    %723 = arith.negf %722 : vector<2x32xf32>
    %724 = math.exp %723 : vector<2x32xf32>
    %cst_221 = arith.constant 1.000000e+00 : f32
    %725 = vector.broadcast %cst_221 : f32 to vector<2x32xf32>
    %726 = arith.addf %725, %724 : vector<2x32xf32>
    %727 = arith.divf %725, %726 : vector<2x32xf32>
    %728 = vector.extract_strided_slice %721 {offsets = [0, 128], sizes = [2, 32], strides = [1, 1]} : vector<2x512xf32> to vector<2x32xf32>
    %729 = arith.negf %728 : vector<2x32xf32>
    %730 = math.exp %729 : vector<2x32xf32>
    %cst_222 = arith.constant 1.000000e+00 : f32
    %731 = vector.broadcast %cst_222 : f32 to vector<2x32xf32>
    %732 = arith.addf %731, %730 : vector<2x32xf32>
    %733 = arith.divf %731, %732 : vector<2x32xf32>
    %734 = vector.extract_strided_slice %721 {offsets = [0, 256], sizes = [2, 32], strides = [1, 1]} : vector<2x512xf32> to vector<2x32xf32>
    %735 = math.tanh %734 : vector<2x32xf32>
    %736 = vector.extract_strided_slice %721 {offsets = [0, 384], sizes = [2, 32], strides = [1, 1]} : vector<2x512xf32> to vector<2x32xf32>
    %737 = arith.negf %736 : vector<2x32xf32>
    %738 = math.exp %737 : vector<2x32xf32>
    %cst_223 = arith.constant 1.000000e+00 : f32
    %739 = vector.broadcast %cst_223 : f32 to vector<2x32xf32>
    %740 = arith.addf %739, %738 : vector<2x32xf32>
    %741 = arith.divf %739, %740 : vector<2x32xf32>
    %742 = arith.mulf %733, %656 : vector<2x32xf32>
    %743 = arith.mulf %727, %735 : vector<2x32xf32>
    %744 = arith.addf %742, %743 : vector<2x32xf32>
    %745 = math.tanh %744 : vector<2x32xf32>
    %746 = arith.mulf %741, %745 : vector<2x32xf32>
    %c0_224 = arith.constant 0 : index
    %c0_225 = arith.constant 0 : index
    %747 = vector.load %arg14[%c0_224, %c0_225] : memref<1x32xf32, #tpu.memory_space<vmem>>, vector<1x32xf32>
    %c0_226 = arith.constant 0 : index
    %c0_227 = arith.constant 0 : index
    %748 = vector.load %arg15[%c0_226, %c0_227] : memref<1x32xf32, #tpu.memory_space<vmem>>, vector<1x32xf32>
    %cst_228 = arith.constant dense<0.000000e+00> : vector<2xf32>
    %749 = vector.multi_reduction <add>, %746, %cst_228 [1] : vector<2x32xf32> to vector<2xf32>
    %750 = vector.shape_cast %749 : vector<2xf32> to vector<2x1xf32>
    %cst_229 = arith.constant 3.200000e+01 : f32
    %751 = vector.broadcast %cst_229 : f32 to vector<2x1xf32>
    %752 = arith.divf %750, %751 : vector<2x1xf32>
    %753 = vector.broadcast %752 : vector<2x1xf32> to vector<2x32xf32>
    %754 = arith.subf %746, %753 : vector<2x32xf32>
    %755 = arith.mulf %754, %754 : vector<2x32xf32>
    %cst_230 = arith.constant dense<0.000000e+00> : vector<2xf32>
    %756 = vector.multi_reduction <add>, %755, %cst_230 [1] : vector<2x32xf32> to vector<2xf32>
    %757 = vector.shape_cast %756 : vector<2xf32> to vector<2x1xf32>
    %cst_231 = arith.constant 3.200000e+01 : f32
    %758 = vector.broadcast %cst_231 : f32 to vector<2x1xf32>
    %759 = arith.divf %757, %758 : vector<2x1xf32>
    %760 = vector.broadcast %752 : vector<2x1xf32> to vector<2x32xf32>
    %761 = arith.subf %746, %760 : vector<2x32xf32>
    %cst_232 = arith.constant 9.99999974E-6 : f32
    %762 = vector.broadcast %cst_232 : f32 to vector<2x1xf32>
    %763 = arith.addf %759, %762 : vector<2x1xf32>
    %764 = math.rsqrt %763 : vector<2x1xf32>
    %765 = vector.broadcast %764 : vector<2x1xf32> to vector<2x32xf32>
    %766 = arith.mulf %761, %765 : vector<2x32xf32>
    %767 = vector.broadcast %747 : vector<1x32xf32> to vector<2x32xf32>
    %768 = arith.mulf %766, %767 : vector<2x32xf32>
    %769 = vector.broadcast %748 : vector<1x32xf32> to vector<2x32xf32>
    %770 = arith.addf %768, %769 : vector<2x32xf32>
    %c0_233 = arith.constant 0 : index
    %c0_234 = arith.constant 0 : index
    %771 = vector.load %arg16[%c0_233, %c0_234] : memref<32x16xf32, #tpu.memory_space<vmem>>, vector<32x16xf32>
    %cst_235 = arith.constant dense<0.000000e+00> : vector<2x16xf32>
    %772 = tpu.matmul %770, %771, %cst_235 {dimension_numbers = #tpu.dot_dimension_numbers<[1], [0], [0], [1], [0, 0, 1, 1], [], []>} : vector<2x32xf32>, vector<32x16xf32>, vector<2x16xf32> -> vector<2x16xf32>
    %c0_236 = arith.constant 0 : index
    %c0_237 = arith.constant 0 : index
    %773 = vector.load %arg17[%c0_236, %c0_237] : memref<1x16xf32, #tpu.memory_space<vmem>>, vector<1x16xf32>
    %774 = vector.broadcast %773 : vector<1x16xf32> to vector<2x16xf32>
    %775 = arith.addf %772, %774 : vector<2x16xf32>
    %776 = math.tanh %775 : vector<2x16xf32>
    %c0_238 = arith.constant 0 : index
    %c0_239 = arith.constant 0 : index
    %777 = vector.load %arg18[%c0_238, %c0_239] : memref<1x16xf32, #tpu.memory_space<vmem>>, vector<1x16xf32>
    %c0_240 = arith.constant 0 : index
    %c0_241 = arith.constant 0 : index
    %778 = vector.load %arg19[%c0_240, %c0_241] : memref<1x16xf32, #tpu.memory_space<vmem>>, vector<1x16xf32>
    %cst_242 = arith.constant dense<0.000000e+00> : vector<2xf32>
    %779 = vector.multi_reduction <add>, %776, %cst_242 [1] : vector<2x16xf32> to vector<2xf32>
    %780 = vector.shape_cast %779 : vector<2xf32> to vector<2x1xf32>
    %cst_243 = arith.constant 1.600000e+01 : f32
    %781 = vector.broadcast %cst_243 : f32 to vector<2x1xf32>
    %782 = arith.divf %780, %781 : vector<2x1xf32>
    %783 = vector.broadcast %782 : vector<2x1xf32> to vector<2x16xf32>
    %784 = arith.subf %776, %783 : vector<2x16xf32>
    %785 = arith.mulf %784, %784 : vector<2x16xf32>
    %cst_244 = arith.constant dense<0.000000e+00> : vector<2xf32>
    %786 = vector.multi_reduction <add>, %785, %cst_244 [1] : vector<2x16xf32> to vector<2xf32>
    %787 = vector.shape_cast %786 : vector<2xf32> to vector<2x1xf32>
    %cst_245 = arith.constant 1.600000e+01 : f32
    %788 = vector.broadcast %cst_245 : f32 to vector<2x1xf32>
    %789 = arith.divf %787, %788 : vector<2x1xf32>
    %790 = vector.broadcast %782 : vector<2x1xf32> to vector<2x16xf32>
    %791 = arith.subf %776, %790 : vector<2x16xf32>
    %cst_246 = arith.constant 9.99999974E-6 : f32
    %792 = vector.broadcast %cst_246 : f32 to vector<2x1xf32>
    %793 = arith.addf %789, %792 : vector<2x1xf32>
    %794 = math.rsqrt %793 : vector<2x1xf32>
    %795 = vector.broadcast %794 : vector<2x1xf32> to vector<2x16xf32>
    %796 = arith.mulf %791, %795 : vector<2x16xf32>
    %797 = vector.broadcast %777 : vector<1x16xf32> to vector<2x16xf32>
    %798 = arith.mulf %796, %797 : vector<2x16xf32>
    %799 = vector.broadcast %778 : vector<1x16xf32> to vector<2x16xf32>
    %800 = arith.addf %798, %799 : vector<2x16xf32>
    %c0_247 = arith.constant 0 : index
    %c0_248 = arith.constant 0 : index
    %801 = vector.load %arg20[%c0_247, %c0_248] : memref<16x128xf32, #tpu.memory_space<vmem>>, vector<16x128xf32>
    %cst_249 = arith.constant dense<0.000000e+00> : vector<2x128xf32>
    %802 = tpu.matmul %800, %801, %cst_249 {dimension_numbers = #tpu.dot_dimension_numbers<[1], [0], [0], [1], [0, 0, 1, 1], [], []>} : vector<2x16xf32>, vector<16x128xf32>, vector<2x128xf32> -> vector<2x128xf32>
    %c0_250 = arith.constant 0 : index
    %c0_251 = arith.constant 0 : index
    %803 = vector.load %arg21[%c0_250, %c0_251] : memref<1x128xf32, #tpu.memory_space<vmem>>, vector<1x128xf32>
    %804 = vector.broadcast %803 : vector<1x128xf32> to vector<2x128xf32>
    %805 = arith.addf %802, %804 : vector<2x128xf32>
    %c4_252 = arith.constant 4 : index
    %c0_253 = arith.constant 0 : index
    %806 = vector.load %arg22[%c4_252, %c0_253] : memref<6x128xf32, #tpu.memory_space<vmem>>, vector<2x128xf32>
    tpu.vector_store %arg22[%c4_252, %c0_253], %805 {strides = array<i32>} : memref<6x128xf32, #tpu.memory_space<vmem>>, vector<2x128xf32>,
    return
  }
}

</mosaic_0001>

<bundles_post_ra>
// kernel: forward.1
= control target key start
LH: loop header
LB: loop body
LE: loop exit
PB: predicated region body
PF: predicated region fallthrough
CT: control target
= control target key end

     0   :  { %s8873_s0 = inlined_call_operand.vmem [shape: f32[16,4], index: 0, kind: input, shape index: {}]   ;;  %s8874_s1 = inlined_call_operand.vmem [shape: f32[4,512], index: 1, kind: input, shape index: {}]   ;;  %s8875_s2 = inlined_call_operand.hbm [shape: f32[128,512], index: 2, kind: input, shape index: {}]   ;;  %s8876_s3 = inlined_call_operand.vmem [shape: f32[1,512], index: 3, kind: input, shape index: {}]   ;;  %s8877_s4 = inlined_call_operand.vmem [shape: f32[1,128], index: 4, kind: input, shape index: {}]   ;;  %s8878_s5 = inlined_call_operand.vmem [shape: f32[1,128], index: 5, kind: input, shape index: {}]   ;;  %s8879_s6 = inlined_call_operand.hbm [shape: f32[128,512], index: 6, kind: input, shape index: {}]   ;;  %s8880_s7 = inlined_call_operand.hbm [shape: f32[64,512], index: 7, kind: input, shape index: {}]   ;;  %s8881_s8 = inlined_call_operand.vmem [shape: f32[1,512], index: 8, kind: input, shape index: {}]   ;;  %s8882_s9 = inlined_call_operand.vmem [shape: f32[1,64], index: 9, kind: input, shape index: {}]   ;;  %s8883_s10 = inlined_call_operand.hbm [shape: f32[1,64], index: 10, kind: input, shape index: {}]   ;;  %s8884_s11 = inlined_call_operand.hbm [shape: f32[64,512], index: 11, kind: input, shape index: {}]   ;;  %s8885_s12 = inlined_call_operand.vmem [shape: f32[32,512], index: 12, kind: input, shape index: {}]   ;;  %s8886_s13 = inlined_call_operand.hbm [shape: f32[1,512], index: 13, kind: input, shape index: {}]   ;;  %s8887_s14 = inlined_call_operand.hbm [shape: f32[1,32], index: 14, kind: input, shape index: {}]   ;;  %s8888_s15 = inlined_call_operand.hbm [shape: f32[1,32], index: 15, kind: input, shape index: {}]   ;;  %s8889_s16 = inlined_call_operand.vmem [shape: f32[32,16], index: 16, kind: input, shape index: {}]   ;;  %s8890_s17 = inlined_call_operand.hbm [shape: f32[1,16], index: 17, kind: input, shape index: {}]   ;;  %s8891_s18 = inlined_call_operand.hbm [shape: f32[1,16], index: 18, kind: input, shape index: {}]   ;;  %s8892_s19 = inlined_call_operand.hbm [shape: f32[1,16], index: 19, kind: input, shape index: {}]   ;;  %s8893_s20 = inlined_call_operand.hbm [shape: f32[16,128], index: 20, kind: input, shape index: {}]   ;;  %s8894_s21 = inlined_call_operand.hbm [shape: f32[1,128], index: 21, kind: input, shape index: {}]   ;;  %s8895_s22 = inlined_call_operand.vmem [shape: f32[6,128], index: 22, kind: output, shape index: {}]  }
   0x1   :  { %8902 = sst [smem:[#allocation30_spill]] %s8873_s0 }
   0x2   :  { %8903 = sst [smem:[#allocation31_spill]] %s8874_s1 }
   0x3   :  { %8904 = sst [smem:[#allocation32_spill]] %s8875_s2 }
   0x4   :  { %8905 = sst [smem:[#allocation33_spill]] %s8876_s3 }
   0x5   :  { %8906 = sst [smem:[#allocation34_spill]] %s8877_s4 }
   0x6   :  { %8907 = sst [smem:[#allocation35_spill]] %s8878_s5 }
   0x7   :  { %8908 = sst [smem:[#allocation36_spill]] %s8879_s6 }
   0x8   :  { %27 = vsyncpa [#allocation4], 0 }
   0x9   :  { %28 = vsyncpa [#allocation6], 0 }
   0xa   :  { %29 = vsyncpa [#allocation9], 0 }
   0xb   :  { %30 = vsyncpa [#allocation12], 0 }
   0xc   :  { %31 = vsyncpa [#allocation15], 0 }
   0xd   :  { %32 = vsyncpa [#allocation18], 0 }
   0xe   :  { %33 = vsyncpa [#allocation21], 0  ;;  %s7489_s3 = smov [#allocation5]   ;;  %s7490_s29 = smov [#allocation8]  }
   0xf   :  { %s61_s28 = sshll.u32 %s7489_s3, 4  ;;  %s90_s30 = sshll.u32 %s7490_s29, 4  ;;  %s62_s28 = int_to_ptr.vmem [resolvable:$true] %s61_s28  ;;  %s7624_s30 = int_to_ptr.vmem [resolvable:$true] %s90_s30 }
  0x10   :  { %s8909_s23 = sld [smem:[#allocation36_spill]] }
  0x16   :  { %s7189_s1 = scalar_lea.hbm %s8909_s23, 8192 }
  0x17   :  { %p7190_p0 = scmp.ne.s32.totalorder %s8909_s23, %s7189_s1  ;;  %p7193_p1 = scmp.lt.u32.totalorder %s7189_s1, %s8909_s23 }
  0x19   :  { %p7195_p2 = pnand %p7193_p1, %p7190_p0 }
  0x1b   :  { %7198 = shalt.err (!%p7195_p2)
}
  0x1c   :  { %s7199_s26 = scalar_lea.vmem %s62_s28, 8192  ;;  %p7204_p4 = scmp.lt.s32.totalorder %s62_s28, %s62_s28 }
  0x1d   :  { %p7200_p3 = scmp.ne.s32.totalorder %s62_s28, %s7199_s26  ;;  %p7205_p5 = scmp.lt.s32.totalorder %s7199_s26, %s7199_s26 }
  0x1f   :  { %p7206_p6 = por %p7205_p5, %p7204_p4 }
  0x21   :  { %p7207_p7 = pnand %p7206_p6, %p7200_p3 }
  0x23   :  { %7210 = shalt.err (!%p7207_p7)
}
  0x24   :  { %s8900_s2 = smov 512   ;;  %s7492_s27 = smov 32  }
  0x25   :  { %67 = dma.hbm_to_vmem [thread:$0]  %s8909_s23, 8192, %s62_s28, [#allocation6], %s8900_s2, %s8900_s2, %s7492_s27  }
  0x26   :  { %s7211_s1 = scalar_lea.hbm %s8883_s10, 16 }
  0x27   :  { %p7212_p8 = scmp.ne.s32.totalorder %s8883_s10, %s7211_s1  ;;  %p7215_p9 = scmp.lt.u32.totalorder %s7211_s1, %s8883_s10 }
  0x29   :  { %p7217_p10 = pnand %p7215_p9, %p7212_p8 }
  0x2b   :  { %7220 = shalt.err (!%p7217_p10)
}
  0x2c   :  { %s7221_s26 = scalar_lea.vmem %s7624_s30, 16  ;;  %s7225_s28 = scalar_lea.vmem %s7624_s30, 32 }
  0x2d   :  { %p7222_p11 = scmp.ne.s32.totalorder %s7624_s30, %s7221_s26  ;;  %p7226_p12 = scmp.lt.s32.totalorder %s7624_s30, %s7624_s30 }
  0x2e   :  { %p7227_p13 = scmp.lt.s32.totalorder %s7225_s28, %s7221_s26 }
  0x30   :  { %p7228_p0 = por %p7227_p13, %p7226_p12 }
  0x32   :  { %p7229_p1 = pnand %p7228_p0, %p7222_p11 }
  0x34   :  { %7232 = shalt.err (!%p7229_p1)
}
  0x35   :  { %93 = dma.hbm_to_vmem [thread:$0]  %s8883_s10, 16, %s7624_s30, [#allocation9]  }
  0x36   :  { %s7493_s29 = smov [#allocation11]   ;;  %s7494_s0 = smov [#allocation14]  }
  0x37   :  { %s114_s4 = sshll.u32 %s7493_s29, 4  ;;  %s134_s1 = sshll.u32 %s7494_s0, 4  ;;  %s115_s4 = int_to_ptr.vmem [resolvable:$true] %s114_s4  ;;  %s135_s1 = int_to_ptr.vmem [resolvable:$true] %s134_s1 }
  0x38   :  { %s7233_s6 = scalar_lea.hbm %s8886_s13, 64 }
  0x39   :  { %p7234_p2 = scmp.ne.s32.totalorder %s8886_s13, %s7233_s6  ;;  %p7237_p3 = scmp.lt.u32.totalorder %s7233_s6, %s8886_s13 }
  0x3b   :  { %p7239_p4 = pnand %p7237_p3, %p7234_p2 }
  0x3d   :  { %7242 = shalt.err (!%p7239_p4)
}
  0x3e   :  { %s7243_s10 = scalar_lea.vmem %s115_s4, 64  ;;  %p7248_p6 = scmp.lt.s32.totalorder %s115_s4, %s115_s4 }
  0x3f   :  { %p7244_p5 = scmp.ne.s32.totalorder %s115_s4, %s7243_s10  ;;  %p7249_p7 = scmp.lt.s32.totalorder %s7243_s10, %s7243_s10 }
  0x41   :  { %p7250_p8 = por %p7249_p7, %p7248_p6 }
  0x43   :  { %p7251_p9 = pnand %p7250_p8, %p7244_p5 }
  0x45   :  { %7254 = shalt.err (!%p7251_p9)
}
  0x46   :  { %117 = dma.hbm_to_vmem [thread:$0]  %s8886_s13, 64, %s115_s4, [#allocation12]  }
  0x47   :  { %s7255_s0 = scalar_lea.hbm %s8888_s15, 16 }
  0x48   :  { %p7256_p10 = scmp.ne.s32.totalorder %s8888_s15, %s7255_s0  ;;  %p7259_p11 = scmp.lt.u32.totalorder %s7255_s0, %s8888_s15 }
  0x4a   :  { %p7261_p12 = pnand %p7259_p11, %p7256_p10 }
  0x4c   :  { %7264 = shalt.err (!%p7261_p12)
}
  0x4d   :  { %s7265_s25 = scalar_lea.vmem %s135_s1, 16  ;;  %s7269_s26 = scalar_lea.vmem %s135_s1, 32 }
  0x4e   :  { %p7266_p13 = scmp.ne.s32.totalorder %s135_s1, %s7265_s25  ;;  %p7270_p0 = scmp.lt.s32.totalorder %s135_s1, %s135_s1 }
  0x4f   :  { %p7271_p1 = scmp.lt.s32.totalorder %s7269_s26, %s7265_s25 }
  0x51   :  { %p7272_p2 = por %p7271_p1, %p7270_p0 }
  0x53   :  { %p7273_p3 = pnand %p7272_p2, %p7266_p13 }
  0x55   :  { %7276 = shalt.err (!%p7273_p3)
}
  0x56   :  { %137 = dma.hbm_to_vmem [thread:$0]  %s8888_s15, 16, %s135_s1, [#allocation15]  }
  0x57   :  { %s7495_s28 = smov [#allocation17]   ;;  %s7496_s30 = smov [#allocation20]  }
  0x58   :  { %s156_s10 = sshll.u32 %s7495_s28, 4  ;;  %s175_s23 = sshll.u32 %s7496_s30, 4  ;;  %s157_s10 = int_to_ptr.vmem [resolvable:$true] %s156_s10  ;;  %s7683_s23 = int_to_ptr.vmem [resolvable:$true] %s175_s23 }
  0x59   :  { %s7277_s0 = scalar_lea.hbm %s8891_s18, 16 }
  0x5a   :  { %p7278_p4 = scmp.ne.s32.totalorder %s8891_s18, %s7277_s0  ;;  %p7281_p5 = scmp.lt.u32.totalorder %s7277_s0, %s8891_s18 }
  0x5c   :  { %p7283_p6 = pnand %p7281_p5, %p7278_p4 }
  0x5e   :  { %7286 = shalt.err (!%p7283_p6)
}
  0x5f   :  { %s7287_s15 = scalar_lea.vmem %s157_s10, 16  ;;  %s7291_s1 = scalar_lea.vmem %s157_s10, 32 }
  0x60   :  { %p7288_p7 = scmp.ne.s32.totalorder %s157_s10, %s7287_s15  ;;  %p7292_p8 = scmp.lt.s32.totalorder %s157_s10, %s157_s10 }
  0x61   :  { %p7293_p9 = scmp.lt.s32.totalorder %s7291_s1, %s7287_s15 }
  0x63   :  { %p7294_p10 = por %p7293_p9, %p7292_p8 }
  0x65   :  { %p7295_p11 = pnand %p7294_p10, %p7288_p7 }
  0x67   :  { %7298 = shalt.err (!%p7295_p11)
}
  0x68   :  { %159 = dma.hbm_to_vmem [thread:$0]  %s8891_s18, 16, %s157_s10, [#allocation18]  }
  0x69   :  { %s7299_s28 = scalar_lea.hbm %s8893_s20, 256 }
  0x6a   :  { %p7300_p12 = scmp.ne.s32.totalorder %s8893_s20, %s7299_s28  ;;  %p7303_p13 = scmp.lt.u32.totalorder %s7299_s28, %s8893_s20 }
  0x6c   :  { %p7305_p0 = pnand %p7303_p13, %p7300_p12 }
  0x6e   :  { %7308 = shalt.err (!%p7305_p0)
}
  0x6f   :  { %s7309_s5 = scalar_lea.vmem %s7683_s23, 256  ;;  %p7314_p2 = scmp.lt.s32.totalorder %s7683_s23, %s7683_s23 }
  0x70   :  { %p7310_p1 = scmp.ne.s32.totalorder %s7683_s23, %s7309_s5  ;;  %p7315_p3 = scmp.lt.s32.totalorder %s7309_s5, %s7309_s5 }
  0x72   :  { %p7316_p4 = por %p7315_p3, %p7314_p2 }
  0x74   :  { %p7317_p5 = pnand %p7316_p4, %p7310_p1 }
  0x76   :  { %7320 = shalt.err (!%p7317_p5)
}
  0x77   :  { %s7497_s18 = smov 128   ;;  %s7498_s10 = smov 8  }
  0x78   :  { %181 = dma.hbm_to_vmem [thread:$0]  %s8893_s20, 256, %s7683_s23, [#allocation21], %s7497_s18, %s7497_s18, %s7498_s10  }
  0x79   :  { %s7499_s6 = smov [#allocation3]   ;;  %s7500_s1 = smov [#allocation7]  }
  0x7a   :  { %s43_s15 = sshll.u32 %s7499_s6, 4  ;;  %s73_s25 = sshll.u32 %s7500_s1, 4  ;;  %s44_s15 = int_to_ptr.vmem [resolvable:$true] %s43_s15  ;;  %s7714_s25 = int_to_ptr.vmem [resolvable:$true] %s73_s25 }
  0x7b   :  { %s8910_s4 = sld [smem:[#allocation32_spill]] }
  0x81   :  { %s7321_s28 = scalar_lea.hbm %s8910_s4, 8192 }
  0x82   :  { %p7322_p6 = scmp.ne.s32.totalorder %s8910_s4, %s7321_s28  ;;  %p7325_p7 = scmp.lt.u32.totalorder %s7321_s28, %s8910_s4 }
  0x84   :  { %p7327_p8 = pnand %p7325_p7, %p7322_p6 }
  0x86   :  { %7330 = shalt.err (!%p7327_p8)
}
  0x87   :  { %s7331_s20 = scalar_lea.vmem %s44_s15, 8192  ;;  %p7336_p10 = scmp.lt.s32.totalorder %s44_s15, %s44_s15 }
  0x88   :  { %p7332_p9 = scmp.ne.s32.totalorder %s44_s15, %s7331_s20  ;;  %p7337_p11 = scmp.lt.s32.totalorder %s7331_s20, %s7331_s20 }
  0x8a   :  { %p7338_p12 = por %p7337_p11, %p7336_p10 }
  0x8c   :  { %p7339_p13 = pnand %p7338_p12, %p7332_p9 }
  0x8e   :  { %7342 = shalt.err (!%p7339_p13)
}
  0x8f   :  { %s8911_s23 = smov 512   ;;  %s7343_s24 = scalar_lea.hbm %s8880_s7, 4096 }
  0x90   :  { %49 = dma.hbm_to_vmem [thread:$0]  %s8910_s4, 8192, %s44_s15, [#allocation4], %s8911_s23, %s8911_s23, %s7492_s27  }
  0x91   :  { %p7344_p0 = scmp.ne.s32.totalorder %s8880_s7, %s7343_s24  ;;  %p7347_p1 = scmp.lt.u32.totalorder %s7343_s24, %s8880_s7 }
  0x93   :  { %p7349_p2 = pnand %p7347_p1, %p7344_p0 }
  0x95   :  { %7352 = shalt.err (!%p7349_p2)
}
  0x96   :  { %s7353_s28 = scalar_lea.vmem %s7714_s25, 4096  ;;  %p7358_p4 = scmp.lt.s32.totalorder %s7714_s25, %s7714_s25 }
  0x97   :  { %p7354_p3 = scmp.ne.s32.totalorder %s7714_s25, %s7353_s28  ;;  %p7359_p5 = scmp.lt.s32.totalorder %s7353_s28, %s7353_s28 }
  0x99   :  { %p7360_p6 = por %p7359_p5, %p7358_p4 }
  0x9b   :  { %p7361_p7 = pnand %p7360_p6, %p7354_p3 }
  0x9d   :  { %7364 = shalt.err (!%p7361_p7)
}
  0x9e   :  { %79 = dma.hbm_to_vmem [thread:$0]  %s8880_s7, 4096, %s7714_s25, [#allocation6], %s8911_s23, %s8911_s23, %s7492_s27  }
  0x9f   :  { %s7501_s30 = smov [#allocation10]   ;;  %s7502_s29 = smov [#allocation13]  }
  0xa0   :  { %s99_s3 = sshll.u32 %s7501_s30, 4  ;;  %s124_s0 = sshll.u32 %s7502_s29, 4  ;;  %s100_s3 = int_to_ptr.vmem [resolvable:$true] %s99_s3  ;;  %s125_s0 = int_to_ptr.vmem [resolvable:$true] %s124_s0 }
  0xa1   :  { %s7365_s18 = scalar_lea.hbm %s8884_s11, 4096 }
  0xa2   :  { %p7366_p8 = scmp.ne.s32.totalorder %s8884_s11, %s7365_s18  ;;  %p7369_p9 = scmp.lt.u32.totalorder %s7365_s18, %s8884_s11 }
  0xa4   :  { %p7371_p10 = pnand %p7369_p9, %p7366_p8 }
  0xa6   :  { %7374 = shalt.err (!%p7371_p10)
}
  0xa7   :  { %s7375_s7 = scalar_lea.vmem %s100_s3, 4096  ;;  %p7380_p12 = scmp.lt.s32.totalorder %s100_s3, %s100_s3 }
  0xa8   :  { %p7376_p11 = scmp.ne.s32.totalorder %s100_s3, %s7375_s7  ;;  %p7381_p13 = scmp.lt.s32.totalorder %s7375_s7, %s7375_s7 }
  0xaa   :  { %p7382_p0 = por %p7381_p13, %p7380_p12 }
  0xac   :  { %p7383_p1 = pnand %p7382_p0, %p7376_p11 }
  0xae   :  { %7386 = shalt.err (!%p7383_p1)
}
  0xaf   :  { %105 = dma.hbm_to_vmem [thread:$0]  %s8884_s11, 4096, %s100_s3, [#allocation9], %s8911_s23, %s8911_s23, %s7492_s27  }
  0xb0   :  { %s7387_s28 = scalar_lea.hbm %s8887_s14, 16 }
  0xb1   :  { %p7388_p2 = scmp.ne.s32.totalorder %s8887_s14, %s7387_s28  ;;  %p7391_p3 = scmp.lt.u32.totalorder %s7387_s28, %s8887_s14 }
  0xb3   :  { %p7393_p4 = pnand %p7391_p3, %p7388_p2 }
  0xb5   :  { %7396 = shalt.err (!%p7393_p4)
}
  0xb6   :  { %s7397_s20 = scalar_lea.vmem %s125_s0, 16  ;;  %s7401_s5 = scalar_lea.vmem %s125_s0, 32 }
  0xb7   :  { %p7398_p5 = scmp.ne.s32.totalorder %s125_s0, %s7397_s20  ;;  %p7402_p6 = scmp.lt.s32.totalorder %s125_s0, %s125_s0 }
  0xb8   :  { %p7403_p7 = scmp.lt.s32.totalorder %s7401_s5, %s7397_s20 }
  0xba   :  { %p7404_p8 = por %p7403_p7, %p7402_p6 }
  0xbc   :  { %p7405_p9 = pnand %p7404_p8, %p7398_p5 }
  0xbe   :  { %7408 = shalt.err (!%p7405_p9)
}
  0xbf   :  { %127 = dma.hbm_to_vmem [thread:$0]  %s8887_s14, 16, %s125_s0, [#allocation12]  }
  0xc0   :  { %s7503_s23 = smov [#allocation16]   ;;  %s7504_s18 = smov [#allocation19]  }
  0xc1   :  { %s146_s3 = sshll.u32 %s7503_s23, 4  ;;  %s166_s10 = sshll.u32 %s7504_s18, 4  ;;  %s147_s3 = int_to_ptr.vmem [resolvable:$true] %s146_s3  ;;  %s167_s10 = int_to_ptr.vmem [resolvable:$true] %s166_s10 }
  0xc2   :  { %s7409_s6 = scalar_lea.hbm %s8890_s17, 16 }
  0xc3   :  { %p7410_p10 = scmp.ne.s32.totalorder %s8890_s17, %s7409_s6  ;;  %p7413_p11 = scmp.lt.u32.totalorder %s7409_s6, %s8890_s17 }
  0xc5   :  { %p7415_p12 = pnand %p7413_p11, %p7410_p10 }
  0xc7   :  { %7418 = shalt.err (!%p7415_p12)
}
  0xc8   :  { %s7419_s14 = scalar_lea.vmem %s147_s3, 16  ;;  %s7423_s0 = scalar_lea.vmem %s147_s3, 32 }
  0xc9   :  { %p7420_p13 = scmp.ne.s32.totalorder %s147_s3, %s7419_s14  ;;  %p7424_p0 = scmp.lt.s32.totalorder %s147_s3, %s147_s3 }
  0xca   :  { %p7425_p1 = scmp.lt.s32.totalorder %s7423_s0, %s7419_s14 }
  0xcc   :  { %p7426_p2 = por %p7425_p1, %p7424_p0 }
  0xce   :  { %p7427_p3 = pnand %p7426_p2, %p7420_p13 }
  0xd0   :  { %7430 = shalt.err (!%p7427_p3)
}
  0xd1   :  { %149 = dma.hbm_to_vmem [thread:$0]  %s8890_s17, 16, %s147_s3, [#allocation15]  }
  0xd2   :  { %s7431_s30 = scalar_lea.hbm %s8892_s19, 16 }
  0xd3   :  { %p7432_p4 = scmp.ne.s32.totalorder %s8892_s19, %s7431_s30  ;;  %p7435_p5 = scmp.lt.u32.totalorder %s7431_s30, %s8892_s19 }
  0xd5   :  { %p7437_p6 = pnand %p7435_p5, %p7432_p4 }
  0xd7   :  { %7440 = shalt.err (!%p7437_p6)
}
  0xd8   :  { %s7441_s27 = scalar_lea.vmem %s167_s10, 16  ;;  %s7445_s23 = scalar_lea.vmem %s167_s10, 32 }
  0xd9   :  { %p7442_p7 = scmp.ne.s32.totalorder %s167_s10, %s7441_s27  ;;  %p7446_p8 = scmp.lt.s32.totalorder %s167_s10, %s167_s10 }
  0xda   :  { %p7447_p9 = scmp.lt.s32.totalorder %s7445_s23, %s7441_s27 }
  0xdc   :  { %p7448_p10 = por %p7447_p9, %p7446_p8 }
  0xde   :  { %p7449_p11 = pnand %p7448_p10, %p7442_p7 }
  0xe0   :  { %7452 = shalt.err (!%p7449_p11)
}
  0xe1   :  { %169 = dma.hbm_to_vmem [thread:$0]  %s8892_s19, 16, %s167_s10, [#allocation18]  }
  0xe2   :  { %s7505_s18 = smov [#allocation22]   ;;  %s7453_s7 = scalar_lea.hbm %s8894_s21, 16 }
  0xe3   :  { %s188_s2 = sshll.u32 %s7505_s18, 4  ;;  %p7454_p12 = scmp.ne.s32.totalorder %s8894_s21, %s7453_s7  ;;  %s189_s2 = int_to_ptr.vmem [resolvable:$true] %s188_s2 }
  0xe4   :  { %p7457_p13 = scmp.lt.u32.totalorder %s7453_s7, %s8894_s21 }
  0xe6   :  { %p7459_p0 = pnand %p7457_p13, %p7454_p12 }
  0xe8   :  { %7462 = shalt.err (!%p7459_p0)
}
  0xe9   :  { %s7463_s0 = scalar_lea.vmem %s189_s2, 16  ;;  %s7467_s19 = scalar_lea.vmem %s189_s2, 32 }
  0xea   :  { %p7464_p1 = scmp.ne.s32.totalorder %s189_s2, %s7463_s0  ;;  %p7468_p2 = scmp.lt.s32.totalorder %s189_s2, %s189_s2 }
  0xeb   :  { %p7469_p3 = scmp.lt.s32.totalorder %s7467_s19, %s7463_s0 }
  0xed   :  { %p7470_p4 = por %p7469_p3, %p7468_p2 }
  0xef   :  { %p7471_p5 = pnand %p7470_p4, %p7464_p1 }
  0xf1   :  { %7474 = shalt.err (!%p7471_p5)
}
  0xf2   :  { %191 = dma.hbm_to_vmem [thread:$0]  %s8894_s21, 16, %s189_s2, [#allocation21]  }
  0xf3   :  { %7475 = dma.done.wait [#allocation4], 8192  }
  0xf4   :  { %7476 = vsyncadd [#allocation4], 4294959104 }
  0xf5   :  { %7477 = dma.done.wait [#allocation6], 12288  }
  0xf6   :  { %7478 = vsyncadd [#allocation6], 4294955008 }
  0xf7   :  { %7479 = dma.done.wait [#allocation9], 4112  }
  0xf8   :  { %7480 = vsyncadd [#allocation9], 4294963184 }
  0xf9   :  { %7481 = dma.done.wait [#allocation12], 80  }
  0xfa   :  { %7482 = vsyncadd [#allocation12], 4294967216 }
  0xfb   :  { %7483 = dma.done.wait [#allocation15], 32  }
  0xfc   :  { %7484 = vsyncadd [#allocation15], 4294967264 }
  0xfd   :  { %7485 = dma.done.wait [#allocation18], 32  }
  0xfe   :  { %7486 = vsyncadd [#allocation18], 4294967264 }
  0xff   :  { %7487 = dma.done.wait [#allocation21], 272  }
 0x100   :  { %7488 = vsyncadd [#allocation21], 4294967024  ;;  %v7506_v0 = vmov 0.0   ;;  %s8912_s15 = sld [smem:[#allocation31_spill]]  ;;  %vm268_vm0 = vcmask 1043456   ;;  %s8913_s5 = sld [smem:[#allocation30_spill]] }
 0x101   :  { %341 = vmatprep.mubr.f32.mxu0 %v7506_v0  ;;  %418 = vmatprep.mubr.f32.mxu1 %v7506_v0  ;;  %v432_v6 = vld [vmem:[#allocation3 + $0x8] sm:$0xff]  ;;  %v434_v8 = vld [vmem:[#allocation3 + $0x18] sm:$0xff]  ;;  %vm261_vm1 = vcmask 31744   ;;  %v431_v11 = vld [vmem:[#allocation3] sm:$0xff]  ;;  %s8914_s3 = sld [smem:[#allocation33_spill]]  ;;  %s8915_s24 = sld [smem:[#allocation34_spill]] }
 0x102   :  { %v436_v7 = vld [vmem:[#allocation3 + $0x28] sm:$0xff]  ;;  %v438_v10 = vld [vmem:[#allocation3 + $0x38] sm:$0xff]  ;;  %v435_v12 = vld [vmem:[#allocation3 + $0x20] sm:$0xff]  ;;  %s8916_s25 = sld [smem:[#allocation35_spill]]  ;;  %vm2734_vm2 = vcmask 523264   ;;  %vm4219_vm3 = vcmask 523270  }
 0x103   :  { %v7825_v9 = vpack.c.bf16 %v436_v7, %v432_v6  ;;  %v7829_v13 = vpack.c.bf16 %v438_v10, %v434_v8  ;;  %v7831_v14 = vpack.c.bf16 %v435_v12, %v431_v11  ;;  %v433_v15 = vld [vmem:[#allocation3 + $0x10] sm:$0xff]  ;;  %v440_v17 = vld [vmem:[#allocation3 + $0x48] sm:$0xff]  ;;  %v442_v20 = vld [vmem:[#allocation3 + $0x58] sm:$0xff]  ;;  %vm4639_vm4 = vcmask 254976  }
 0x104   :  { %v437_v16 = vld [vmem:[#allocation3 + $0x30] sm:$0xff]  ;;  %v444_v19 = vld [vmem:[#allocation3 + $0x68] sm:$0xff]  ;;  %v446_v21 = vld [vmem:[#allocation3 + $0x78] sm:$0xff]  ;;  %vm7508_vm5 = vmmov 0   ;;  %vm4464_vm6 = vcmask 261120   ;;  %vm4755_vm7 = vcmask 123904  }
 0x105   :  { %v7835_v18 = vpack.c.bf16 %v437_v16, %v433_v15  ;;  %v7839_v22 = vpack.c.bf16 %v444_v19, %v440_v17  ;;  %v7841_v23 = vpack.c.bf16 %v446_v21, %v442_v20  ;;  %v439_v24 = vld [vmem:[#allocation3 + $0x40] sm:$0xff]  ;;  %v441_v26 = vld [vmem:[#allocation3 + $0x50] sm:$0xff]  ;;  %v448_v28 = vld [vmem:[#allocation3 + $0x88] sm:$0xff]  ;;  %vm4793_vm8 = vcmask 130048  }
 0x106   :  { %v233_v1 = vld [vmem:[%s8912_s15] sm:$0xff]  ;;  %v234_v2 = vld [vmem:[%s8912_s15 + $0x8] sm:$0xff]  ;;  %v443_v25 = vld [vmem:[#allocation3 + $0x60] sm:$0xff] }
 0x107   :  { %v231_v3 = vld [vmem:[%s8913_s5] sm:$0xff]  ;;  %v259_v4 = vcombine.high %v233_v1, %v233_v1  ;;  %v260_v5 = vcombine.high %v234_v2, %v234_v2  ;;  %v452_v29 = vld [vmem:[#allocation3 + $0xa8] sm:$0xff]  ;;  %v7847_v30 = vpack.c.bf16 %v443_v25, %v439_v24  ;;  %v450_v32 = vld [vmem:[#allocation3 + $0x98] sm:$0xff] }
 0x108   :  { %v445_v27 = vld [vmem:[#allocation3 + $0x70] sm:$0xff]  ;;  %v454_v33 = vld [vmem:[#allocation3 + $0xb8] sm:$0xff]  ;;  %v447_v34 = vld [vmem:[#allocation3 + $0x80] sm:$0xff]  ;;  %v7853_v35 = vpack.c.bf16 %v452_v29, %v448_v28 }
 0x109   :  { %5709 = vmatprep.subr.msk.mxu0 %vm268_vm0, %v259_v4  ;;  %5713 = vmatprep.subr.msk.mxu1 %vm268_vm0, %v260_v5  ;;  %v7849_v31 = vpack.c.bf16 %v445_v27, %v441_v26  ;;  %v7855_v36 = vpack.c.bf16 %v454_v33, %v450_v32  ;;  %v451_v37 = vld [vmem:[#allocation3 + $0xa0] sm:$0xff]  ;;  %v449_v38 = vld [vmem:[#allocation3 + $0x90] sm:$0xff]  ;;  %v456_v40 = vld [vmem:[#allocation3 + $0xc8] sm:$0xff] }
 0x10a   :  { %5710 = vmatpush1.msk.msra.mxu0 %vm268_vm0, %v233_v1  ;;  %5714 = vmatpush1.msk.msra.mxu1 %vm268_vm0, %v234_v2  ;;  %v453_v39 = vld [vmem:[#allocation3 + $0xb0] sm:$0xff]  ;;  %v460_v41 = vld [vmem:[#allocation3 + $0xe8] sm:$0xff]  ;;  %v458_v42 = vld [vmem:[#allocation3 + $0xd8] sm:$0xff]  ;;  %v7861_v44 = vpack.c.bf16 %v451_v37, %v447_v34 }
 0x10b   :  { %5711 = vmatmul.mubr.msk.f32.vlgmr.msra.gmra.mrb[0].mxu0 %vm261_vm1, %v231_v3  ;;  %5901 = vmatprep.subr.bf16.mxu0 %v7825_v9  ;;  %v462_v43 = vld [vmem:[#allocation3 + $0xf8] sm:$0xff]  ;;  %v7863_v45 = vpack.c.bf16 %v453_v39, %v449_v38  ;;  %v455_v46 = vld [vmem:[#allocation3 + $0xc0] sm:$0xff]  ;;  %v7867_v48 = vpack.c.bf16 %v460_v41, %v456_v40  ;;  %v457_v50 = vld [vmem:[#allocation3 + $0xd0] sm:$0xff] }
 0x10c   :  { %5933 = vmatprep.subr.bf16.mxu1 %v7829_v13  ;;  %5715 = vmatmul.mubr.msk.f32.vlgmr.msra.gmra.mrb[0].mxu1 %vm261_vm1, %v231_v3  ;;  %v459_v47 = vld [vmem:[#allocation3 + $0xe0] sm:$0xff]  ;;  %v7869_v49 = vpack.c.bf16 %v462_v43, %v458_v42  ;;  %v461_v51 = vld [vmem:[#allocation3 + $0xf0] sm:$0xff]  ;;  %v464_v52 = vld [vmem:[#allocation3 + $0x108] sm:$0xff] }
 0x10d   :  { %5903 = vmatpush1.bf16.msra.mxu0 %v7831_v14  ;;  %5935 = vmatpush1.bf16.msra.mxu1 %v7835_v18  ;;  %v468_v53 = vld [vmem:[#allocation3 + $0x128] sm:$0xff]  ;;  %v466_v54 = vld [vmem:[#allocation3 + $0x118] sm:$0xff]  ;;  %v7873_v56 = vpack.c.bf16 %v459_v47, %v455_v46  ;;  %v7875_v57 = vpack.c.bf16 %v461_v51, %v457_v50  ;;  %v463_v58 = vld [vmem:[#allocation3 + $0x100] sm:$0xff] }
 0x10e   :  { %5905 = vmatprep.subr.bf16.mxu0 %v7839_v22  ;;  %5937 = vmatprep.subr.bf16.mxu1 %v7841_v23  ;;  %v470_v55 = vld [vmem:[#allocation3 + $0x138] sm:$0xff]  ;;  %v467_v59 = vld [vmem:[#allocation3 + $0x120] sm:$0xff]  ;;  %v7879_v60 = vpack.c.bf16 %v468_v53, %v464_v52  ;;  %v465_v62 = vld [vmem:[#allocation3 + $0x110] sm:$0xff] }
 0x10f   :  { %347 = vmatprep.mubr.f32.mxu0 %v7506_v0  ;;  %424 = vmatprep.mubr.f32.mxu1 %v7506_v0  ;;  %v7881_v61 = vpack.c.bf16 %v470_v55, %v466_v54  ;;  %v469_v63 = vld [vmem:[#allocation3 + $0x130] sm:$0xff]  ;;  %v472_v1 = vld [vmem:[#allocation3 + $0x148] sm:$0xff]  ;;  %v474_v3 = vld [vmem:[#allocation3 + $0x158] sm:$0xff]  ;;  %v7885_v5 = vpack.c.bf16 %v467_v59, %v463_v58 }
 0x110   :  { %v476_v2 = vld [vmem:[#allocation3 + $0x168] sm:$0xff]  ;;  %v478_v4 = vld [vmem:[#allocation3 + $0x178] sm:$0xff]  ;;  %v7887_v6 = vpack.c.bf16 %v469_v63, %v465_v62  ;;  %v471_v7 = vld [vmem:[#allocation3 + $0x140] sm:$0xff]  ;;  %v237_v62 = vlaneseq }
 0x111   :  { %5907 = vmatpush1.bf16.msra.mxu0 %v7847_v30  ;;  %5939 = vmatpush1.bf16.msra.mxu1 %v7849_v31  ;;  %v475_v8 = vld [vmem:[#allocation3 + $0x160] sm:$0xff]  ;;  %v232_v10 = vld [vmem:[%s8913_s5 + $0x8] sm:$0xff]  ;;  %v7894_v11 = vpack.c.bf16 %v476_v2, %v472_v1  ;;  %v7896_v12 = vpack.c.bf16 %v478_v4, %v474_v3  ;;  %v473_v15 = vld [vmem:[#allocation3 + $0x150] sm:$0xff] }
 0x112   :  { %5909 = vmatprep.subr.bf16.mxu0 %v7853_v35  ;;  %5941 = vmatprep.subr.bf16.mxu1 %v7855_v36  ;;  %v477_v16 = vld [vmem:[#allocation3 + $0x170] sm:$0xff]  ;;  %v480_v17 = vld [vmem:[#allocation3 + $0x188] sm:$0xff]  ;;  %v482_v20 = vld [vmem:[#allocation3 + $0x198] sm:$0xff]  ;;  %v7904_v24 = vpack.c.bf16 %v475_v8, %v471_v7  ;;  %v238_v63 = vshrl.u32 %v237_v62, 7 }
 0x113   :  { %v484_v19 = vld [vmem:[#allocation3 + $0x1a8] sm:$0xff]  ;;  %v486_v21 = vld [vmem:[#allocation3 + $0x1b8] sm:$0xff]  ;;  %5712 = vmatmul.mubr.msk.f32.gmra.mrb[2].mxu0 %vm261_vm1, %v232_v10  ;;  %5716 = vmatmul.mubr.msk.f32.gmra.mrb[2].mxu1 %vm261_vm1, %v232_v10  ;;  %v7906_v25 = vpack.c.bf16 %v477_v16, %v473_v15  ;;  %v479_v26 = vld [vmem:[#allocation3 + $0x180] sm:$0xff] }
 0x114   :  { %559 = vmatprep.mubr.f32.mxu0 %v7506_v0  ;;  %630 = vmatprep.mubr.f32.mxu1 %v7506_v0  ;;  %v483_v27 = vld [vmem:[#allocation3 + $0x1a0] sm:$0xff]  ;;  %v7910_v28 = vpack.c.bf16 %v484_v19, %v480_v17  ;;  %v7912_v29 = vpack.c.bf16 %v486_v21, %v482_v20  ;;  %v481_v32 = vld [vmem:[#allocation3 + $0x190] sm:$0xff]  ;;  %v488_v34 = vld [vmem:[#allocation3 + $0x1c8] sm:$0xff]  ;;  %v7974_v1 = vsub.s32 0, %v238_v63  ;;  %v7976_v2 = vsub.s32 2, %v238_v63 }
 0x115   :  { %5911 = vmatpush1.bf16.msra.mxu0 %v7861_v44  ;;  %5943 = vmatpush1.bf16.msra.mxu1 %v7863_v45  ;;  %v485_v33 = vld [vmem:[#allocation3 + $0x1b0] sm:$0xff]  ;;  %v492_v37 = vld [vmem:[#allocation3 + $0x1e8] sm:$0xff]  ;;  %v490_v38 = vld [vmem:[#allocation3 + $0x1d8] sm:$0xff]  ;;  %v7916_v40 = vpack.c.bf16 %v483_v27, %v479_v26  ;;  %v7981_v4 = vsub.s32 1, %v238_v63  ;;  %v7983_v7 = vsub.s32 3, %v238_v63 }
 0x116   :  { %5913 = vmatprep.subr.bf16.mxu0 %v7867_v48  ;;  %5945 = vmatprep.subr.bf16.mxu1 %v7869_v49  ;;  %v494_v39 = vld [vmem:[#allocation3 + $0x1f8] sm:$0xff]  ;;  %v7918_v41 = vpack.c.bf16 %v485_v33, %v481_v32  ;;  %v487_v42 = vld [vmem:[#allocation3 + $0x1c0] sm:$0xff]  ;;  %v7922_v43 = vpack.c.bf16 %v492_v37, %v488_v34  ;;  %v489_v50 = vld [vmem:[#allocation3 + $0x1d0] sm:$0xff] }
 0x117   :  { %v7924_v46 = vpack.c.bf16 %v494_v39, %v490_v38  ;;  %v491_v47 = vld [vmem:[#allocation3 + $0x1e0] sm:$0xff]  ;;  %v493_v51 = vld [vmem:[#allocation3 + $0x1f0] sm:$0xff] }
 0x118   :  { %v7928_v52 = vpack.c.bf16 %v491_v47, %v487_v42  ;;  %v7930_v53 = vpack.c.bf16 %v493_v51, %v489_v50  ;;  %v235_v3 = vld [vmem:[%s8914_s3] sm:$0xf] }
 0x119   :  { %5915 = vmatpush1.bf16.msra.mxu0 %v7873_v56  ;;  %5947 = vmatpush1.bf16.msra.mxu1 %v7875_v57  ;;  %v244_v8 = vrot.slane %v235_v3, %v7981_v4  ;;  %v252_v10 = vrot.slane %v235_v3, %v7983_v7 }
 0x11a   :  { %5917 = vmatprep.subr.bf16.mxu0 %v7879_v60  ;;  %5949 = vmatprep.subr.bf16.mxu1 %v7881_v61 }
 0x11d   :  { %5919 = vmatpush1.bf16.msra.mxu0 %v7885_v5  ;;  %5951 = vmatpush1.bf16.msra.mxu1 %v7887_v6 }
 0x11e   :  { %5921 = vmatprep.subr.bf16.mxu0 %v7894_v11  ;;  %5953 = vmatprep.subr.bf16.mxu1 %v7896_v12 }
 0x121   :  { %5923 = vmatpush1.bf16.msra.mxu0 %v7904_v24  ;;  %5955 = vmatpush1.bf16.msra.mxu1 %v7906_v25 }
 0x122   :  { %5925 = vmatprep.subr.bf16.mxu0 %v7910_v28  ;;  %5957 = vmatprep.subr.bf16.mxu1 %v7912_v29 }
 0x125   :  { %5927 = vmatpush1.bf16.msra.mxu0 %v7916_v40  ;;  %5959 = vmatpush1.bf16.msra.mxu1 %v7918_v41 }
 0x126   :  { %5929 = vmatprep.subr.bf16.mxu0 %v7922_v43  ;;  %5961 = vmatprep.subr.bf16.mxu1 %v7924_v46 }
 0x129   :  { %5931 = vmatpush1.bf16.msra.mxu0 %v7928_v52  ;;  %5963 = vmatpush1.bf16.msra.mxu1 %v7930_v53 }
 0x12a   :  { %5965 = vmatprep.subr.bf16.mxu0 %v7825_v9  ;;  %5997 = vmatprep.subr.bf16.mxu1 %v7829_v13 }
 0x12c   :  { %560 = vmatmul.mubr.f32.vlgmr.msra.gmra.mrb[4].mxu0 %v7506_v0  ;;  %631 = vmatmul.mubr.f32.vlgmr.msra.gmra.mrb[4].mxu1 %v7506_v0 }
 0x12d   :  { %5967 = vmatpush1.bf16.msra.mxu0 %v7831_v14  ;;  %5999 = vmatpush1.bf16.msra.mxu1 %v7835_v18 }
 0x12e   :  { %5969 = vmatprep.subr.bf16.mxu0 %v7839_v22  ;;  %6001 = vmatprep.subr.bf16.mxu1 %v7841_v23 }
 0x12f   :  { %794 = vmatprep.mubr.f32.mxu0 %v7506_v0  ;;  %865 = vmatprep.mubr.f32.mxu1 %v7506_v0 }
 0x131   :  { %5971 = vmatpush1.bf16.msra.mxu0 %v7847_v30  ;;  %6003 = vmatpush1.bf16.msra.mxu1 %v7849_v31 }
 0x132   :  { %5973 = vmatprep.subr.bf16.mxu0 %v7853_v35  ;;  %6005 = vmatprep.subr.bf16.mxu1 %v7855_v36 }
 0x135   :  { %5975 = vmatpush1.bf16.msra.mxu0 %v7861_v44  ;;  %6007 = vmatpush1.bf16.msra.mxu1 %v7863_v45 }
 0x136   :  { %5977 = vmatprep.subr.bf16.mxu0 %v7867_v48  ;;  %6009 = vmatprep.subr.bf16.mxu1 %v7869_v49 }
 0x139   :  { %5979 = vmatpush1.bf16.msra.mxu0 %v7873_v56  ;;  %6011 = vmatpush1.bf16.msra.mxu1 %v7875_v57 }
 0x13a   :  { %5981 = vmatprep.subr.bf16.mxu0 %v7879_v60  ;;  %6013 = vmatprep.subr.bf16.mxu1 %v7881_v61 }
 0x13d   :  { %5983 = vmatpush1.bf16.msra.mxu0 %v7885_v5  ;;  %6015 = vmatpush1.bf16.msra.mxu1 %v7887_v6 }
 0x13e   :  { %5985 = vmatprep.subr.bf16.mxu0 %v7894_v11  ;;  %6017 = vmatprep.subr.bf16.mxu1 %v7896_v12 }
 0x141   :  { %5987 = vmatpush1.bf16.msra.mxu0 %v7904_v24  ;;  %6019 = vmatpush1.bf16.msra.mxu1 %v7906_v25 }
 0x142   :  { %5989 = vmatprep.subr.bf16.mxu0 %v7910_v28  ;;  %6021 = vmatprep.subr.bf16.mxu1 %v7912_v29 }
 0x145   :  { %5991 = vmatpush1.bf16.msra.mxu0 %v7916_v40  ;;  %6023 = vmatpush1.bf16.msra.mxu1 %v7918_v41 }
 0x146   :  { %5993 = vmatprep.subr.bf16.mxu0 %v7922_v43  ;;  %6025 = vmatprep.subr.bf16.mxu1 %v7924_v46 }
 0x149   :  { %5995 = vmatpush1.bf16.msra.mxu0 %v7928_v52  ;;  %6027 = vmatpush1.bf16.msra.mxu1 %v7930_v53 }
 0x14a   :  { %6029 = vmatprep.subr.bf16.mxu0 %v7825_v9  ;;  %6061 = vmatprep.subr.bf16.mxu1 %v7829_v13  ;;  %v240_v9 = vrot.slane %v235_v3, %v7974_v1  ;;  %v248_v13 = vrot.slane %v235_v3, %v7976_v2 }
 0x1de   :  { %v343_v54 = vpop.f32.mrb[0].mxu0 }
 0x1df   :  { %v345_v55 = vpop.f32.mrb[1].mxu0  ;;  %v420_v58 = vpop.f32.mrb[0].mxu1  ;;  %v7997_v32 = vadd.f32 %v343_v54, %v240_v9 }
 0x1e0   :  { %v422_v59 = vpop.f32.mrb[1].mxu1  ;;  %v7999_v33 = vadd.f32 %v345_v55, %v244_v8  ;;  %v8006_v54 = vadd.f32 %v420_v58, %v248_v13 }
 0x1e1   :  { %v8003_v62 = vadd.f32 %v422_v59, %v252_v10 }
 0x1e6   :  { %v349_v15 = vpop.f32.mrb[2].mxu0  ;;  %v426_v16 = vpop.f32.mrb[2].mxu1 }
 0x1e7   :  { %v7989_v17 = vadd.f32 %v349_v15, %v240_v9  ;;  %v351_v19 = vpop.f32.mrb[3].mxu0  ;;  %v7991_v20 = vadd.f32 %v426_v16, %v248_v13  ;;  %v428_v21 = vpop.f32.mrb[3].mxu1 }
 0x1e8   :  { %v7993_v26 = vadd.f32 %v351_v19, %v244_v8  ;;  %v7995_v27 = vadd.f32 %v428_v21, %v252_v10 }
 0x1ff   :  { %v561_v34 = vpop.f32.mrb[4].mxu0  ;;  %v632_v37 = vpop.f32.mrb[4].mxu1 }
 0x200   :  { %v637_v38 = vadd.f32 %v561_v34, %v7997_v32  ;;  %v563_v39 = vpop.f32.mrb[5].mxu0  ;;  %v634_v42 = vpop.f32.mrb[5].mxu1  ;;  %v639_v3 = vadd.f32 %v632_v37, %v8006_v54 }
 0x201   :  { %v638_v47 = vadd.f32 %v563_v39, %v7999_v33  ;;  %v640_v63 = vadd.f32 %v634_v42, %v8003_v62 }
 0x202   :  { %v5717_v50 = vmul.f32 -1.442695, %v637_v38 }
 0x203   :  { %v5718_v51 = vmul.f32 -1.442695, %v638_v47  ;;  %v5719_v55 = vmul.f32 -1.442695, %v640_v63 }
 0x204   :  { %6861 = vpow2.f32 %v5717_v50 }
 0x205   :  { %6863 = vpow2.f32 %v5718_v51 }
 0x206   :  { %6865 = vpow2.f32 %v5719_v55 }
 0x207   :  { %6867 = vtanh.f32 %v639_v3 }
 0x20e   :  { %v6862_v9 = vpop.eup %6861 }
 0x20f   :  { %v6864_v8 = vpop.eup %6863  ;;  %v644_v15 = vadd.f32 1.0, %v6862_v9  ;;  %v1170_v9 = vld [vmem:[#allocation3 + $0x8] sm:$0xff] }
 0x210   :  { %v650_v16 = vadd.f32 1.0, %v6864_v8  ;;  %v6866_v19 = vpop.eup %6865  ;;  %v1174_v8 = vld [vmem:[#allocation3 + $0x28] sm:$0xff] }
 0x211   :  { %6869 = vrcp.f32 %v644_v15  ;;  %v6868_v21 = vpop.eup %6867  ;;  %v657_v38 = vadd.f32 1.0, %v6866_v19  ;;  %v1172_v15 = vld [vmem:[#allocation3 + $0x18] sm:$0xff] }
 0x212   :  { %6871 = vrcp.f32 %v650_v16  ;;  %v8054_v16 = vpack.c.bf16 %v1174_v8, %v1170_v9  ;;  %v1176_v19 = vld [vmem:[#allocation3 + $0x38] sm:$0xff]  ;;  %v1199_v9 = vld [vmem:[#allocation3 + $0xf0] sm:$0xff] }
 0x213   :  { %6873 = vrcp.f32 %v657_v38  ;;  %v1171_v38 = vld [vmem:[#allocation3 + $0x10] sm:$0xff] }
 0x21b   :  { %v6870_v59 = vpop.eup %6869 }
 0x21c   :  { %v6872_v10 = vpop.eup %6871  ;;  %v661_v34 = vmul.f32 %v6870_v59, %v6868_v21  ;;  %v1169_v21 = vld [vmem:[#allocation3] sm:$0xff] }
 0x21d   :  { %v660_v39 = vmul.f32 0.0, %v6872_v10  ;;  %v6874_v13 = vpop.eup %6873  ;;  %v1173_v59 = vld [vmem:[#allocation3 + $0x20] sm:$0xff]  ;;  %v8056_v10 = vpack.c.bf16 %v1176_v19, %v1172_v15  ;;  %v1202_v15 = vld [vmem:[#allocation3 + $0x108] sm:$0xff] }
 0x21e   :  { %v1206_v19 = vld [vmem:[#allocation3 + $0x128] sm:$0xff] }
 0x21f   :  { %v8009_v58 = vadd.f32 %v661_v34, %v660_v39  ;;  %v8058_v34 = vpack.c.bf16 %v1173_v59, %v1169_v21  ;;  %v1175_v39 = vld [vmem:[#allocation3 + $0x30] sm:$0xff]  ;;  %v1204_v21 = vld [vmem:[#allocation3 + $0x118] sm:$0xff]  ;;  %v8102_v59 = vpack.c.bf16 %v1206_v19, %v1202_v15  ;;  %v1221_v19 = vld [vmem:[#allocation3 + $0x1a0] sm:$0xff] }
 0x221   :  { %6875 = vtanh.f32 %v8009_v58 }
 0x22b   :  { %v6876_v37 = vpop.eup %6875 }
 0x22c   :  { %v664_v42 = vmul.f32 %v6876_v37, %v6874_v13  ;;  %v1178_v13 = vld [vmem:[#allocation3 + $0x48] sm:$0xff] }
 0x22d   :  { %v1182_v37 = vld [vmem:[#allocation3 + $0x68] sm:$0xff] }
 0x22e   :  { %665 = vst [vmem:[#allocation2] sm:$0x3] %v664_v42  ;;  %795 = vmatmul.mubr.f32.vlgmr.msra.gmra.mrb[6].mxu0 %v664_v42  ;;  %866 = vmatmul.mubr.f32.vlgmr.msra.gmra.mrb[6].mxu1 %v664_v42  ;;  %v1180_v42 = vld [vmem:[#allocation3 + $0x58] sm:$0xff] }
 0x22f   :  { %6031 = vmatpush1.bf16.msra.mxu0 %v7831_v14  ;;  %6063 = vmatpush1.bf16.msra.mxu1 %v7835_v18 }
 0x230   :  { %6033 = vmatprep.subr.bf16.mxu0 %v7839_v22  ;;  %6065 = vmatprep.subr.bf16.mxu1 %v7841_v23 }
 0x231   :  { %1047 = vmatprep.mubr.f32.mxu0 %v7506_v0  ;;  %1118 = vmatprep.mubr.f32.mxu1 %v7506_v0 }
 0x233   :  { %6035 = vmatpush1.bf16.msra.mxu0 %v7847_v30  ;;  %6067 = vmatpush1.bf16.msra.mxu1 %v7849_v31 }
 0x234   :  { %6037 = vmatprep.subr.bf16.mxu0 %v7853_v35  ;;  %6069 = vmatprep.subr.bf16.mxu1 %v7855_v36 }
 0x237   :  { %6039 = vmatpush1.bf16.msra.mxu0 %v7861_v44  ;;  %6071 = vmatpush1.bf16.msra.mxu1 %v7863_v45 }
 0x238   :  { %6041 = vmatprep.subr.bf16.mxu0 %v7867_v48  ;;  %6073 = vmatprep.subr.bf16.mxu1 %v7869_v49 }
 0x23b   :  { %6043 = vmatpush1.bf16.msra.mxu0 %v7873_v56  ;;  %6075 = vmatpush1.bf16.msra.mxu1 %v7875_v57 }
 0x23c   :  { %6045 = vmatprep.subr.bf16.mxu0 %v7879_v60  ;;  %6077 = vmatprep.subr.bf16.mxu1 %v7881_v61 }
 0x23f   :  { %6047 = vmatpush1.bf16.msra.mxu0 %v7885_v5  ;;  %6079 = vmatpush1.bf16.msra.mxu1 %v7887_v6 }
 0x240   :  { %6049 = vmatprep.subr.bf16.mxu0 %v7894_v11  ;;  %6081 = vmatprep.subr.bf16.mxu1 %v7896_v12 }
 0x243   :  { %6051 = vmatpush1.bf16.msra.mxu0 %v7904_v24  ;;  %6083 = vmatpush1.bf16.msra.mxu1 %v7906_v25 }
 0x244   :  { %6053 = vmatprep.subr.bf16.mxu0 %v7910_v28  ;;  %6085 = vmatprep.subr.bf16.mxu1 %v7912_v29  ;;  %v908_v28 = vrot.slane %v8009_v58, 6  ;;  %v8061_v58 = vpack.c.bf16 %v1175_v39, %v1171_v38  ;;  %v1208_v38 = vld [vmem:[#allocation3 + $0x138] sm:$0xff]  ;;  %v1201_v39 = vld [vmem:[#allocation3 + $0x100] sm:$0xff] }
 0x247   :  { %6055 = vmatpush1.bf16.msra.mxu0 %v7916_v40  ;;  %6087 = vmatpush1.bf16.msra.mxu1 %v7918_v41 }
 0x248   :  { %6057 = vmatprep.subr.bf16.mxu0 %v7922_v43  ;;  %6089 = vmatprep.subr.bf16.mxu1 %v7924_v46 }
 0x24b   :  { %6059 = vmatpush1.bf16.msra.mxu0 %v7928_v52  ;;  %6091 = vmatpush1.bf16.msra.mxu1 %v7930_v53 }
 0x24c   :  { %6093 = vmatprep.subr.bf16.mxu0 %v8054_v16  ;;  %6125 = vmatprep.subr.bf16.mxu1 %v8056_v10 }
 0x301   :  { %v796_v14 = vpop.f32.mrb[6].mxu0  ;;  %v867_v18 = vpop.f32.mrb[6].mxu1 }
 0x302   :  { %v876_v22 = vrot.slane %v796_v14, 6  ;;  %v798_v23 = vpop.f32.mrb[7].mxu0  ;;  %v869_v30 = vpop.f32.mrb[7].mxu1  ;;  %v878_v56 = vrot.slane %v867_v18, 6  ;;  %v8066_v14 = vpack.c.bf16 %v1182_v37, %v1178_v13  ;;  %v1184_v18 = vld [vmem:[#allocation3 + $0x78] sm:$0xff]  ;;  %v1205_v13 = vld [vmem:[#allocation3 + $0x120] sm:$0xff]  ;;  %v8104_v37 = vpack.c.bf16 %v1208_v38, %v1204_v21 }
 0x303   :  { %v877_v31 = vrot.slane %v798_v23, 6  ;;  %v879_v48 = vrot.slane %v869_v30, 6  ;;  %v1181_v23 = vld [vmem:[#allocation3 + $0x60] sm:$0xff]  ;;  %v8068_v30 = vpack.c.bf16 %v1184_v18, %v1180_v42  ;;  %v8106_v42 = vpack.c.bf16 %v1205_v13, %v1201_v39  ;;  %v1203_v18 = vld [vmem:[#allocation3 + $0x110] sm:$0xff] }
 0x304   :  { %v884_v35 = vadd.f32 %v876_v22, %v7997_v32  ;;  %v886_v60 = vadd.f32 %v878_v56, %v8006_v54  ;;  %v1177_v22 = vld [vmem:[#allocation3 + $0x40] sm:$0xff]  ;;  %v1219_v21 = vld [vmem:[#allocation3 + $0x190] sm:$0xff] }
 0x305   :  { %v885_v36 = vadd.f32 %v877_v31, %v7999_v33  ;;  %v887_v49 = vadd.f32 %v879_v48, %v8003_v62  ;;  %v8070_v31 = vpack.c.bf16 %v1181_v23, %v1177_v22  ;;  %v1190_v48 = vld [vmem:[#allocation3 + $0xa8] sm:$0xff]  ;;  %v1207_v22 = vld [vmem:[#allocation3 + $0x130] sm:$0xff] }
 0x306   :  { %v5720_v44 = vmul.f32 -1.442695, %v884_v35  ;;  %v1179_v35 = vld [vmem:[#allocation3 + $0x50] sm:$0xff]  ;;  %v1210_v23 = vld [vmem:[#allocation3 + $0x148] sm:$0xff] }
 0x307   :  { %v5721_v45 = vmul.f32 -1.442695, %v885_v36  ;;  %v5722_v57 = vmul.f32 -1.442695, %v887_v49  ;;  %v1183_v36 = vld [vmem:[#allocation3 + $0x70] sm:$0xff]  ;;  %v1188_v49 = vld [vmem:[#allocation3 + $0x98] sm:$0xff] }
 0x308   :  { %6877 = vpow2.f32 %v5720_v44  ;;  %v8073_v44 = vpack.c.bf16 %v1183_v36, %v1179_v35  ;;  %v8109_v35 = vpack.c.bf16 %v1207_v22, %v1203_v18  ;;  %v1214_v36 = vld [vmem:[#allocation3 + $0x168] sm:$0xff]  ;;  %v1223_v38 = vld [vmem:[#allocation3 + $0x1b0] sm:$0xff] }
 0x309   :  { %6879 = vpow2.f32 %v5721_v45  ;;  %v1186_v45 = vld [vmem:[#allocation3 + $0x88] sm:$0xff]  ;;  %v8133_v13 = vpack.c.bf16 %v1223_v38, %v1219_v21 }
 0x30a   :  { %6881 = vpow2.f32 %v5722_v57  ;;  %v8078_v56 = vpack.c.bf16 %v1190_v48, %v1186_v45  ;;  %v1192_v57 = vld [vmem:[#allocation3 + $0xb8] sm:$0xff] }
 0x30b   :  { %6883 = vtanh.f32 %v886_v60  ;;  %v1185_v60 = vld [vmem:[#allocation3 + $0x80] sm:$0xff]  ;;  %v1212_v45 = vld [vmem:[#allocation3 + $0x158] sm:$0xff] }
 0x30c   :  { %v1216_v48 = vld [vmem:[#allocation3 + $0x178] sm:$0xff] }
 0x312   :  { %v6878_v61 = vpop.eup %6877 }
 0x313   :  { %v6880_v5 = vpop.eup %6879  ;;  %v891_v6 = vadd.f32 1.0, %v6878_v61  ;;  %v1189_v61 = vld [vmem:[#allocation3 + $0xa0] sm:$0xff] }
 0x314   :  { %v897_v11 = vadd.f32 1.0, %v6880_v5  ;;  %v6882_v12 = vpop.eup %6881  ;;  %v8080_v5 = vpack.c.bf16 %v1192_v57, %v1188_v49  ;;  %v8113_v49 = vpack.c.bf16 %v1214_v36, %v1210_v23  ;;  %v8115_v57 = vpack.c.bf16 %v1216_v48, %v1212_v45 }
 0x315   :  { %6885 = vrcp.f32 %v891_v6  ;;  %v6884_v24 = vpop.eup %6883  ;;  %v904_v41 = vadd.f32 1.0, %v6882_v12  ;;  %v8082_v6 = vpack.c.bf16 %v1189_v61, %v1185_v60  ;;  %v1191_v12 = vld [vmem:[#allocation3 + $0xb0] sm:$0xff]  ;;  %v1209_v60 = vld [vmem:[#allocation3 + $0x140] sm:$0xff] }
 0x316   :  { %6887 = vrcp.f32 %v897_v11  ;;  %v1187_v11 = vld [vmem:[#allocation3 + $0x90] sm:$0xff]  ;;  %v1213_v61 = vld [vmem:[#allocation3 + $0x160] sm:$0xff] }
 0x317   :  { %6889 = vrcp.f32 %v904_v41  ;;  %v1200_v41 = vld [vmem:[#allocation3 + $0xf8] sm:$0xff] }
 0x31f   :  { %v6886_v25 = vpop.eup %6885 }
 0x320   :  { %v6888_v29 = vpop.eup %6887  ;;  %v911_v40 = vmul.f32 %v6886_v25, %v6884_v24  ;;  %v8085_v24 = vpack.c.bf16 %v1191_v12, %v1187_v11  ;;  %v1194_v25 = vld [vmem:[#allocation3 + $0xc8] sm:$0xff]  ;;  %v1211_v11 = vld [vmem:[#allocation3 + $0x150] sm:$0xff]  ;;  %v8118_v12 = vpack.c.bf16 %v1213_v61, %v1209_v60 }
 0x321   :  { %v910_v47 = vmul.f32 %v6888_v29, %v908_v28  ;;  %v6890_v51 = vpop.eup %6889  ;;  %v1198_v28 = vld [vmem:[#allocation3 + $0xe8] sm:$0xff]  ;;  %v1196_v29 = vld [vmem:[#allocation3 + $0xd8] sm:$0xff] }
 0x323   :  { %v8049_v50 = vadd.f32 %v911_v40, %v910_v47  ;;  %v8090_v40 = vpack.c.bf16 %v1198_v28, %v1194_v25  ;;  %v1193_v47 = vld [vmem:[#allocation3 + $0xc0] sm:$0xff]  ;;  %v1215_v25 = vld [vmem:[#allocation3 + $0x170] sm:$0xff]  ;;  %v1218_v28 = vld [vmem:[#allocation3 + $0x188] sm:$0xff] }
 0x325   :  { %6891 = vtanh.f32 %v8049_v50 }
 0x32f   :  { %v6892_v63 = vpop.eup %6891 }
 0x330   :  { %v914_v55 = vmul.f32 %v6892_v63, %v6890_v51  ;;  %v1197_v51 = vld [vmem:[#allocation3 + $0xe0] sm:$0xff]  ;;  %v8092_v63 = vpack.c.bf16 %v1200_v41, %v1196_v29  ;;  %v1222_v29 = vld [vmem:[#allocation3 + $0x1a8] sm:$0xff]  ;;  %v8122_v41 = vpack.c.bf16 %v1215_v25, %v1211_v11 }
 0x332   :  { %915 = vst [vmem:[#allocation2] sm:$0xc] %v914_v55  ;;  %v981_v3 = vrot.slane %v914_v55, 2  ;;  %v8094_v55 = vpack.c.bf16 %v1197_v51, %v1193_v47  ;;  %v8124_v47 = vpack.c.bf16 %v1222_v29, %v1218_v28  ;;  %v1220_v51 = vld [vmem:[#allocation3 + $0x198] sm:$0xff] }
 0x334   :  { %1048 = vmatmul.mubr.f32.vlgmr.msra.gmra.mrb[8].mxu0 %v981_v3  ;;  %1119 = vmatmul.mubr.f32.vlgmr.msra.gmra.mrb[8].mxu1 %v981_v3  ;;  %v1195_v3 = vld [vmem:[#allocation3 + $0xd0] sm:$0xff] }
 0x335   :  { %1300 = vmatprep.mubr.f32.mxu0 %v7506_v0  ;;  %1371 = vmatprep.mubr.f32.mxu1 %v7506_v0  ;;  %v8097_v8 = vpack.c.bf16 %v1199_v9, %v1195_v3  ;;  %v1224_v3 = vld [vmem:[#allocation3 + $0x1b8] sm:$0xff]  ;;  %v1217_v9 = vld [vmem:[#allocation3 + $0x180] sm:$0xff] }
 0x336   :  { %6095 = vmatpush1.bf16.msra.mxu0 %v8058_v34  ;;  %6127 = vmatpush1.bf16.msra.mxu1 %v8061_v58  ;;  %v8126_v15 = vpack.c.bf16 %v1224_v3, %v1220_v51  ;;  %v8129_v39 = vpack.c.bf16 %v1221_v19, %v1217_v9 }
 0x337   :  { %6097 = vmatprep.subr.bf16.mxu0 %v8066_v14  ;;  %6129 = vmatprep.subr.bf16.mxu1 %v8068_v30 }
 0x33a   :  { %6099 = vmatpush1.bf16.msra.mxu0 %v8070_v31  ;;  %6131 = vmatpush1.bf16.msra.mxu1 %v8073_v44 }
 0x33b   :  { %6101 = vmatprep.subr.bf16.mxu0 %v8078_v56  ;;  %6133 = vmatprep.subr.bf16.mxu1 %v8080_v5 }
 0x33e   :  { %6103 = vmatpush1.bf16.msra.mxu0 %v8082_v6  ;;  %6135 = vmatpush1.bf16.msra.mxu1 %v8085_v24 }
 0x33f   :  { %6105 = vmatprep.subr.bf16.mxu0 %v8090_v40  ;;  %6137 = vmatprep.subr.bf16.mxu1 %v8092_v63 }
 0x342   :  { %6107 = vmatpush1.bf16.msra.mxu0 %v8094_v55  ;;  %6139 = vmatpush1.bf16.msra.mxu1 %v8097_v8 }
 0x343   :  { %6109 = vmatprep.subr.bf16.mxu0 %v8102_v59  ;;  %6141 = vmatprep.subr.bf16.mxu1 %v8104_v37 }
 0x346   :  { %6111 = vmatpush1.bf16.msra.mxu0 %v8106_v42  ;;  %6143 = vmatpush1.bf16.msra.mxu1 %v8109_v35 }
 0x347   :  { %6113 = vmatprep.subr.bf16.mxu0 %v8113_v49  ;;  %6145 = vmatprep.subr.bf16.mxu1 %v8115_v57 }
 0x34a   :  { %6115 = vmatpush1.bf16.msra.mxu0 %v8118_v12  ;;  %6147 = vmatpush1.bf16.msra.mxu1 %v8122_v41 }
 0x34b   :  { %6117 = vmatprep.subr.bf16.mxu0 %v8124_v47  ;;  %6149 = vmatprep.subr.bf16.mxu1 %v8126_v15 }
 0x34e   :  { %6119 = vmatpush1.bf16.msra.mxu0 %v8129_v39  ;;  %6151 = vmatpush1.bf16.msra.mxu1 %v8133_v13 }
 0x34f   :  { %6121 = vmatprep.subr.bf16.mxu0 %v7922_v43  ;;  %6153 = vmatprep.subr.bf16.mxu1 %v7924_v46 }
 0x352   :  { %6123 = vmatpush1.bf16.msra.mxu0 %v7928_v52  ;;  %6155 = vmatpush1.bf16.msra.mxu1 %v7930_v53 }
 0x353   :  { %6157 = vmatprep.subr.bf16.mxu0 %v8054_v16  ;;  %6189 = vmatprep.subr.bf16.mxu1 %v8056_v10 }
 0x407   :  { %v1049_v18 = vpop.f32.mrb[8].mxu0  ;;  %v1120_v22 = vpop.f32.mrb[8].mxu1 }
 0x408   :  { %v1129_v23 = vrot.slane %v1049_v18, 4  ;;  %v1051_v36 = vpop.f32.mrb[9].mxu0  ;;  %v1122_v45 = vpop.f32.mrb[9].mxu1  ;;  %v1131_v53 = vrot.slane %v1120_v22, 4  ;;  %v1161_v18 = vrot.slane %v8049_v50, 6  ;;  %v1479_v50 = vld [vmem:[#allocation3 + $0x1c8] sm:$0xff] }
 0x409   :  { %v1130_v48 = vrot.slane %v1051_v36, 4  ;;  %v1132_v11 = vrot.slane %v1122_v45, 4 }
 0x40a   :  { %v1137_v60 = vadd.f32 %v1129_v23, %v7997_v32  ;;  %v1139_v28 = vadd.f32 %v1131_v53, %v8006_v54 }
 0x40b   :  { %v1138_v43 = vadd.f32 %v1130_v48, %v7999_v33  ;;  %v1140_v52 = vadd.f32 %v1132_v11, %v8003_v62  ;;  %v1483_v11 = vld [vmem:[#allocation3 + $0x1e8] sm:$0xff] }
 0x40c   :  { %v5723_v61 = vmul.f32 -1.442695, %v1137_v60  ;;  %v8180_v53 = vpack.c.bf16 %v1483_v11, %v1479_v50 }
 0x40d   :  { %v5724_v46 = vmul.f32 -1.442695, %v1138_v43  ;;  %v5725_v25 = vmul.f32 -1.442695, %v1140_v52  ;;  %v1481_v52 = vld [vmem:[#allocation3 + $0x1d8] sm:$0xff] }
 0x40e   :  { %6893 = vpow2.f32 %v5723_v61 }
 0x40f   :  { %6895 = vpow2.f32 %v5724_v46 }
 0x410   :  { %6897 = vpow2.f32 %v5725_v25  ;;  %v1485_v25 = vld [vmem:[#allocation3 + $0x1f8] sm:$0xff] }
 0x411   :  { %6899 = vtanh.f32 %v1139_v28  ;;  %v1478_v28 = vld [vmem:[#allocation3 + $0x1c0] sm:$0xff] }
 0x418   :  { %v6894_v29 = vpop.eup %6893 }
 0x419   :  { %v6896_v51 = vpop.eup %6895  ;;  %v1144_v3 = vadd.f32 1.0, %v6894_v29  ;;  %v1482_v29 = vld [vmem:[#allocation3 + $0x1e0] sm:$0xff] }
 0x41a   :  { %v1150_v9 = vadd.f32 1.0, %v6896_v51  ;;  %v6898_v19 = vpop.eup %6897  ;;  %v8182_v51 = vpack.c.bf16 %v1485_v25, %v1481_v52 }
 0x41b   :  { %6901 = vrcp.f32 %v1144_v3  ;;  %v6900_v21 = vpop.eup %6899  ;;  %v1157_v45 = vadd.f32 1.0, %v6898_v19  ;;  %v8184_v3 = vpack.c.bf16 %v1482_v29, %v1478_v28  ;;  %v1484_v19 = vld [vmem:[#allocation3 + $0x1f0] sm:$0xff] }
 0x41c   :  { %6903 = vrcp.f32 %v1150_v9  ;;  %v1480_v9 = vld [vmem:[#allocation3 + $0x1d0] sm:$0xff] }
 0x41d   :  { %6905 = vrcp.f32 %v1157_v45 }
 0x425   :  { %v6902_v38 = vpop.eup %6901 }
 0x426   :  { %v6904_v23 = vpop.eup %6903  ;;  %v1164_v36 = vmul.f32 %v6902_v38, %v6900_v21  ;;  %v8187_v21 = vpack.c.bf16 %v1484_v19, %v1480_v9 }
 0x427   :  { %v1163_v22 = vmul.f32 %v6904_v23, %v1161_v18  ;;  %v6906_v60 = vpop.eup %6905 }
 0x429   :  { %v8149_v48 = vadd.f32 %v1164_v36, %v1163_v22 }
 0x42b   :  { %6907 = vtanh.f32 %v8149_v48 }
 0x435   :  { %v6908_v43 = vpop.eup %6907 }
 0x436   :  { %v1167_v61 = vmul.f32 %v6908_v43, %v6906_v60 }
 0x438   :  { %1168 = vst [vmem:[#allocation2] sm:$0x30] %v1167_v61  ;;  %v1234_v46 = vrot.slane %v1167_v61, 4 }
 0x43a   :  { %1301 = vmatmul.mubr.f32.vlgmr.msra.gmra.mrb[10].mxu0 %v1234_v46  ;;  %1372 = vmatmul.mubr.f32.vlgmr.msra.gmra.mrb[10].mxu1 %v1234_v46 }
 0x43b   :  { %6159 = vmatpush1.bf16.msra.mxu0 %v8058_v34  ;;  %6191 = vmatpush1.bf16.msra.mxu1 %v8061_v58 }
 0x43c   :  { %6161 = vmatprep.subr.bf16.mxu0 %v8066_v14  ;;  %6193 = vmatprep.subr.bf16.mxu1 %v8068_v30 }
 0x43d   :  { %1553 = vmatprep.mubr.f32.mxu0 %v7506_v0  ;;  %1624 = vmatprep.mubr.f32.mxu1 %v7506_v0 }
 0x43f   :  { %6163 = vmatpush1.bf16.msra.mxu0 %v8070_v31  ;;  %6195 = vmatpush1.bf16.msra.mxu1 %v8073_v44 }
 0x440   :  { %6165 = vmatprep.subr.bf16.mxu0 %v8078_v56  ;;  %6197 = vmatprep.subr.bf16.mxu1 %v8080_v5 }
 0x443   :  { %6167 = vmatpush1.bf16.msra.mxu0 %v8082_v6  ;;  %6199 = vmatpush1.bf16.msra.mxu1 %v8085_v24 }
 0x444   :  { %6169 = vmatprep.subr.bf16.mxu0 %v8090_v40  ;;  %6201 = vmatprep.subr.bf16.mxu1 %v8092_v63 }
 0x447   :  { %6171 = vmatpush1.bf16.msra.mxu0 %v8094_v55  ;;  %6203 = vmatpush1.bf16.msra.mxu1 %v8097_v8 }
 0x448   :  { %6173 = vmatprep.subr.bf16.mxu0 %v8102_v59  ;;  %6205 = vmatprep.subr.bf16.mxu1 %v8104_v37 }
 0x44b   :  { %6175 = vmatpush1.bf16.msra.mxu0 %v8106_v42  ;;  %6207 = vmatpush1.bf16.msra.mxu1 %v8109_v35 }
 0x44c   :  { %6177 = vmatprep.subr.bf16.mxu0 %v8113_v49  ;;  %6209 = vmatprep.subr.bf16.mxu1 %v8115_v57 }
 0x44f   :  { %6179 = vmatpush1.bf16.msra.mxu0 %v8118_v12  ;;  %6211 = vmatpush1.bf16.msra.mxu1 %v8122_v41 }
 0x450   :  { %6181 = vmatprep.subr.bf16.mxu0 %v8124_v47  ;;  %6213 = vmatprep.subr.bf16.mxu1 %v8126_v15 }
 0x453   :  { %6183 = vmatpush1.bf16.msra.mxu0 %v8129_v39  ;;  %6215 = vmatpush1.bf16.msra.mxu1 %v8133_v13 }
 0x454   :  { %6185 = vmatprep.subr.bf16.mxu0 %v8180_v53  ;;  %6217 = vmatprep.subr.bf16.mxu1 %v8182_v51 }
 0x457   :  { %6187 = vmatpush1.bf16.msra.mxu0 %v8184_v3  ;;  %6219 = vmatpush1.bf16.msra.mxu1 %v8187_v21 }
 0x458   :  { %6221 = vmatprep.subr.bf16.mxu0 %v8054_v16  ;;  %6253 = vmatprep.subr.bf16.mxu1 %v8056_v10 }
 0x50d   :  { %v1302_v38 = vpop.f32.mrb[10].mxu0  ;;  %v1373_v18 = vpop.f32.mrb[10].mxu1 }
 0x50e   :  { %v1382_v23 = vrot.slane %v1302_v38, 2  ;;  %v1304_v36 = vpop.f32.mrb[11].mxu0  ;;  %v1375_v45 = vpop.f32.mrb[11].mxu1  ;;  %v1384_v52 = vrot.slane %v1373_v18, 2 }
 0x50f   :  { %v1383_v22 = vrot.slane %v1304_v36, 2  ;;  %v1385_v50 = vrot.slane %v1375_v45, 2  ;;  %v1414_v36 = vrot.slane %v8149_v48, 6 }
 0x510   :  { %v1390_v60 = vadd.f32 %v1382_v23, %v7997_v32  ;;  %v1392_v28 = vadd.f32 %v1384_v52, %v8006_v54 }
 0x511   :  { %v1391_v43 = vadd.f32 %v1383_v22, %v7999_v33  ;;  %v1393_v11 = vadd.f32 %v1385_v50, %v8003_v62 }
 0x512   :  { %v5726_v61 = vmul.f32 -1.442695, %v1390_v60 }
 0x513   :  { %v5727_v46 = vmul.f32 -1.442695, %v1391_v43  ;;  %v5728_v25 = vmul.f32 -1.442695, %v1393_v11 }
 0x514   :  { %6909 = vpow2.f32 %v5726_v61 }
 0x515   :  { %6911 = vpow2.f32 %v5727_v46 }
 0x516   :  { %6913 = vpow2.f32 %v5728_v25 }
 0x517   :  { %6915 = vtanh.f32 %v1392_v28 }
 0x51e   :  { %v6910_v29 = vpop.eup %6909 }
 0x51f   :  { %v6912_v9 = vpop.eup %6911  ;;  %v1397_v19 = vadd.f32 1.0, %v6910_v29 }
 0x520   :  { %v1403_v38 = vadd.f32 1.0, %v6912_v9  ;;  %v6914_v32 = vpop.eup %6913 }
 0x521   :  { %6917 = vrcp.f32 %v1397_v19  ;;  %v6916_v33 = vpop.eup %6915  ;;  %v1410_v62 = vadd.f32 1.0, %v6914_v32 }
 0x522   :  { %6919 = vrcp.f32 %v1403_v38 }
 0x523   :  { %6921 = vrcp.f32 %v1410_v62 }
 0x52b   :  { %v6918_v23 = vpop.eup %6917 }
 0x52c   :  { %v6920_v45 = vpop.eup %6919  ;;  %v1417_v22 = vmul.f32 %v6918_v23, %v6916_v33 }
 0x52d   :  { %v1416_v18 = vmul.f32 %v6920_v45, %v1414_v36  ;;  %v6922_v54 = vpop.eup %6921 }
 0x52f   :  { %v8199_v60 = vadd.f32 %v1417_v22, %v1416_v18 }
 0x531   :  { %6923 = vtanh.f32 %v8199_v60 }
 0x53b   :  { %v6924_v43 = vpop.eup %6923 }
 0x53c   :  { %v1420_v61 = vmul.f32 %v6924_v43, %v6922_v54 }
 0x53e   :  { %1421 = vst [vmem:[#allocation2] sm:$0xc0] %v1420_v61  ;;  %v1487_v46 = vrot.slane %v1420_v61, 6 }
 0x540   :  { %1554 = vmatmul.mubr.f32.vlgmr.msra.gmra.mrb[12].mxu0 %v1487_v46  ;;  %1625 = vmatmul.mubr.f32.vlgmr.msra.gmra.mrb[12].mxu1 %v1487_v46  ;;  %v1655_v46 = vrot.slane %v8199_v60, 6 }
 0x541   :  { %6223 = vmatpush1.bf16.msra.mxu0 %v8058_v34  ;;  %6255 = vmatpush1.bf16.msra.mxu1 %v8061_v58 }
 0x542   :  { %6225 = vmatprep.subr.bf16.mxu0 %v8066_v14  ;;  %6257 = vmatprep.subr.bf16.mxu1 %v8068_v30 }
 0x543   :  { %1791 = vmatprep.mubr.f32.mxu0 %v7506_v0  ;;  %1862 = vmatprep.mubr.f32.mxu1 %v7506_v0 }
 0x545   :  { %v2419_v48 = vld [vmem:[#allocation2] sm:$0xff]  ;;  %6227 = vmatpush1.bf16.msra.mxu0 %v8070_v31  ;;  %6259 = vmatpush1.bf16.msra.mxu1 %v8073_v44 }
 0x546   :  { %2423 = vadd.xlane.f32.xlu0 %v2419_v48  ;;  %6229 = vmatprep.subr.bf16.mxu0 %v8078_v56 }
 0x547   :  { %6261 = vmatprep.subr.bf16.mxu1 %v8080_v5 }
 0x549   :  { %6231 = vmatpush1.bf16.msra.mxu0 %v8082_v6  ;;  %6263 = vmatpush1.bf16.msra.mxu1 %v8085_v24 }
 0x54a   :  { %6233 = vmatprep.subr.bf16.mxu0 %v8090_v40  ;;  %6265 = vmatprep.subr.bf16.mxu1 %v8092_v63 }
 0x54d   :  { %6235 = vmatpush1.bf16.msra.mxu0 %v8094_v55  ;;  %6267 = vmatpush1.bf16.msra.mxu1 %v8097_v8 }
 0x54e   :  { %6237 = vmatprep.subr.bf16.mxu0 %v8102_v59  ;;  %6269 = vmatprep.subr.bf16.mxu1 %v8104_v37 }
 0x551   :  { %6239 = vmatpush1.bf16.msra.mxu0 %v8106_v42  ;;  %6271 = vmatpush1.bf16.msra.mxu1 %v8109_v35 }
 0x552   :  { %6241 = vmatprep.subr.bf16.mxu0 %v8113_v49  ;;  %6273 = vmatprep.subr.bf16.mxu1 %v8115_v57 }
 0x555   :  { %6243 = vmatpush1.bf16.msra.mxu0 %v8118_v12  ;;  %6275 = vmatpush1.bf16.msra.mxu1 %v8122_v41 }
 0x556   :  { %6245 = vmatprep.subr.bf16.mxu0 %v8124_v47  ;;  %6277 = vmatprep.subr.bf16.mxu1 %v8126_v15 }
 0x559   :  { %6247 = vmatpush1.bf16.msra.mxu0 %v8129_v39  ;;  %6279 = vmatpush1.bf16.msra.mxu1 %v8133_v13 }
 0x55a   :  { %6249 = vmatprep.subr.bf16.mxu0 %v8180_v53  ;;  %6281 = vmatprep.subr.bf16.mxu1 %v8182_v51 }
 0x55d   :  { %6251 = vmatpush1.bf16.msra.mxu0 %v8184_v3  ;;  %6283 = vmatpush1.bf16.msra.mxu1 %v8187_v21 }
 0x55e   :  { %6285 = vmatprep.subr.bf16.mxu0 %v8054_v16  ;;  %6317 = vmatprep.subr.bf16.mxu1 %v8056_v10 }
 0x5d3   :  { %v2424_v50 = vpop.xlane.xlu0 %2423 }
 0x5d4   :  { %v2428_v11 = vmul.f32 0.0078125, %v2424_v50 }
 0x5d6   :  { %v8236_v52 = vsub.f32 %v2419_v48, %v2428_v11 }
 0x5d8   :  { %v2432_v25 = vmul.f32 %v8236_v52, %v8236_v52 }
 0x5da   :  { %2434 = vadd.xlane.f32.xlu1 %v2432_v25 }
 0x613   :  { %v1555_v28 = vpop.f32.mrb[12].mxu0  ;;  %v1626_v29 = vpop.f32.mrb[12].mxu1 }
 0x614   :  { %v1631_v9 = vadd.f32 %v1555_v28, %v7989_v17  ;;  %v1557_v19 = vpop.f32.mrb[13].mxu0  ;;  %v1628_v38 = vpop.f32.mrb[13].mxu1  ;;  %v1633_v36 = vadd.f32 %v1626_v29, %v7991_v20 }
 0x615   :  { %v1632_v32 = vadd.f32 %v1557_v19, %v7993_v26  ;;  %v1634_v10 = vadd.f32 %v1628_v38, %v7995_v27 }
 0x616   :  { %v5729_v33 = vmul.f32 -1.442695, %v1631_v9 }
 0x617   :  { %v5730_v16 = vmul.f32 -1.442695, %v1632_v32  ;;  %v5731_v23 = vmul.f32 -1.442695, %v1634_v10 }
 0x618   :  { %6925 = vpow2.f32 %v5729_v33 }
 0x619   :  { %6927 = vpow2.f32 %v5730_v16 }
 0x61a   :  { %6929 = vpow2.f32 %v5731_v23  ;;  %v2167_v23 = vld [vmem:[#allocation3 + $0x8] sm:$0xff] }
 0x61b   :  { %6931 = vtanh.f32 %v1633_v36  ;;  %v2171_v36 = vld [vmem:[#allocation3 + $0x28] sm:$0xff] }
 0x622   :  { %v6926_v45 = vpop.eup %6925 }
 0x623   :  { %v6928_v22 = vpop.eup %6927  ;;  %v1638_v62 = vadd.f32 1.0, %v6926_v45  ;;  %v2169_v45 = vld [vmem:[#allocation3 + $0x18] sm:$0xff] }
 0x624   :  { %v1644_v18 = vadd.f32 1.0, %v6928_v22  ;;  %v6930_v54 = vpop.eup %6929  ;;  %v6348_v22 = vpack.c.bf16 %v2171_v36, %v2167_v23  ;;  %v2203_v23 = vld [vmem:[#allocation3 + $0x128] sm:$0xff]  ;;  %v2201_v36 = vld [vmem:[#allocation3 + $0x118] sm:$0xff] }
 0x625   :  { %6933 = vrcp.f32 %v1638_v62  ;;  %v6932_v43 = vpop.eup %6931  ;;  %v1651_v11 = vadd.f32 1.0, %v6930_v54  ;;  %v2173_v62 = vld [vmem:[#allocation3 + $0x38] sm:$0xff]  ;;  %v2170_v54 = vld [vmem:[#allocation3 + $0x20] sm:$0xff] }
 0x626   :  { %6935 = vrcp.f32 %v1644_v18  ;;  %v2166_v18 = vld [vmem:[#allocation3] sm:$0xff] }
 0x627   :  { %6937 = vrcp.f32 %v1651_v11  ;;  %v2175_v11 = vld [vmem:[#allocation3 + $0x48] sm:$0xff] }
 0x62f   :  { %v6934_v61 = vpop.eup %6933 }
 0x630   :  { %v6936_v48 = vpop.eup %6935  ;;  %v1658_v50 = vmul.f32 %v6934_v61, %v6932_v43  ;;  %v6380_v43 = vpack.c.bf16 %v2173_v62, %v2169_v45  ;;  %v6350_v61 = vpack.c.bf16 %v2170_v54, %v2166_v18  ;;  %v2198_v62 = vld [vmem:[#allocation3 + $0x100] sm:$0xff] }
 0x631   :  { %v1657_v25 = vmul.f32 %v6936_v48, %v1655_v46  ;;  %v6938_v29 = vpop.eup %6937  ;;  %v2168_v46 = vld [vmem:[#allocation3 + $0x10] sm:$0xff]  ;;  %v2202_v18 = vld [vmem:[#allocation3 + $0x120] sm:$0xff] }
 0x632   :  { %v2172_v48 = vld [vmem:[#allocation3 + $0x30] sm:$0xff] }
 0x633   :  { %v8245_v28 = vadd.f32 %v1658_v50, %v1657_v25  ;;  %v6382_v50 = vpack.c.bf16 %v2172_v48, %v2168_v46  ;;  %v2179_v25 = vld [vmem:[#allocation3 + $0x68] sm:$0xff]  ;;  %v2204_v46 = vld [vmem:[#allocation3 + $0x130] sm:$0xff] }
 0x634   :  { %v2207_v48 = vld [vmem:[#allocation3 + $0x148] sm:$0xff] }
 0x635   :  { %6939 = vtanh.f32 %v8245_v28 }
 0x63f   :  { %v6940_v9 = vpop.eup %6939 }
 0x640   :  { %v1661_v19 = vmul.f32 %v6940_v9, %v6938_v29  ;;  %v6352_v29 = vpack.c.bf16 %v2179_v25, %v2175_v11  ;;  %v2181_v9 = vld [vmem:[#allocation3 + $0x78] sm:$0xff]  ;;  %v2211_v11 = vld [vmem:[#allocation3 + $0x168] sm:$0xff] }
 0x641   :  { %v2209_v25 = vld [vmem:[#allocation3 + $0x158] sm:$0xff] }
 0x642   :  { %1662 = vst [vmem:[#allocation2 + $0x8] sm:$0x3] %v1661_v19  ;;  %1792 = vmatmul.mubr.f32.vlgmr.msra.gmra.mrb[14].mxu0 %v1661_v19  ;;  %1863 = vmatmul.mubr.f32.vlgmr.msra.gmra.mrb[14].mxu1 %v1661_v19  ;;  %v2174_v19 = vld [vmem:[#allocation3 + $0x40] sm:$0xff] }
 0x643   :  { %6287 = vmatpush1.bf16.msra.mxu0 %v8058_v34  ;;  %6319 = vmatpush1.bf16.msra.mxu1 %v8061_v58 }
 0x644   :  { %6289 = vmatprep.subr.bf16.mxu0 %v8066_v14  ;;  %6321 = vmatprep.subr.bf16.mxu1 %v8068_v30 }
 0x645   :  { %2044 = vmatprep.mubr.f32.mxu0 %v7506_v0  ;;  %2115 = vmatprep.mubr.f32.mxu1 %v7506_v0 }
 0x647   :  { %6291 = vmatpush1.bf16.msra.mxu0 %v8070_v31  ;;  %6323 = vmatpush1.bf16.msra.mxu1 %v8073_v44 }
 0x648   :  { %6293 = vmatprep.subr.bf16.mxu0 %v8078_v56  ;;  %6325 = vmatprep.subr.bf16.mxu1 %v8080_v5 }
 0x64b   :  { %6295 = vmatpush1.bf16.msra.mxu0 %v8082_v6  ;;  %6327 = vmatpush1.bf16.msra.mxu1 %v8085_v24 }
 0x64c   :  { %6297 = vmatprep.subr.bf16.mxu0 %v8090_v40  ;;  %6329 = vmatprep.subr.bf16.mxu1 %v8092_v63 }
 0x64f   :  { %6299 = vmatpush1.bf16.msra.mxu0 %v8094_v55  ;;  %6331 = vmatpush1.bf16.msra.mxu1 %v8097_v8 }
 0x650   :  { %6301 = vmatprep.subr.bf16.mxu0 %v8102_v59  ;;  %6333 = vmatprep.subr.bf16.mxu1 %v8104_v37 }
 0x653   :  { %6303 = vmatpush1.bf16.msra.mxu0 %v8106_v42  ;;  %6335 = vmatpush1.bf16.msra.mxu1 %v8109_v35 }
 0x654   :  { %6305 = vmatprep.subr.bf16.mxu0 %v8113_v49  ;;  %6337 = vmatprep.subr.bf16.mxu1 %v8115_v57 }
 0x657   :  { %6307 = vmatpush1.bf16.msra.mxu0 %v8118_v12  ;;  %6339 = vmatpush1.bf16.msra.mxu1 %v8122_v41 }
 0x658   :  { %6309 = vmatprep.subr.bf16.mxu0 %v8124_v47  ;;  %6341 = vmatprep.subr.bf16.mxu1 %v8126_v15  ;;  %v1905_v47 = vrot.slane %v8245_v28, 6  ;;  %v2177_v28 = vld [vmem:[#allocation3 + $0x58] sm:$0xff] }
 0x65b   :  { %6311 = vmatpush1.bf16.msra.mxu0 %v8129_v39  ;;  %6343 = vmatpush1.bf16.msra.mxu1 %v8133_v13 }
 0x65c   :  { %6313 = vmatprep.subr.bf16.mxu0 %v8180_v53  ;;  %6345 = vmatprep.subr.bf16.mxu1 %v8182_v51 }
 0x65f   :  { %6315 = vmatpush1.bf16.msra.mxu0 %v8184_v3  ;;  %6347 = vmatpush1.bf16.msra.mxu1 %v8187_v21 }
 0x660   :  { %6349 = vmatprep.subr.bf16.mxu0 %v6348_v22  ;;  %6381 = vmatprep.subr.bf16.mxu1 %v6380_v43  ;;  %v2205_v22 = vld [vmem:[#allocation3 + $0x138] sm:$0xff]  ;;  %v6366_v43 = vpack.c.bf16 %v2202_v18, %v2198_v62 }
 0x661   :  { %v6396_v54 = vpack.c.bf16 %v2205_v22, %v2201_v36 }
 0x715   :  { %v1793_v34 = vpop.f32.mrb[14].mxu0  ;;  %v1864_v58 = vpop.f32.mrb[14].mxu1 }
 0x716   :  { %v1873_v14 = vrot.slane %v1793_v34, 6  ;;  %v1795_v30 = vpop.f32.mrb[15].mxu0  ;;  %v1866_v31 = vpop.f32.mrb[15].mxu1  ;;  %v1875_v55 = vrot.slane %v1864_v58, 6  ;;  %v2178_v34 = vld [vmem:[#allocation3 + $0x60] sm:$0xff]  ;;  %v6384_v58 = vpack.c.bf16 %v2181_v9, %v2177_v28  ;;  %v2213_v28 = vld [vmem:[#allocation3 + $0x178] sm:$0xff] }
 0x717   :  { %v1874_v44 = vrot.slane %v1795_v30, 6  ;;  %v1876_v40 = vrot.slane %v1866_v31, 6  ;;  %v2176_v30 = vld [vmem:[#allocation3 + $0x50] sm:$0xff]  ;;  %v6400_v9 = vpack.c.bf16 %v2213_v28, %v2209_v25 }
 0x718   :  { %v1881_v56 = vadd.f32 %v1873_v14, %v7989_v17  ;;  %v1883_v59 = vadd.f32 %v1875_v55, %v7991_v20  ;;  %v6354_v14 = vpack.c.bf16 %v2178_v34, %v2174_v19  ;;  %v2180_v31 = vld [vmem:[#allocation3 + $0x70] sm:$0xff]  ;;  %v2186_v55 = vld [vmem:[#allocation3 + $0xa0] sm:$0xff] }
 0x719   :  { %v1882_v5 = vadd.f32 %v1874_v44, %v7993_v26  ;;  %v1884_v63 = vadd.f32 %v1876_v40, %v7995_v27  ;;  %v6386_v44 = vpack.c.bf16 %v2180_v31, %v2176_v30  ;;  %v2189_v40 = vld [vmem:[#allocation3 + $0xb8] sm:$0xff]  ;;  %v2206_v19 = vld [vmem:[#allocation3 + $0x140] sm:$0xff]  ;;  %v2212_v30 = vld [vmem:[#allocation3 + $0x170] sm:$0xff] }
 0x71a   :  { %v5732_v6 = vmul.f32 -1.442695, %v1881_v56  ;;  %v2183_v56 = vld [vmem:[#allocation3 + $0x88] sm:$0xff]  ;;  %v2210_v34 = vld [vmem:[#allocation3 + $0x160] sm:$0xff] }
 0x71b   :  { %v5733_v24 = vmul.f32 -1.442695, %v1882_v5  ;;  %v5734_v8 = vmul.f32 -1.442695, %v1884_v63  ;;  %v2187_v5 = vld [vmem:[#allocation3 + $0xa8] sm:$0xff]  ;;  %v2182_v63 = vld [vmem:[#allocation3 + $0x80] sm:$0xff] }
 0x71c   :  { %6941 = vpow2.f32 %v5732_v6  ;;  %v2185_v6 = vld [vmem:[#allocation3 + $0x98] sm:$0xff]  ;;  %v2215_v31 = vld [vmem:[#allocation3 + $0x188] sm:$0xff] }
 0x71d   :  { %6943 = vpow2.f32 %v5733_v24  ;;  %v6356_v24 = vpack.c.bf16 %v2187_v5, %v2183_v56 }
 0x71e   :  { %6945 = vpow2.f32 %v5734_v8  ;;  %v6388_v8 = vpack.c.bf16 %v2189_v40, %v2185_v6  ;;  %v2217_v6 = vld [vmem:[#allocation3 + $0x198] sm:$0xff]  ;;  %v2214_v40 = vld [vmem:[#allocation3 + $0x180] sm:$0xff] }
 0x71f   :  { %6947 = vtanh.f32 %v1883_v59  ;;  %v6358_v59 = vpack.c.bf16 %v2186_v55, %v2182_v63  ;;  %v2218_v55 = vld [vmem:[#allocation3 + $0x1a0] sm:$0xff] }
 0x726   :  { %v6942_v37 = vpop.eup %6941 }
 0x727   :  { %v6944_v42 = vpop.eup %6943  ;;  %v1888_v35 = vadd.f32 1.0, %v6942_v37  ;;  %v2184_v37 = vld [vmem:[#allocation3 + $0x90] sm:$0xff] }
 0x728   :  { %v1894_v49 = vadd.f32 1.0, %v6944_v42  ;;  %v6946_v57 = vpop.eup %6945  ;;  %v2188_v42 = vld [vmem:[#allocation3 + $0xb0] sm:$0xff] }
 0x729   :  { %6949 = vrcp.f32 %v1888_v35  ;;  %v6948_v12 = vpop.eup %6947  ;;  %v1901_v13 = vadd.f32 1.0, %v6946_v57  ;;  %v6390_v35 = vpack.c.bf16 %v2188_v42, %v2184_v37  ;;  %v2195_v57 = vld [vmem:[#allocation3 + $0xe8] sm:$0xff]  ;;  %v6374_v37 = vpack.c.bf16 %v2218_v55, %v2214_v40  ;;  %v2470_v40 = vld [vmem:[#allocation5 + $0x40] sm:$0xff]  ;;  %v2435_v55 = vpop.xlane.xlu1 %2434 }
 0x72a   :  { %6951 = vrcp.f32 %v1894_v49  ;;  %v2191_v49 = vld [vmem:[#allocation3 + $0xc8] sm:$0xff] }
 0x72b   :  { %6953 = vrcp.f32 %v1901_v13 }
 0x733   :  { %v6950_v41 = vpop.eup %6949 }
 0x734   :  { %v6952_v15 = vpop.eup %6951  ;;  %v1908_v39 = vmul.f32 %v6950_v41, %v6948_v12  ;;  %v2193_v12 = vld [vmem:[#allocation3 + $0xd8] sm:$0xff]  ;;  %v6360_v41 = vpack.c.bf16 %v2195_v57, %v2191_v49  ;;  %v2467_v49 = vld [vmem:[#allocation5 + $0x28] sm:$0xff] }
 0x735   :  { %v1907_v60 = vmul.f32 %v6952_v15, %v1905_v47  ;;  %v6954_v32 = vpop.eup %6953  ;;  %v2197_v47 = vld [vmem:[#allocation3 + $0xf8] sm:$0xff]  ;;  %v2190_v15 = vld [vmem:[#allocation3 + $0xc0] sm:$0xff] }
 0x736   :  { %v6392_v13 = vpack.c.bf16 %v2197_v47, %v2193_v12  ;;  %v2465_v57 = vld [vmem:[#allocation5 + $0x18] sm:$0xff] }
 0x737   :  { %v8285_v38 = vadd.f32 %v1908_v39, %v1907_v60  ;;  %v2194_v39 = vld [vmem:[#allocation3 + $0xe0] sm:$0xff]  ;;  %v2469_v12 = vld [vmem:[#allocation5 + $0x38] sm:$0xff] }
 0x738   :  { %v6362_v60 = vpack.c.bf16 %v2194_v39, %v2190_v15  ;;  %v6444_v47 = vpack.c.bf16 %v2469_v12, %v2465_v57  ;;  %v2483_v57 = vld [vmem:[#allocation5 + $0xa8] sm:$0xff]  ;;  %v2481_v12 = vld [vmem:[#allocation5 + $0x98] sm:$0xff] }
 0x739   :  { %6955 = vtanh.f32 %v8285_v38 }
 0x743   :  { %v6956_v33 = vpop.eup %6955 }
 0x744   :  { %v1911_v16 = vmul.f32 %v6956_v33, %v6954_v32  ;;  %v2192_v32 = vld [vmem:[#allocation3 + $0xd0] sm:$0xff] }
 0x745   :  { %v2196_v33 = vld [vmem:[#allocation3 + $0xf0] sm:$0xff] }
 0x746   :  { %1912 = vst [vmem:[#allocation2 + $0x8] sm:$0xc] %v1911_v16  ;;  %v1978_v10 = vrot.slane %v1911_v16, 2  ;;  %v6394_v16 = vpack.c.bf16 %v2196_v33, %v2192_v32 }
 0x748   :  { %2045 = vmatmul.mubr.f32.vlgmr.msra.gmra.mrb[16].mxu0 %v1978_v10  ;;  %2116 = vmatmul.mubr.f32.vlgmr.msra.gmra.mrb[16].mxu1 %v1978_v10  ;;  %v2199_v10 = vld [vmem:[#allocation3 + $0x108] sm:$0xff] }
 0x749   :  { %2297 = vmatprep.mubr.f32.mxu0 %v7506_v0  ;;  %2368 = vmatprep.mubr.f32.mxu1 %v7506_v0  ;;  %v6364_v45 = vpack.c.bf16 %v2203_v23, %v2199_v10 }
 0x74a   :  { %6351 = vmatpush1.bf16.msra.mxu0 %v6350_v61  ;;  %6383 = vmatpush1.bf16.msra.mxu1 %v6382_v50  ;;  %v2200_v61 = vld [vmem:[#allocation3 + $0x110] sm:$0xff] }
 0x74b   :  { %6353 = vmatprep.subr.bf16.mxu0 %v6352_v29  ;;  %6385 = vmatprep.subr.bf16.mxu1 %v6384_v58  ;;  %v6398_v50 = vpack.c.bf16 %v2204_v46, %v2200_v61  ;;  %v6368_v29 = vpack.c.bf16 %v2211_v11, %v2207_v48  ;;  %v2208_v58 = vld [vmem:[#allocation3 + $0x150] sm:$0xff]  ;;  %v2158_v48 = vrot.slane %v8285_v38, 6 }
 0x74c   :  { %v6402_v56 = vpack.c.bf16 %v2212_v30, %v2208_v58  ;;  %v2464_v58 = vld [vmem:[#allocation5 + $0x10] sm:$0xff]  ;;  %v2471_v30 = vld [vmem:[#allocation5 + $0x48] sm:$0xff] }
 0x74e   :  { %6355 = vmatpush1.bf16.msra.mxu0 %v6354_v14  ;;  %6387 = vmatpush1.bf16.msra.mxu1 %v6386_v44  ;;  %v6370_v14 = vpack.c.bf16 %v2210_v34, %v2206_v19  ;;  %v2219_v44 = vld [vmem:[#allocation3 + $0x1a8] sm:$0xff]  ;;  %v2466_v19 = vld [vmem:[#allocation5 + $0x20] sm:$0xff] }
 0x74f   :  { %6357 = vmatprep.subr.bf16.mxu0 %v6356_v24  ;;  %6389 = vmatprep.subr.bf16.mxu1 %v6388_v8  ;;  %v6372_v5 = vpack.c.bf16 %v2219_v44, %v2215_v31  ;;  %v2221_v24 = vld [vmem:[#allocation3 + $0x1b8] sm:$0xff]  ;;  %v2216_v8 = vld [vmem:[#allocation3 + $0x190] sm:$0xff]  ;;  %v2475_v44 = vld [vmem:[#allocation5 + $0x68] sm:$0xff] }
 0x750   :  { %v6404_v63 = vpack.c.bf16 %v2221_v24, %v2217_v6 }
 0x752   :  { %6359 = vmatpush1.bf16.msra.mxu0 %v6358_v59  ;;  %6391 = vmatpush1.bf16.msra.mxu1 %v6390_v35  ;;  %v2220_v59 = vld [vmem:[#allocation3 + $0x1b0] sm:$0xff]  ;;  %v2463_v35 = vld [vmem:[#allocation5 + $0x8] sm:$0xff] }
 0x753   :  { %6361 = vmatprep.subr.bf16.mxu0 %v6360_v41  ;;  %6393 = vmatprep.subr.bf16.mxu1 %v6392_v13  ;;  %v6406_v42 = vpack.c.bf16 %v2220_v59, %v2216_v8  ;;  %v6412_v41 = vpack.c.bf16 %v2467_v49, %v2463_v35  ;;  %v6416_v59 = vpack.c.bf16 %v2475_v44, %v2471_v30  ;;  %v2476_v35 = vld [vmem:[#allocation5 + $0x70] sm:$0xff]  ;;  %v2479_v49 = vld [vmem:[#allocation5 + $0x88] sm:$0xff] }
 0x754   :  { %v2500_v30 = vld [vmem:[#allocation5 + $0x130] sm:$0xff]  ;;  %v2507_v44 = vld [vmem:[#allocation5 + $0x168] sm:$0xff] }
 0x756   :  { %6363 = vmatpush1.bf16.msra.mxu0 %v6362_v60  ;;  %6395 = vmatpush1.bf16.msra.mxu1 %v6394_v16 }
 0x757   :  { %6365 = vmatprep.subr.bf16.mxu0 %v6364_v45  ;;  %6397 = vmatprep.subr.bf16.mxu1 %v6396_v54 }
 0x75a   :  { %6367 = vmatpush1.bf16.msra.mxu0 %v6366_v43  ;;  %6399 = vmatpush1.bf16.msra.mxu1 %v6398_v50 }
 0x75b   :  { %6369 = vmatprep.subr.bf16.mxu0 %v6368_v29  ;;  %6401 = vmatprep.subr.bf16.mxu1 %v6400_v9  ;;  %v2462_v9 = vld [vmem:[#allocation5] sm:$0xff] }
 0x75c   :  { %v6414_v6 = vpack.c.bf16 %v2466_v19, %v2462_v9  ;;  %v2494_v9 = vld [vmem:[#allocation5 + $0x100] sm:$0xff] }
 0x75d   :  { %v2498_v19 = vld [vmem:[#allocation5 + $0x120] sm:$0xff] }
 0x75e   :  { %6371 = vmatpush1.bf16.msra.mxu0 %v6370_v14  ;;  %6403 = vmatpush1.bf16.msra.mxu1 %v6402_v56  ;;  %v2468_v14 = vld [vmem:[#allocation5 + $0x30] sm:$0xff]  ;;  %v2473_v56 = vld [vmem:[#allocation5 + $0x58] sm:$0xff] }
 0x75f   :  { %6373 = vmatprep.subr.bf16.mxu0 %v6372_v5  ;;  %6405 = vmatprep.subr.bf16.mxu1 %v6404_v63  ;;  %v2477_v5 = vld [vmem:[#allocation5 + $0x78] sm:$0xff]  ;;  %v6446_v24 = vpack.c.bf16 %v2468_v14, %v2464_v58  ;;  %v2474_v63 = vld [vmem:[#allocation5 + $0x60] sm:$0xff]  ;;  %v2496_v14 = vld [vmem:[#allocation5 + $0x110] sm:$0xff] }
 0x762   :  { %6375 = vmatpush1.bf16.msra.mxu0 %v6374_v37  ;;  %6407 = vmatpush1.bf16.msra.mxu1 %v6406_v42  ;;  %v6448_v37 = vpack.c.bf16 %v2477_v5, %v2473_v56  ;;  %v2472_v42 = vld [vmem:[#allocation5 + $0x50] sm:$0xff]  ;;  %v2505_v56 = vld [vmem:[#allocation5 + $0x158] sm:$0xff] }
 0x763   :  { %6377 = vmatprep.subr.bf16.mxu0 %v8180_v53  ;;  %6409 = vmatprep.subr.bf16.mxu1 %v8182_v51  ;;  %v2509_v5 = vld [vmem:[#allocation5 + $0x178] sm:$0xff] }
 0x766   :  { %6379 = vmatpush1.bf16.msra.mxu0 %v8184_v3  ;;  %6411 = vmatpush1.bf16.msra.mxu1 %v8187_v21 }
 0x767   :  { %6413 = vmatprep.subr.bf16.mxu0 %v6412_v41  ;;  %6445 = vmatprep.subr.bf16.mxu1 %v6444_v47  ;;  %v2485_v41 = vld [vmem:[#allocation5 + $0xb8] sm:$0xff]  ;;  %v2438_v47 = vmul.f32 0.0078125, %v2435_v55  ;;  %v6464_v55 = vpack.c.bf16 %v2509_v5, %v2505_v56 }
 0x81b   :  { %v2046_v15 = vpop.f32.mrb[16].mxu0  ;;  %v2117_v39 = vpop.f32.mrb[16].mxu1 }
 0x81c   :  { %v2126_v13 = vrot.slane %v2046_v15, 4  ;;  %v2048_v60 = vpop.f32.mrb[17].mxu0  ;;  %v2119_v32 = vpop.f32.mrb[17].mxu1  ;;  %v2128_v21 = vrot.slane %v2117_v39, 4  ;;  %v6418_v15 = vpack.c.bf16 %v2474_v63, %v2470_v40  ;;  %v6450_v39 = vpack.c.bf16 %v2476_v35, %v2472_v42  ;;  %v2506_v40 = vld [vmem:[#allocation5 + $0x160] sm:$0xff]  ;;  %v2515_v42 = vld [vmem:[#allocation5 + $0x1a8] sm:$0xff] }
 0x81d   :  { %v2127_v33 = vrot.slane %v2048_v60, 4  ;;  %v2129_v51 = vrot.slane %v2119_v32, 4  ;;  %v2482_v60 = vld [vmem:[#allocation5 + $0xa0] sm:$0xff]  ;;  %v6420_v32 = vpack.c.bf16 %v2483_v57, %v2479_v49  ;;  %v2513_v35 = vld [vmem:[#allocation5 + $0x198] sm:$0xff] }
 0x81e   :  { %v2134_v16 = vadd.f32 %v2126_v13, %v7989_v17  ;;  %v2136_v45 = vadd.f32 %v2128_v21, %v7991_v20  ;;  %v2478_v13 = vld [vmem:[#allocation5 + $0x80] sm:$0xff]  ;;  %v2440_v21 = vadd.f32 1e-05, %v2438_v47  ;;  %v2517_v49 = vld [vmem:[#allocation5 + $0x1b8] sm:$0xff] }
 0x81f   :  { %v2135_v53 = vadd.f32 %v2127_v33, %v7993_v26  ;;  %v2137_v3 = vadd.f32 %v2129_v51, %v7995_v27  ;;  %v6452_v33 = vpack.c.bf16 %v2485_v41, %v2481_v12  ;;  %v2489_v51 = vld [vmem:[#allocation5 + $0xd8] sm:$0xff]  ;;  %v2510_v41 = vld [vmem:[#allocation5 + $0x180] sm:$0xff] }
 0x820   :  { %v5735_v10 = vmul.f32 -1.442695, %v2134_v16  ;;  %v2480_v16 = vld [vmem:[#allocation5 + $0x90] sm:$0xff]  ;;  %v2514_v47 = vld [vmem:[#allocation5 + $0x1a0] sm:$0xff] }
 0x821   :  { %v5736_v23 = vmul.f32 -1.442695, %v2135_v53  ;;  %v5737_v36 = vmul.f32 -1.442695, %v2137_v3  ;;  %v2484_v53 = vld [vmem:[#allocation5 + $0xb0] sm:$0xff]  ;;  %v2493_v3 = vld [vmem:[#allocation5 + $0xf8] sm:$0xff] }
 0x822   :  { %6957 = vpow2.f32 %v5735_v10  ;;  %v2487_v10 = vld [vmem:[#allocation5 + $0xc8] sm:$0xff] }
 0x823   :  { %6959 = vpow2.f32 %v5736_v23  ;;  %v2491_v23 = vld [vmem:[#allocation5 + $0xe8] sm:$0xff] }
 0x824   :  { %6961 = vpow2.f32 %v5737_v36  ;;  %v6422_v36 = vpack.c.bf16 %v2482_v60, %v2478_v13  ;;  %v2512_v13 = vld [vmem:[#allocation5 + $0x190] sm:$0xff] }
 0x825   :  { %6963 = vtanh.f32 %v2136_v45  ;;  %v6454_v45 = vpack.c.bf16 %v2484_v53, %v2480_v16  ;;  %v2516_v60 = vld [vmem:[#allocation5 + $0x1b0] sm:$0xff]  ;;  %v2523_v16 = vld [vmem:[#allocation5 + $0x1e8] sm:$0xff]  ;;  %v2521_v53 = vld [vmem:[#allocation5 + $0x1d8] sm:$0xff] }
 0x82c   :  { %v6958_v22 = vpop.eup %6957 }
 0x82d   :  { %v6960_v62 = vpop.eup %6959  ;;  %v2141_v18 = vadd.f32 1.0, %v6958_v22  ;;  %v2486_v22 = vld [vmem:[#allocation5 + $0xc0] sm:$0xff] }
 0x82e   :  { %v2147_v54 = vadd.f32 1.0, %v6960_v62  ;;  %v6962_v43 = vpop.eup %6961  ;;  %v2490_v62 = vld [vmem:[#allocation5 + $0xe0] sm:$0xff] }
 0x82f   :  { %6965 = vrcp.f32 %v2141_v18  ;;  %v6964_v61 = vpop.eup %6963  ;;  %v2154_v25 = vadd.f32 1.0, %v6962_v43  ;;  %v6424_v18 = vpack.c.bf16 %v2491_v23, %v2487_v10  ;;  %v2488_v43 = vld [vmem:[#allocation5 + $0xd0] sm:$0xff]  ;;  %v2525_v10 = vld [vmem:[#allocation5 + $0x1f8] sm:$0xff]  ;;  %v6438_v23 = vpack.c.bf16 %v2514_v47, %v2510_v41 }
 0x830   :  { %6967 = vrcp.f32 %v2147_v54  ;;  %v6456_v54 = vpack.c.bf16 %v2493_v3, %v2489_v51  ;;  %v6470_v51 = vpack.c.bf16 %v2516_v60, %v2512_v13  ;;  %v2518_v3 = vld [vmem:[#allocation5 + $0x1c0] sm:$0xff] }
 0x831   :  { %6969 = vrcp.f32 %v2154_v25  ;;  %v6426_v25 = vpack.c.bf16 %v2490_v62, %v2486_v22  ;;  %v2520_v22 = vld [vmem:[#allocation5 + $0x1d0] sm:$0xff] }
 0x832   :  { %v2524_v62 = vld [vmem:[#allocation5 + $0x1f0] sm:$0xff] }
 0x839   :  { %v6966_v46 = vpop.eup %6965 }
 0x83a   :  { %v6968_v50 = vpop.eup %6967  ;;  %v2161_v11 = vmul.f32 %v6966_v46, %v6964_v61  ;;  %v2492_v61 = vld [vmem:[#allocation5 + $0xf0] sm:$0xff]  ;;  %v2495_v46 = vld [vmem:[#allocation5 + $0x108] sm:$0xff] }
 0x83b   :  { %v2160_v28 = vmul.f32 %v6968_v50, %v2158_v48  ;;  %v6970_v34 = vpop.eup %6969  ;;  %v2499_v48 = vld [vmem:[#allocation5 + $0x128] sm:$0xff]  ;;  %v2497_v50 = vld [vmem:[#allocation5 + $0x118] sm:$0xff] }
 0x83d   :  { %v8299_v29 = vadd.f32 %v2161_v11, %v2160_v28  ;;  %v2501_v11 = vld [vmem:[#allocation5 + $0x138] sm:$0xff]  ;;  %v6458_v28 = vpack.c.bf16 %v2492_v61, %v2488_v43  ;;  %v6474_v61 = vpack.c.bf16 %v2524_v62, %v2520_v22  ;;  %v2708_v22 = vld [vmem:[#allocation7 + $0x30] sm:$0xff]  ;;  %v2711_v62 = vld [vmem:[#allocation7 + $0x48] sm:$0xff] }
 0x83e   :  { %v6460_v58 = vpack.c.bf16 %v2501_v11, %v2497_v50 }
 0x83f   :  { %6971 = vtanh.f32 %v8299_v29 }
 0x840   :  { %6973 = vrsqrt.f32 %v2440_v21 }
 0x849   :  { %v6972_v31 = vpop.eup %6971 }
 0x84a   :  { %v2164_v38 = vmul.f32 %v6972_v31, %v6970_v34  ;;  %v6428_v34 = vpack.c.bf16 %v2499_v48, %v2495_v46  ;;  %v2503_v31 = vld [vmem:[#allocation5 + $0x148] sm:$0xff]  ;;  %v8314_v48 = vld [vmem:[%s8916_s25] ss:$0 sm:$0xff] }
 0x84b   :  { %v6432_v63 = vpack.c.bf16 %v2507_v44, %v2503_v31 }
 0x84c   :  { %2165 = vst [vmem:[#allocation2 + $0x8] sm:$0x30] %v2164_v38  ;;  %v2231_v8 = vrot.slane %v2164_v38, 4  ;;  %v6430_v38 = vpack.c.bf16 %v2498_v19, %v2494_v9 }
 0x84e   :  { %2298 = vmatmul.mubr.f32.vlgmr.msra.gmra.mrb[18].mxu0 %v2231_v8  ;;  %2369 = vmatmul.mubr.f32.vlgmr.msra.gmra.mrb[18].mxu1 %v2231_v8  ;;  %v2504_v8 = vld [vmem:[#allocation5 + $0x150] sm:$0xff] }
 0x84f   :  { %6415 = vmatpush1.bf16.msra.mxu0 %v6414_v6  ;;  %6447 = vmatpush1.bf16.msra.mxu1 %v6446_v24  ;;  %v6462_v6 = vpack.c.bf16 %v2500_v30, %v2496_v14  ;;  %v2502_v24 = vld [vmem:[#allocation5 + $0x140] sm:$0xff] }
 0x850   :  { %6417 = vmatprep.subr.bf16.mxu0 %v6416_v59  ;;  %6449 = vmatprep.subr.bf16.mxu1 %v6448_v37  ;;  %v2508_v59 = vld [vmem:[#allocation5 + $0x170] sm:$0xff]  ;;  %v2511_v37 = vld [vmem:[#allocation5 + $0x188] sm:$0xff]  ;;  %v6434_v57 = vpack.c.bf16 %v2506_v40, %v2502_v24 }
 0x851   :  { %2612 = vmatprep.mubr.f32.mxu0 %v7506_v0  ;;  %2689 = vmatprep.mubr.f32.mxu1 %v7506_v0  ;;  %v6466_v12 = vpack.c.bf16 %v2508_v59, %v2504_v8  ;;  %v2411_v8 = vrot.slane %v8299_v29, 6 }
 0x853   :  { %6419 = vmatpush1.bf16.msra.mxu0 %v6418_v15  ;;  %6451 = vmatpush1.bf16.msra.mxu1 %v6450_v39  ;;  %v6436_v15 = vpack.c.bf16 %v2515_v42, %v2511_v37  ;;  %v6468_v39 = vpack.c.bf16 %v2517_v49, %v2513_v35 }
 0x854   :  { %6421 = vmatprep.subr.bf16.mxu0 %v6420_v32  ;;  %6453 = vmatprep.subr.bf16.mxu1 %v6452_v33  ;;  %v2519_v32 = vld [vmem:[#allocation5 + $0x1c8] sm:$0xff]  ;;  %v6974_v33 = vpop.eup %6973 }
 0x855   :  { %v6440_v21 = vpack.c.bf16 %v2523_v16, %v2519_v32  ;;  %v2707_v16 = vld [vmem:[#allocation7 + $0x28] sm:$0xff] }
 0x857   :  { %6423 = vmatpush1.bf16.msra.mxu0 %v6422_v36  ;;  %6455 = vmatpush1.bf16.msra.mxu1 %v6454_v45  ;;  %v6472_v36 = vpack.c.bf16 %v2525_v10, %v2521_v53  ;;  %v2522_v45 = vld [vmem:[#allocation5 + $0x1e0] sm:$0xff]  ;;  %v2705_v53 = vld [vmem:[#allocation7 + $0x18] sm:$0xff] }
 0x858   :  { %6425 = vmatprep.subr.bf16.mxu0 %v6424_v18  ;;  %6457 = vmatprep.subr.bf16.mxu1 %v6456_v54  ;;  %v2444_v18 = vmul.f32 %v6974_v33, %v8236_v52  ;;  %v8308_v54 = vld [vmem:[%s8915_s24] ss:$0 sm:$0xff]  ;;  %v6442_v43 = vpack.c.bf16 %v2522_v45, %v2518_v3  ;;  %v2703_v33 = vld [vmem:[#allocation7 + $0x8] sm:$0xff]  ;;  %v2706_v3 = vld [vmem:[#allocation7 + $0x20] sm:$0xff] }
 0x859   :  { %v8336_v10 = vpack.c.bf16 %v2707_v16, %v2703_v33  ;;  %v2704_v45 = vld [vmem:[#allocation7 + $0x10] sm:$0xff] }
 0x85a   :  { %v2452_v46 = vmul.f32 %v8308_v54, %v2444_v18  ;;  %v8343_v18 = vpack.c.bf16 %v2708_v22, %v2704_v45 }
 0x85b   :  { %6427 = vmatpush1.bf16.msra.mxu0 %v6426_v25  ;;  %6459 = vmatpush1.bf16.msra.mxu1 %v6458_v28 }
 0x85c   :  { %6429 = vmatprep.subr.bf16.mxu0 %v6428_v34  ;;  %6461 = vmatprep.subr.bf16.mxu1 %v6460_v58  ;;  %v2460_v52 = vadd.f32 %v8314_v48, %v2452_v46  ;;  %v2717_v46 = vld [vmem:[#allocation7 + $0x78] sm:$0xff] }
 0x85f   :  { %6431 = vmatpush1.bf16.msra.mxu0 %v6430_v38  ;;  %6463 = vmatpush1.bf16.msra.mxu1 %v6462_v6 }
 0x860   :  { %6433 = vmatprep.subr.bf16.mxu0 %v6432_v63  ;;  %6465 = vmatprep.subr.bf16.mxu1 %v6464_v55 }
 0x863   :  { %6435 = vmatpush1.bf16.msra.mxu0 %v6434_v57  ;;  %6467 = vmatpush1.bf16.msra.mxu1 %v6466_v12 }
 0x864   :  { %6437 = vmatprep.subr.bf16.mxu0 %v6436_v15  ;;  %6469 = vmatprep.subr.bf16.mxu1 %v6468_v39 }
 0x867   :  { %6439 = vmatpush1.bf16.msra.mxu0 %v6438_v23  ;;  %6471 = vmatpush1.bf16.msra.mxu1 %v6470_v51  ;;  %v2709_v23 = vld [vmem:[#allocation7 + $0x38] sm:$0xff]  ;;  %v2702_v51 = vld [vmem:[#allocation7] sm:$0xff] }
 0x868   :  { %6441 = vmatprep.subr.bf16.mxu0 %v6440_v21  ;;  %6473 = vmatprep.subr.bf16.mxu1 %v6472_v36  ;;  %v8338_v21 = vpack.c.bf16 %v2709_v23, %v2705_v53  ;;  %v8340_v36 = vpack.c.bf16 %v2706_v3, %v2702_v51 }
 0x86b   :  { %6443 = vmatpush1.bf16.msra.mxu0 %v6442_v43  ;;  %6475 = vmatpush1.bf16.msra.mxu1 %v6474_v61  ;;  %v2715_v43 = vld [vmem:[#allocation7 + $0x68] sm:$0xff]  ;;  %v2713_v61 = vld [vmem:[#allocation7 + $0x58] sm:$0xff] }
 0x86c   :  { %6477 = vmatprep.subr.bf16.mxu0 %v8336_v10  ;;  %6493 = vmatprep.subr.bf16.mxu1 %v8338_v21 }
 0x86e   :  { %2613 = vmatmul.mubr.f32.vlgmr.msra.gmra.mrb[20].mxu0 %v2460_v52  ;;  %2690 = vmatmul.mubr.f32.vlgmr.msra.gmra.mrb[20].mxu1 %v2460_v52  ;;  %v8347_v52 = vpack.c.bf16 %v2715_v43, %v2711_v62 }
 0x86f   :  { %2618 = vmatprep.mubr.f32.mxu0 %v7506_v0  ;;  %2695 = vmatprep.mubr.f32.mxu1 %v7506_v0 }
 0x870   :  { %6479 = vmatpush1.bf16.msra.mxu0 %v8340_v36  ;;  %6495 = vmatpush1.bf16.msra.mxu1 %v8343_v18 }
 0x871   :  { %6481 = vmatprep.subr.bf16.mxu0 %v8347_v52 }
 0x921   :  { %v2299_v50 = vpop.f32.mrb[18].mxu0  ;;  %v2370_v11 = vpop.f32.mrb[18].mxu1 }
 0x922   :  { %v2379_v25 = vrot.slane %v2299_v50, 2  ;;  %v2301_v28 = vpop.f32.mrb[19].mxu0  ;;  %v2372_v9 = vpop.f32.mrb[19].mxu1  ;;  %v2381_v56 = vrot.slane %v2370_v11, 2  ;;  %v8349_v50 = vpack.c.bf16 %v2717_v46, %v2713_v61  ;;  %v2710_v11 = vld [vmem:[#allocation7 + $0x40] sm:$0xff] }
 0x923   :  { %v2380_v19 = vrot.slane %v2301_v28, 2  ;;  %v2382_v31 = vrot.slane %v2372_v9, 2  ;;  %v2712_v28 = vld [vmem:[#allocation7 + $0x50] sm:$0xff] }
 0x924   :  { %v2387_v34 = vadd.f32 %v2379_v25, %v7989_v17  ;;  %v2389_v38 = vadd.f32 %v2381_v56, %v7991_v20  ;;  %v2714_v25 = vld [vmem:[#allocation7 + $0x60] sm:$0xff]  ;;  %6497 = vmatprep.subr.bf16.mxu1 %v8349_v50 }
 0x925   :  { %v2388_v58 = vadd.f32 %v2380_v19, %v7993_v26  ;;  %v2390_v44 = vadd.f32 %v2382_v31, %v7995_v27  ;;  %v8352_v9 = vpack.c.bf16 %v2714_v25, %v2710_v11  ;;  %v2716_v19 = vld [vmem:[#allocation7 + $0x70] sm:$0xff]  ;;  %v2721_v31 = vld [vmem:[#allocation7 + $0x98] sm:$0xff]  ;;  %v2718_v56 = vld [vmem:[#allocation7 + $0x80] sm:$0xff] }
 0x926   :  { %v5738_v14 = vmul.f32 -1.442695, %v2387_v34  ;;  %v2719_v34 = vld [vmem:[#allocation7 + $0x88] sm:$0xff] }
 0x927   :  { %v5739_v30 = vmul.f32 -1.442695, %v2388_v58  ;;  %v5740_v5 = vmul.f32 -1.442695, %v2390_v44  ;;  %v2723_v58 = vld [vmem:[#allocation7 + $0xa8] sm:$0xff]  ;;  %v2725_v44 = vld [vmem:[#allocation7 + $0xb8] sm:$0xff]  ;;  %6483 = vmatpush1.bf16.msra.mxu0 %v8352_v9 }
 0x928   :  { %6975 = vpow2.f32 %v5738_v14  ;;  %v8356_v14 = vpack.c.bf16 %v2716_v19, %v2712_v28 }
 0x929   :  { %6977 = vpow2.f32 %v5739_v30  ;;  %v8358_v30 = vpack.c.bf16 %v2723_v58, %v2719_v34 }
 0x92a   :  { %6979 = vpow2.f32 %v5740_v5  ;;  %v8360_v5 = vpack.c.bf16 %v2725_v44, %v2721_v31  ;;  %6499 = vmatpush1.bf16.msra.mxu1 %v8356_v14 }
 0x92b   :  { %6981 = vtanh.f32 %v2389_v38  ;;  %v2722_v38 = vld [vmem:[#allocation7 + $0xa0] sm:$0xff]  ;;  %6485 = vmatprep.subr.bf16.mxu0 %v8358_v30 }
 0x92c   :  { %6501 = vmatprep.subr.bf16.mxu1 %v8360_v5 }
 0x932   :  { %v6976_v6 = vpop.eup %6975 }
 0x933   :  { %v6978_v24 = vpop.eup %6977  ;;  %v2394_v40 = vadd.f32 1.0, %v6976_v6  ;;  %v2720_v6 = vld [vmem:[#allocation7 + $0x90] sm:$0xff] }
 0x934   :  { %v2400_v63 = vadd.f32 1.0, %v6978_v24  ;;  %v6980_v17 = vpop.eup %6979  ;;  %v2724_v24 = vld [vmem:[#allocation7 + $0xb0] sm:$0xff] }
 0x935   :  { %6983 = vrcp.f32 %v2394_v40  ;;  %v6982_v26 = vpop.eup %6981  ;;  %v2407_v27 = vadd.f32 1.0, %v6980_v17  ;;  %v8363_v40 = vpack.c.bf16 %v2722_v38, %v2718_v56  ;;  %v2727_v17 = vld [vmem:[#allocation7 + $0xc8] sm:$0xff] }
 0x936   :  { %6985 = vrcp.f32 %v2400_v63  ;;  %v8367_v63 = vpack.c.bf16 %v2724_v24, %v2720_v6 }
 0x937   :  { %6987 = vrcp.f32 %v2407_v27  ;;  %6487 = vmatpush1.bf16.msra.mxu0 %v8363_v40  ;;  %v2730_v27 = vld [vmem:[#allocation7 + $0xe0] sm:$0xff] }
 0x938   :  { %6503 = vmatpush1.bf16.msra.mxu1 %v8367_v63 }
 0x93f   :  { %v6984_v55 = vpop.eup %6983 }
 0x940   :  { %v6986_v59 = vpop.eup %6985  ;;  %v2414_v37 = vmul.f32 %v6984_v55, %v6982_v26  ;;  %v2731_v26 = vld [vmem:[#allocation7 + $0xe8] sm:$0xff]  ;;  %v2729_v55 = vld [vmem:[#allocation7 + $0xd8] sm:$0xff] }
 0x941   :  { %v2413_v42 = vmul.f32 %v6986_v59, %v2411_v8  ;;  %v8324_v35 = vpop.f32.mrb[20].mxu0  ;;  %v8326_v20 = vpop.f32.mrb[20].mxu1  ;;  %v8372_v8 = vpack.c.bf16 %v2731_v26, %v2727_v17  ;;  %v2733_v59 = vld [vmem:[#allocation7 + $0xf8] sm:$0xff] }
 0x942   :  { %v8328_v49 = vpop.f32.mrb[21].mxu0  ;;  %v8330_v57 = vpop.f32.mrb[21].mxu1 }
 0x943   :  { %v2415_v12 = vadd.f32 %v2414_v37, %v2413_v42  ;;  %v6988_v41 = vpop.eup %6987  ;;  %v2726_v37 = vld [vmem:[#allocation7 + $0xc0] sm:$0xff]  ;;  %v8374_v42 = vpack.c.bf16 %v2733_v59, %v2729_v55  ;;  %6489 = vmatprep.subr.bf16.mxu0 %v8372_v8 }
 0x945   :  { %6989 = vtanh.f32 %v2415_v12  ;;  %v8376_v12 = vpack.c.bf16 %v2730_v27, %v2726_v37  ;;  %6505 = vmatprep.subr.bf16.mxu1 %v8374_v42 }
 0x947   :  { %6491 = vmatpush1.bf16.msra.mxu0 %v8376_v12 }
 0x948   :  { %6509 = vmatprep.subr.bf16.mxu0 %v8336_v10 }
 0x94f   :  { %v6990_v47 = vpop.eup %6989 }
 0x950   :  { %v2417_v15 = vmul.f32 %v6990_v47, %v6988_v41  ;;  %v2728_v41 = vld [vmem:[#allocation7 + $0xd0] sm:$0xff] }
 0x951   :  { %v2732_v47 = vld [vmem:[#allocation7 + $0xf0] sm:$0xff] }
 0x952   :  { %2418 = vst [vmem:[#allocation2 + $0x8] sm:$0xc0] %v2417_v15  ;;  %v8379_v15 = vpack.c.bf16 %v2732_v47, %v2728_v41 }
 0x954   :  { %6507 = vmatpush1.bf16.msra.mxu1 %v8379_v15 }
 0x955   :  { %6525 = vmatprep.subr.bf16.mxu1 %v8338_v21 }
 0x959   :  { %v2420_v29 = vld [vmem:[#allocation2 + $0x8] sm:$0xff] }
 0x95a   :  { %2425 = vadd.xlane.f32.xlu0 %v2420_v29 }
 0x9e7   :  { %v2426_v39 = vpop.xlane.xlu0 %2425 }
 0x9e8   :  { %v2429_v13 = vmul.f32 0.0078125, %v2426_v39 }
 0x9ea   :  { %v8332_v60 = vsub.f32 %v2420_v29, %v2429_v13 }
 0x9ec   :  { %v2433_v32 = vmul.f32 %v8332_v60, %v8332_v60 }
 0x9ee   :  { %2436 = vadd.xlane.f32.xlu1 %v2433_v32 }
 0xa7b   :  { %v2437_v29 = vpop.xlane.xlu1 %2436 }
 0xa7c   :  { %v2439_v39 = vmul.f32 0.0078125, %v2437_v29 }
 0xa7e   :  { %v2441_v13 = vadd.f32 1e-05, %v2439_v39 }
 0xa80   :  { %6991 = vrsqrt.f32 %v2441_v13 }
 0xa8a   :  { %v6992_v32 = vpop.eup %6991 }
 0xa8b   :  { %v2445_v33 = vmul.f32 %v6992_v32, %v8332_v60 }
 0xa8d   :  { %v2453_v16 = vmul.f32 %v8308_v54, %v2445_v33  ;;  %v2526_v54 = vld [vmem:[%s8881_s8] sm:$0xf] }
 0xa8e   :  { %v8418_v60 = vrot.slane %v2526_v54, %v7981_v4  ;;  %v8438_v28 = vrot.slane %v2526_v54, %v7983_v7 }
 0xa8f   :  { %v2461_v53 = vadd.f32 %v8314_v48, %v2453_v16  ;;  %v8415_v48 = vrot.slane %v2526_v54, %v7974_v1 }
 0xa90   :  { %v8434_v62 = vadd.f32 %v8328_v49, %v8418_v60  ;;  %v8446_v49 = vrot.slane %v2526_v54, %v7976_v2 }
 0xa91   :  { %2619 = vmatmul.mubr.f32.gmra.mrb[22].mxu0 %v2461_v53  ;;  %2696 = vmatmul.mubr.f32.gmra.mrb[22].mxu1 %v2461_v53  ;;  %v8430_v22 = vadd.f32 %v8324_v35, %v8415_v48  ;;  %v8443_v35 = vadd.f32 %v8330_v57, %v8438_v28 }
 0xa92   :  { %2802 = vmatprep.mubr.f32.mxu0 %v7506_v0  ;;  %2873 = vmatprep.mubr.f32.mxu1 %v7506_v0  ;;  %v8451_v44 = vadd.f32 %v8326_v20, %v8446_v49 }
 0xa95   :  { %2803 = vmatmul.mubr.f32.vlgmr.msra.gmra.mrb[24].mxu0 %v7506_v0  ;;  %2874 = vmatmul.mubr.f32.vlgmr.msra.gmra.mrb[24].mxu1 %v7506_v0 }
 0xa96   :  { %6511 = vmatpush1.bf16.msra.mxu0 %v8340_v36  ;;  %6527 = vmatpush1.bf16.msra.mxu1 %v8343_v18 }
 0xa97   :  { %6513 = vmatprep.subr.bf16.mxu0 %v8347_v52  ;;  %6529 = vmatprep.subr.bf16.mxu1 %v8349_v50 }
 0xa98   :  { %2975 = vmatprep.mubr.f32.mxu0 %v7506_v0  ;;  %3046 = vmatprep.mubr.f32.mxu1 %v7506_v0 }
 0xa9a   :  { %6515 = vmatpush1.bf16.msra.mxu0 %v8352_v9  ;;  %6531 = vmatpush1.bf16.msra.mxu1 %v8356_v14 }
 0xa9b   :  { %6517 = vmatprep.subr.bf16.mxu0 %v8358_v30  ;;  %6533 = vmatprep.subr.bf16.mxu1 %v8360_v5 }
 0xa9e   :  { %6519 = vmatpush1.bf16.msra.mxu0 %v8363_v40  ;;  %6535 = vmatpush1.bf16.msra.mxu1 %v8367_v63 }
 0xa9f   :  { %6521 = vmatprep.subr.bf16.mxu0 %v8372_v8  ;;  %6537 = vmatprep.subr.bf16.mxu1 %v8374_v42 }
 0xaa2   :  { %6523 = vmatpush1.bf16.msra.mxu0 %v8376_v12  ;;  %6539 = vmatpush1.bf16.msra.mxu1 %v8379_v15 }
 0xaa3   :  { %6541 = vmatprep.subr.bf16.mxu0 %v8336_v10  ;;  %6557 = vmatprep.subr.bf16.mxu1 %v8338_v21 }
 0xb64   :  { %v8420_v23 = vpop.f32.mrb[22].mxu0  ;;  %v8422_v51 = vpop.f32.mrb[22].mxu1 }
 0xb65   :  { %v8424_v3 = vpop.f32.mrb[23].mxu0  ;;  %v8426_v45 = vpop.f32.mrb[23].mxu1 }
 0xb68   :  { %v2804_v43 = vpop.f32.mrb[24].mxu0  ;;  %v2875_v61 = vpop.f32.mrb[24].mxu1 }
 0xb69   :  { %v2880_v46 = vadd.f32 %v2804_v43, %v8430_v22  ;;  %v2806_v11 = vpop.f32.mrb[25].mxu0  ;;  %v2877_v25 = vpop.f32.mrb[25].mxu1  ;;  %v2882_v38 = vadd.f32 %v2875_v61, %v8451_v44 }
 0xb6a   :  { %v2881_v19 = vadd.f32 %v2806_v11, %v8434_v62  ;;  %v2883_v31 = vadd.f32 %v2877_v25, %v8443_v35 }
 0xb6b   :  { %v5743_v34 = vmul.f32 -1.442695, %v2880_v46 }
 0xb6c   :  { %v5744_v58 = vmul.f32 -1.442695, %v2881_v19  ;;  %v5745_v56 = vmul.f32 -1.442695, %v2883_v31 }
 0xb6d   :  { %6993 = vpow2.f32 %v5743_v34 }
 0xb6e   :  { %6995 = vpow2.f32 %v5744_v58 }
 0xb6f   :  { %6997 = vpow2.f32 %v5745_v56 }
 0xb70   :  { %6999 = vtanh.f32 %v2882_v38 }
 0xb77   :  { %v6994_v6 = vpop.eup %6993 }
 0xb78   :  { %v6996_v24 = vpop.eup %6995  ;;  %v2887_v17 = vadd.f32 1.0, %v6994_v6 }
 0xb79   :  { %v2893_v57 = vadd.f32 1.0, %v6996_v24  ;;  %v6998_v26 = vpop.eup %6997 }
 0xb7a   :  { %7001 = vrcp.f32 %v2887_v17  ;;  %v7000_v55 = vpop.eup %6999  ;;  %v2900_v41 = vadd.f32 1.0, %v6998_v26 }
 0xb7b   :  { %7003 = vrcp.f32 %v2893_v57 }
 0xb7c   :  { %7005 = vrcp.f32 %v2900_v41 }
 0xb84   :  { %v7002_v59 = vpop.eup %7001 }
 0xb85   :  { %v7004_v37 = vpop.eup %7003  ;;  %v2904_v27 = vmul.f32 %v7002_v59, %v7000_v55 }
 0xb86   :  { %v2903_v47 = vmul.f32 0.0, %v7004_v37  ;;  %v7006_v29 = vpop.eup %7005 }
 0xb88   :  { %v2905_v20 = vadd.f32 %v2904_v27, %v2903_v47 }
 0xb8a   :  { %7007 = vtanh.f32 %v2905_v20  ;;  %v3089_v59 = vrot.slane %v2905_v20, 6 }
 0xb94   :  { %v7008_v39 = vpop.eup %7007 }
 0xb95   :  { %v2907_v13 = vmul.f32 %v7008_v39, %v7006_v29 }
 0xb97   :  { %5746 = vmatmul.mubr.msk.f32.vlgmr.msra.gmra.mrb[26].mxu0 %vm2734_vm2, %v2907_v13  ;;  %5747 = vmatmul.mubr.msk.f32.vlgmr.msra.gmra.mrb[26].mxu1 %vm2734_vm2, %v2907_v13 }
 0xb98   :  { %6543 = vmatpush1.bf16.msra.mxu0 %v8340_v36  ;;  %6559 = vmatpush1.bf16.msra.mxu1 %v8343_v18 }
 0xb99   :  { %6545 = vmatprep.subr.bf16.mxu0 %v8347_v52  ;;  %6561 = vmatprep.subr.bf16.mxu1 %v8349_v50 }
 0xb9a   :  { %3164 = vmatprep.mubr.f32.mxu0 %v7506_v0  ;;  %3235 = vmatprep.mubr.f32.mxu1 %v7506_v0 }
 0xb9c   :  { %6547 = vmatpush1.bf16.msra.mxu0 %v8352_v9  ;;  %6563 = vmatpush1.bf16.msra.mxu1 %v8356_v14 }
 0xb9d   :  { %6549 = vmatprep.subr.bf16.mxu0 %v8358_v30  ;;  %6565 = vmatprep.subr.bf16.mxu1 %v8360_v5 }
 0xba0   :  { %6551 = vmatpush1.bf16.msra.mxu0 %v8363_v40  ;;  %6567 = vmatpush1.bf16.msra.mxu1 %v8367_v63 }
 0xba1   :  { %6553 = vmatprep.subr.bf16.mxu0 %v8372_v8  ;;  %6569 = vmatprep.subr.bf16.mxu1 %v8374_v42 }
 0xba4   :  { %6555 = vmatpush1.bf16.msra.mxu0 %v8376_v12  ;;  %6571 = vmatpush1.bf16.msra.mxu1 %v8379_v15 }
 0xba5   :  { %6573 = vmatprep.subr.bf16.mxu0 %v8336_v10  ;;  %6589 = vmatprep.subr.bf16.mxu1 %v8338_v21 }
 0xc6a   :  { %v2977_v32 = vpop.f32.mrb[26].mxu0  ;;  %v3048_v33 = vpop.f32.mrb[26].mxu1 }
 0xc6b   :  { %v3057_v16 = vrot.slane %v2977_v32, 6  ;;  %v2979_v53 = vpop.f32.mrb[27].mxu0  ;;  %v3050_v54 = vpop.f32.mrb[27].mxu1  ;;  %v3059_v58 = vrot.slane %v3048_v33, 6 }
 0xc6c   :  { %v3058_v43 = vrot.slane %v2979_v53, 6  ;;  %v3060_v19 = vrot.slane %v3050_v54, 6 }
 0xc6d   :  { %v3065_v61 = vadd.f32 %v3057_v16, %v8430_v22  ;;  %v3067_v56 = vadd.f32 %v3059_v58, %v8451_v44 }
 0xc6e   :  { %v3066_v46 = vadd.f32 %v3058_v43, %v8434_v62  ;;  %v3068_v34 = vadd.f32 %v3060_v19, %v8443_v35 }
 0xc6f   :  { %v5748_v11 = vmul.f32 -1.442695, %v3065_v61 }
 0xc70   :  { %v5749_v25 = vmul.f32 -1.442695, %v3066_v46  ;;  %v5750_v31 = vmul.f32 -1.442695, %v3068_v34 }
 0xc71   :  { %7009 = vpow2.f32 %v5748_v11 }
 0xc72   :  { %7011 = vpow2.f32 %v5749_v25 }
 0xc73   :  { %7013 = vpow2.f32 %v5750_v31 }
 0xc74   :  { %7015 = vtanh.f32 %v3067_v56 }
 0xc7b   :  { %v7010_v38 = vpop.eup %7009 }
 0xc7c   :  { %v7012_v6 = vpop.eup %7011  ;;  %v3072_v24 = vadd.f32 1.0, %v7010_v38 }
 0xc7d   :  { %v3078_v17 = vadd.f32 1.0, %v7012_v6  ;;  %v7014_v57 = vpop.eup %7013 }
 0xc7e   :  { %7017 = vrcp.f32 %v3072_v24  ;;  %v7016_v26 = vpop.eup %7015  ;;  %v3085_v41 = vadd.f32 1.0, %v7014_v57 }
 0xc7f   :  { %7019 = vrcp.f32 %v3078_v17 }
 0xc80   :  { %7021 = vrcp.f32 %v3085_v41 }
 0xc88   :  { %v7018_v55 = vpop.eup %7017 }
 0xc89   :  { %v7020_v37 = vpop.eup %7019  ;;  %v3092_v27 = vmul.f32 %v7018_v55, %v7016_v26 }
 0xc8a   :  { %v3091_v47 = vmul.f32 %v7020_v37, %v3089_v59  ;;  %v7022_v39 = vpop.eup %7021 }
 0xc8c   :  { %v3093_v29 = vadd.f32 %v3092_v27, %v3091_v47 }
 0xc8e   :  { %7023 = vtanh.f32 %v3093_v29  ;;  %v3278_v37 = vrot.slane %v3093_v29, 6 }
 0xc98   :  { %v7024_v13 = vpop.eup %7023 }
 0xc99   :  { %v3095_v32 = vmul.f32 %v7024_v13, %v7022_v39 }
 0xc9b   :  { %v3097_v33 = vrot.slane %v3095_v32, 2 }
 0xc9d   :  { %5751 = vmatmul.mubr.msk.f32.vlgmr.msra.gmra.mrb[28].mxu0 %vm2734_vm2, %v3097_v33  ;;  %5752 = vmatmul.mubr.msk.f32.vlgmr.msra.gmra.mrb[28].mxu1 %vm2734_vm2, %v3097_v33 }
 0xc9e   :  { %6575 = vmatpush1.bf16.msra.mxu0 %v8340_v36  ;;  %6591 = vmatpush1.bf16.msra.mxu1 %v8343_v18 }
 0xc9f   :  { %6577 = vmatprep.subr.bf16.mxu0 %v8347_v52  ;;  %6593 = vmatprep.subr.bf16.mxu1 %v8349_v50 }
 0xca0   :  { %3353 = vmatprep.mubr.f32.mxu0 %v7506_v0  ;;  %3424 = vmatprep.mubr.f32.mxu1 %v7506_v0 }
 0xca2   :  { %6579 = vmatpush1.bf16.msra.mxu0 %v8352_v9  ;;  %6595 = vmatpush1.bf16.msra.mxu1 %v8356_v14 }
 0xca3   :  { %6581 = vmatprep.subr.bf16.mxu0 %v8358_v30  ;;  %6597 = vmatprep.subr.bf16.mxu1 %v8360_v5 }
 0xca6   :  { %6583 = vmatpush1.bf16.msra.mxu0 %v8363_v40  ;;  %6599 = vmatpush1.bf16.msra.mxu1 %v8367_v63 }
 0xca7   :  { %6585 = vmatprep.subr.bf16.mxu0 %v8372_v8  ;;  %6601 = vmatprep.subr.bf16.mxu1 %v8374_v42 }
 0xcaa   :  { %6587 = vmatpush1.bf16.msra.mxu0 %v8376_v12  ;;  %6603 = vmatpush1.bf16.msra.mxu1 %v8379_v15 }
 0xcab   :  { %6605 = vmatprep.subr.bf16.mxu0 %v8336_v10  ;;  %6621 = vmatprep.subr.bf16.mxu1 %v8338_v21 }
 0xd70   :  { %v3166_v20 = vpop.f32.mrb[28].mxu0  ;;  %v3237_v16 = vpop.f32.mrb[28].mxu1 }
 0xd71   :  { %v3246_v53 = vrot.slane %v3166_v20, 4  ;;  %v3168_v54 = vpop.f32.mrb[29].mxu0  ;;  %v3239_v43 = vpop.f32.mrb[29].mxu1  ;;  %v3248_v31 = vrot.slane %v3237_v16, 4 }
 0xd72   :  { %v3247_v61 = vrot.slane %v3168_v54, 4  ;;  %v3249_v34 = vrot.slane %v3239_v43, 4 }
 0xd73   :  { %v3254_v46 = vadd.f32 %v3246_v53, %v8430_v22  ;;  %v3256_v38 = vadd.f32 %v3248_v31, %v8451_v44 }
 0xd74   :  { %v3255_v11 = vadd.f32 %v3247_v61, %v8434_v62  ;;  %v3257_v58 = vadd.f32 %v3249_v34, %v8443_v35 }
 0xd75   :  { %v5753_v25 = vmul.f32 -1.442695, %v3254_v46 }
 0xd76   :  { %v5754_v19 = vmul.f32 -1.442695, %v3255_v11  ;;  %v5755_v56 = vmul.f32 -1.442695, %v3257_v58 }
 0xd77   :  { %7025 = vpow2.f32 %v5753_v25 }
 0xd78   :  { %7027 = vpow2.f32 %v5754_v19 }
 0xd79   :  { %7029 = vpow2.f32 %v5755_v56 }
 0xd7a   :  { %7031 = vtanh.f32 %v3256_v38 }
 0xd81   :  { %v7026_v6 = vpop.eup %7025 }
 0xd82   :  { %v7028_v24 = vpop.eup %7027  ;;  %v3261_v17 = vadd.f32 1.0, %v7026_v6 }
 0xd83   :  { %v3267_v57 = vadd.f32 1.0, %v7028_v24  ;;  %v7030_v26 = vpop.eup %7029 }
 0xd84   :  { %7033 = vrcp.f32 %v3261_v17  ;;  %v7032_v55 = vpop.eup %7031  ;;  %v3274_v47 = vadd.f32 1.0, %v7030_v26 }
 0xd85   :  { %7035 = vrcp.f32 %v3267_v57 }
 0xd86   :  { %7037 = vrcp.f32 %v3274_v47 }
 0xd8e   :  { %v7034_v59 = vpop.eup %7033 }
 0xd8f   :  { %v7036_v27 = vpop.eup %7035  ;;  %v3281_v41 = vmul.f32 %v7034_v59, %v7032_v55 }
 0xd90   :  { %v3280_v39 = vmul.f32 %v7036_v27, %v3278_v37  ;;  %v7038_v32 = vpop.eup %7037 }
 0xd92   :  { %v3282_v13 = vadd.f32 %v3281_v41, %v3280_v39 }
 0xd94   :  { %7039 = vtanh.f32 %v3282_v13  ;;  %v3467_v59 = vrot.slane %v3282_v13, 6  ;;  %v8548_v13 = vadd.f32 %v8420_v23, %v8415_v48 }
 0xd9e   :  { %v7040_v33 = vpop.eup %7039 }
 0xd9f   :  { %v3284_v20 = vmul.f32 %v7040_v33, %v7038_v32 }
 0xda1   :  { %v3286_v16 = vrot.slane %v3284_v20, 4  ;;  %v8552_v20 = vadd.f32 %v8424_v3, %v8418_v60  ;;  %v8563_v60 = vadd.f32 %v8422_v51, %v8446_v49 }
 0xda3   :  { %5756 = vmatmul.mubr.msk.f32.vlgmr.msra.gmra.mrb[30].mxu0 %vm2734_vm2, %v3286_v16  ;;  %5757 = vmatmul.mubr.msk.f32.vlgmr.msra.gmra.mrb[30].mxu1 %vm2734_vm2, %v3286_v16 }
 0xda4   :  { %6607 = vmatpush1.bf16.msra.mxu0 %v8340_v36  ;;  %6623 = vmatpush1.bf16.msra.mxu1 %v8343_v18 }
 0xda5   :  { %6609 = vmatprep.subr.bf16.mxu0 %v8347_v52  ;;  %6625 = vmatprep.subr.bf16.mxu1 %v8349_v50 }
 0xda6   :  { %3542 = vmatprep.mubr.f32.mxu0 %v7506_v0  ;;  %3613 = vmatprep.mubr.f32.mxu1 %v7506_v0 }
 0xda8   :  { %6611 = vmatpush1.bf16.msra.mxu0 %v8352_v9  ;;  %6627 = vmatpush1.bf16.msra.mxu1 %v8356_v14 }
 0xda9   :  { %6613 = vmatprep.subr.bf16.mxu0 %v8358_v30  ;;  %6629 = vmatprep.subr.bf16.mxu1 %v8360_v5 }
 0xdac   :  { %6615 = vmatpush1.bf16.msra.mxu0 %v8363_v40  ;;  %6631 = vmatpush1.bf16.msra.mxu1 %v8367_v63 }
 0xdad   :  { %6617 = vmatprep.subr.bf16.mxu0 %v8372_v8  ;;  %6633 = vmatprep.subr.bf16.mxu1 %v8374_v42 }
 0xdb0   :  { %6619 = vmatpush1.bf16.msra.mxu0 %v8376_v12  ;;  %6635 = vmatpush1.bf16.msra.mxu1 %v8379_v15 }
 0xdb1   :  { %6637 = vmatprep.subr.bf16.mxu0 %v8336_v10  ;;  %6653 = vmatprep.subr.bf16.mxu1 %v8338_v21 }
 0xe76   :  { %v3355_v29 = vpop.f32.mrb[30].mxu0  ;;  %v3426_v53 = vpop.f32.mrb[30].mxu1 }
 0xe77   :  { %v3435_v54 = vrot.slane %v3355_v29, 2  ;;  %v3357_v43 = vpop.f32.mrb[31].mxu0  ;;  %v3428_v61 = vpop.f32.mrb[31].mxu1  ;;  %v3437_v56 = vrot.slane %v3426_v53, 2 }
 0xe78   :  { %v3436_v46 = vrot.slane %v3357_v43, 2  ;;  %v3438_v58 = vrot.slane %v3428_v61, 2 }
 0xe79   :  { %v3443_v11 = vadd.f32 %v3435_v54, %v8430_v22  ;;  %v3445_v6 = vadd.f32 %v3437_v56, %v8451_v44 }
 0xe7a   :  { %v3444_v25 = vadd.f32 %v3436_v46, %v8434_v62  ;;  %v3446_v31 = vadd.f32 %v3438_v58, %v8443_v35 }
 0xe7b   :  { %v5758_v19 = vmul.f32 -1.442695, %v3443_v11 }
 0xe7c   :  { %v5759_v34 = vmul.f32 -1.442695, %v3444_v25  ;;  %v5760_v38 = vmul.f32 -1.442695, %v3446_v31  ;;  %v8558_v25 = vadd.f32 %v8426_v45, %v8438_v28 }
 0xe7d   :  { %7041 = vpow2.f32 %v5758_v19 }
 0xe7e   :  { %7043 = vpow2.f32 %v5759_v34 }
 0xe7f   :  { %7045 = vpow2.f32 %v5760_v38 }
 0xe80   :  { %7047 = vtanh.f32 %v3445_v6 }
 0xe87   :  { %v7042_v24 = vpop.eup %7041 }
 0xe88   :  { %v7044_v17 = vpop.eup %7043  ;;  %v3450_v57 = vadd.f32 1.0, %v7042_v24 }
 0xe89   :  { %v3456_v26 = vadd.f32 1.0, %v7044_v17  ;;  %v7046_v22 = vpop.eup %7045 }
 0xe8a   :  { %7049 = vrcp.f32 %v3450_v57  ;;  %v7048_v62 = vpop.eup %7047  ;;  %v3463_v41 = vadd.f32 1.0, %v7046_v22 }
 0xe8b   :  { %7051 = vrcp.f32 %v3456_v26 }
 0xe8c   :  { %7053 = vrcp.f32 %v3463_v41 }
 0xe94   :  { %v7050_v55 = vpop.eup %7049 }
 0xe95   :  { %v7052_v37 = vpop.eup %7051  ;;  %v3470_v27 = vmul.f32 %v7050_v55, %v7048_v62 }
 0xe96   :  { %v3469_v35 = vmul.f32 %v7052_v37, %v3467_v59  ;;  %v7054_v44 = vpop.eup %7053 }
 0xe98   :  { %v3471_v47 = vadd.f32 %v3470_v27, %v3469_v35 }
 0xe9a   :  { %7055 = vtanh.f32 %v3471_v47  ;;  %v3644_v38 = vrot.slane %v3471_v47, 6 }
 0xea4   :  { %v7056_v39 = vpop.eup %7055 }
 0xea5   :  { %v3473_v32 = vmul.f32 %v7056_v39, %v7054_v44 }
 0xea7   :  { %v3475_v33 = vrot.slane %v3473_v32, 6 }
 0xea9   :  { %5761 = vmatmul.mubr.msk.f32.vlgmr.msra.gmra.mrb[32].mxu0 %vm2734_vm2, %v3475_v33  ;;  %5762 = vmatmul.mubr.msk.f32.vlgmr.msra.gmra.mrb[32].mxu1 %vm2734_vm2, %v3475_v33 }
 0xeaa   :  { %6639 = vmatpush1.bf16.msra.mxu0 %v8340_v36  ;;  %6655 = vmatpush1.bf16.msra.mxu1 %v8343_v18 }
 0xeab   :  { %6641 = vmatprep.subr.bf16.mxu0 %v8347_v52  ;;  %6657 = vmatprep.subr.bf16.mxu1 %v8349_v50 }
 0xeac   :  { %3718 = vmatprep.mubr.f32.mxu0 %v7506_v0  ;;  %3789 = vmatprep.mubr.f32.mxu1 %v7506_v0 }
 0xeae   :  { %6643 = vmatpush1.bf16.msra.mxu0 %v8352_v9  ;;  %6659 = vmatpush1.bf16.msra.mxu1 %v8356_v14 }
 0xeaf   :  { %6645 = vmatprep.subr.bf16.mxu0 %v8358_v30  ;;  %6661 = vmatprep.subr.bf16.mxu1 %v8360_v5 }
 0xeb2   :  { %6647 = vmatpush1.bf16.msra.mxu0 %v8363_v40  ;;  %6663 = vmatpush1.bf16.msra.mxu1 %v8367_v63 }
 0xeb3   :  { %6649 = vmatprep.subr.bf16.mxu0 %v8372_v8  ;;  %6665 = vmatprep.subr.bf16.mxu1 %v8374_v42 }
 0xeb6   :  { %6651 = vmatpush1.bf16.msra.mxu0 %v8376_v12  ;;  %6667 = vmatpush1.bf16.msra.mxu1 %v8379_v15 }
 0xeb7   :  { %6669 = vmatprep.subr.bf16.mxu0 %v8336_v10  ;;  %6685 = vmatprep.subr.bf16.mxu1 %v8338_v21 }
 0xf7c   :  { %v3544_v16 = vpop.f32.mrb[32].mxu0  ;;  %v3615_v29 = vpop.f32.mrb[32].mxu1 }
 0xf7d   :  { %v3620_v53 = vadd.f32 %v3544_v16, %v8548_v13  ;;  %v3546_v54 = vpop.f32.mrb[33].mxu0  ;;  %v3617_v43 = vpop.f32.mrb[33].mxu1  ;;  %v3622_v3 = vadd.f32 %v3615_v29, %v8563_v60 }
 0xf7e   :  { %v3621_v61 = vadd.f32 %v3546_v54, %v8552_v20  ;;  %v3623_v48 = vadd.f32 %v3617_v43, %v8558_v25 }
 0xf7f   :  { %v5763_v46 = vmul.f32 -1.442695, %v3620_v53 }
 0xf80   :  { %v5764_v11 = vmul.f32 -1.442695, %v3621_v61  ;;  %v5765_v23 = vmul.f32 -1.442695, %v3623_v48 }
 0xf81   :  { %7057 = vpow2.f32 %v5763_v46 }
 0xf82   :  { %7059 = vpow2.f32 %v5764_v11 }
 0xf83   :  { %7061 = vpow2.f32 %v5765_v23 }
 0xf84   :  { %7063 = vtanh.f32 %v3622_v3 }
 0xf8b   :  { %v7058_v19 = vpop.eup %7057 }
 0xf8c   :  { %v7060_v34 = vpop.eup %7059  ;;  %v3627_v58 = vadd.f32 1.0, %v7058_v19 }
 0xf8d   :  { %v3633_v31 = vadd.f32 1.0, %v7060_v34  ;;  %v7062_v45 = vpop.eup %7061 }
 0xf8e   :  { %7065 = vrcp.f32 %v3627_v58  ;;  %v7064_v28 = vpop.eup %7063  ;;  %v3640_v17 = vadd.f32 1.0, %v7062_v45 }
 0xf8f   :  { %7067 = vrcp.f32 %v3633_v31 }
 0xf90   :  { %7069 = vrcp.f32 %v3640_v17 }
 0xf98   :  { %v7066_v56 = vpop.eup %7065 }
 0xf99   :  { %v7068_v6 = vpop.eup %7067  ;;  %v3647_v24 = vmul.f32 %v7066_v56, %v7064_v28 }
 0xf9a   :  { %v3646_v51 = vmul.f32 %v7068_v6, %v3644_v38  ;;  %v7070_v57 = vpop.eup %7069 }
 0xf9c   :  { %v3648_v49 = vadd.f32 %v3647_v24, %v3646_v51 }
 0xf9e   :  { %7071 = vtanh.f32 %v3648_v49  ;;  %v3832_v48 = vrot.slane %v3648_v49, 6 }
 0xfa8   :  { %v7072_v26 = vpop.eup %7071 }
 0xfa9   :  { %v3650_v22 = vmul.f32 %v7072_v26, %v7070_v57 }
 0xfab   :  { %5766 = vmatmul.mubr.msk.f32.vlgmr.msra.gmra.mrb[34].mxu0 %vm2734_vm2, %v3650_v22  ;;  %5767 = vmatmul.mubr.msk.f32.vlgmr.msra.gmra.mrb[34].mxu1 %vm2734_vm2, %v3650_v22 }
 0xfac   :  { %6671 = vmatpush1.bf16.msra.mxu0 %v8340_v36  ;;  %6687 = vmatpush1.bf16.msra.mxu1 %v8343_v18 }
 0xfad   :  { %6673 = vmatprep.subr.bf16.mxu0 %v8347_v52  ;;  %6689 = vmatprep.subr.bf16.mxu1 %v8349_v50 }
 0xfae   :  { %3907 = vmatprep.mubr.f32.mxu0 %v7506_v0  ;;  %3978 = vmatprep.mubr.f32.mxu1 %v7506_v0 }
 0xfb0   :  { %6675 = vmatpush1.bf16.msra.mxu0 %v8352_v9  ;;  %6691 = vmatpush1.bf16.msra.mxu1 %v8356_v14 }
 0xfb1   :  { %6677 = vmatprep.subr.bf16.mxu0 %v8358_v30  ;;  %6693 = vmatprep.subr.bf16.mxu1 %v8360_v5 }
 0xfb4   :  { %6679 = vmatpush1.bf16.msra.mxu0 %v8363_v40  ;;  %6695 = vmatpush1.bf16.msra.mxu1 %v8367_v63 }
 0xfb5   :  { %6681 = vmatprep.subr.bf16.mxu0 %v8372_v8  ;;  %6697 = vmatprep.subr.bf16.mxu1 %v8374_v42 }
 0xfb8   :  { %6683 = vmatpush1.bf16.msra.mxu0 %v8376_v12  ;;  %6699 = vmatpush1.bf16.msra.mxu1 %v8379_v15 }
 0xfb9   :  { %6701 = vmatprep.subr.bf16.mxu0 %v8336_v10  ;;  %6717 = vmatprep.subr.bf16.mxu1 %v8338_v21 }
0x107e   :  { %v3720_v62 = vpop.f32.mrb[34].mxu0  ;;  %v3791_v55 = vpop.f32.mrb[34].mxu1 }
0x107f   :  { %v3800_v59 = vrot.slane %v3720_v62, 6  ;;  %v3722_v37 = vpop.f32.mrb[35].mxu0  ;;  %v3793_v27 = vpop.f32.mrb[35].mxu1  ;;  %v3802_v10 = vrot.slane %v3791_v55, 6 }
0x1080   :  { %v3801_v41 = vrot.slane %v3722_v37, 6  ;;  %v3803_v32 = vrot.slane %v3793_v27, 6 }
0x1081   :  { %v3808_v35 = vadd.f32 %v3800_v59, %v8548_v13  ;;  %v3810_v21 = vadd.f32 %v3802_v10, %v8563_v60 }
0x1082   :  { %v3809_v47 = vadd.f32 %v3801_v41, %v8552_v20  ;;  %v3811_v33 = vadd.f32 %v3803_v32, %v8558_v25 }
0x1083   :  { %v5768_v44 = vmul.f32 -1.442695, %v3808_v35 }
0x1084   :  { %v5769_v39 = vmul.f32 -1.442695, %v3809_v47  ;;  %v5770_v16 = vmul.f32 -1.442695, %v3811_v33 }
0x1085   :  { %7073 = vpow2.f32 %v5768_v44 }
0x1086   :  { %7075 = vpow2.f32 %v5769_v39 }
0x1087   :  { %7077 = vpow2.f32 %v5770_v16 }
0x1088   :  { %7079 = vtanh.f32 %v3810_v21 }
0x108f   :  { %v7074_v29 = vpop.eup %7073 }
0x1090   :  { %v7076_v53 = vpop.eup %7075  ;;  %v3815_v54 = vadd.f32 1.0, %v7074_v29 }
0x1091   :  { %v3821_v43 = vadd.f32 1.0, %v7076_v53  ;;  %v7078_v61 = vpop.eup %7077 }
0x1092   :  { %7081 = vrcp.f32 %v3815_v54  ;;  %v7080_v46 = vpop.eup %7079  ;;  %v3828_v19 = vadd.f32 1.0, %v7078_v61 }
0x1093   :  { %7083 = vrcp.f32 %v3821_v43 }
0x1094   :  { %7085 = vrcp.f32 %v3828_v19 }
0x109c   :  { %v7082_v11 = vpop.eup %7081 }
0x109d   :  { %v7084_v23 = vpop.eup %7083  ;;  %v3835_v3 = vmul.f32 %v7082_v11, %v7080_v46 }
0x109e   :  { %v3834_v34 = vmul.f32 %v7084_v23, %v3832_v48  ;;  %v7086_v31 = vpop.eup %7085 }
0x10a0   :  { %v3836_v58 = vadd.f32 %v3835_v3, %v3834_v34 }
0x10a2   :  { %7087 = vtanh.f32 %v3836_v58  ;;  %v4021_v22 = vrot.slane %v3836_v58, 6 }
0x10ac   :  { %v7088_v45 = vpop.eup %7087 }
0x10ad   :  { %v3838_v28 = vmul.f32 %v7088_v45, %v7086_v31 }
0x10af   :  { %v3840_v56 = vrot.slane %v3838_v28, 2 }
0x10b1   :  { %5771 = vmatmul.mubr.msk.f32.vlgmr.msra.gmra.mrb[36].mxu0 %vm2734_vm2, %v3840_v56  ;;  %5772 = vmatmul.mubr.msk.f32.vlgmr.msra.gmra.mrb[36].mxu1 %vm2734_vm2, %v3840_v56 }
0x10b2   :  { %6703 = vmatpush1.bf16.msra.mxu0 %v8340_v36  ;;  %6719 = vmatpush1.bf16.msra.mxu1 %v8343_v18 }
0x10b3   :  { %6705 = vmatprep.subr.bf16.mxu0 %v8347_v52  ;;  %6721 = vmatprep.subr.bf16.mxu1 %v8349_v50 }
0x10b4   :  { %4096 = vmatprep.mubr.f32.mxu0 %v7506_v0  ;;  %4167 = vmatprep.mubr.f32.mxu1 %v7506_v0 }
0x10b6   :  { %6707 = vmatpush1.bf16.msra.mxu0 %v8352_v9  ;;  %6723 = vmatpush1.bf16.msra.mxu1 %v8356_v14 }
0x10b7   :  { %6709 = vmatprep.subr.bf16.mxu0 %v8358_v30  ;;  %6725 = vmatprep.subr.bf16.mxu1 %v8360_v5 }
0x10ba   :  { %6711 = vmatpush1.bf16.msra.mxu0 %v8363_v40  ;;  %6727 = vmatpush1.bf16.msra.mxu1 %v8367_v63 }
0x10bb   :  { %6713 = vmatprep.subr.bf16.mxu0 %v8372_v8  ;;  %6729 = vmatprep.subr.bf16.mxu1 %v8374_v42 }
0x10be   :  { %6715 = vmatpush1.bf16.msra.mxu0 %v8376_v12  ;;  %6731 = vmatpush1.bf16.msra.mxu1 %v8379_v15 }
0x1184   :  { %v3909_v36 = vpop.f32.mrb[36].mxu0  ;;  %v3980_v18 = vpop.f32.mrb[36].mxu1 }
0x1185   :  { %v3989_v52 = vrot.slane %v3909_v36, 4  ;;  %v3911_v50 = vpop.f32.mrb[37].mxu0  ;;  %v3982_v9 = vpop.f32.mrb[37].mxu1  ;;  %v3991_v42 = vrot.slane %v3980_v18, 4 }
0x1186   :  { %v3990_v14 = vrot.slane %v3911_v50, 4  ;;  %v3992_v38 = vrot.slane %v3982_v9, 4 }
0x1187   :  { %v3997_v30 = vadd.f32 %v3989_v52, %v8548_v13  ;;  %v3999_v15 = vadd.f32 %v3991_v42, %v8563_v60  ;;  %v4251_v42 = vld [vmem:[#allocation10 + $0x18] sm:$0xff] }
0x1188   :  { %v3998_v5 = vadd.f32 %v3990_v14, %v8552_v20  ;;  %v4000_v8 = vadd.f32 %v3992_v38, %v8558_v25  ;;  %v4249_v38 = vld [vmem:[#allocation10 + $0x8] sm:$0xff] }
0x1189   :  { %v5773_v40 = vmul.f32 -1.442695, %v3997_v30 }
0x118a   :  { %v5774_v63 = vmul.f32 -1.442695, %v3998_v5  ;;  %v5775_v12 = vmul.f32 -1.442695, %v4000_v8  ;;  %v4253_v8 = vld [vmem:[#allocation10 + $0x28] sm:$0xff] }
0x118b   :  { %7089 = vpow2.f32 %v5773_v40 }
0x118c   :  { %7091 = vpow2.f32 %v5774_v63 }
0x118d   :  { %7093 = vpow2.f32 %v5775_v12  ;;  %v6732_v12 = vpack.c.bf16 %v4253_v8, %v4249_v38  ;;  %v5781_v38 = vld [vmem:[%s8882_s9] ss:$0 sm:$0xff] }
0x118e   :  { %7095 = vtanh.f32 %v3999_v15  ;;  %v4255_v15 = vld [vmem:[#allocation10 + $0x38] sm:$0xff] }
0x118f   :  { %6733 = vmatprep.subr.bf16.mxu0 %v6732_v12  ;;  %v4448_v12 = vld [vmem:[%s8885_s12] sm:$0xff] }
0x1195   :  { %v7090_v6 = vpop.eup %7089 }
0x1196   :  { %v7092_v24 = vpop.eup %7091  ;;  %v4004_v17 = vadd.f32 1.0, %v7090_v6  ;;  %v4248_v6 = vld [vmem:[#allocation10] sm:$0xff] }
0x1197   :  { %v4010_v51 = vadd.f32 1.0, %v7092_v24  ;;  %v7094_v49 = vpop.eup %7093  ;;  %v4252_v24 = vld [vmem:[#allocation10 + $0x20] sm:$0xff] }
0x1198   :  { %7097 = vrcp.f32 %v4004_v17  ;;  %v7096_v57 = vpop.eup %7095  ;;  %v4017_v59 = vadd.f32 1.0, %v7094_v49  ;;  %v6748_v17 = vpack.c.bf16 %v4255_v15, %v4251_v42  ;;  %v4250_v49 = vld [vmem:[#allocation10 + $0x10] sm:$0xff]  ;;  %v5782_v42 = vld [vmem:[#allocation8] ss:$0 sm:$0xff] }
0x1199   :  { %7099 = vrcp.f32 %v4010_v51  ;;  %v6734_v51 = vpack.c.bf16 %v4252_v24, %v4248_v6  ;;  %v4452_v15 = vld [vmem:[%s8885_s12 + $0x20] sm:$0xff]  ;;  %v4450_v24 = vld [vmem:[%s8885_s12 + $0x10] sm:$0xff] }
0x119a   :  { %7101 = vrcp.f32 %v4017_v59  ;;  %6749 = vmatprep.subr.bf16.mxu1 %v6748_v17  ;;  %v4454_v17 = vld [vmem:[%s8885_s12 + $0x30] sm:$0xff] }
0x11a2   :  { %v7098_v26 = vpop.eup %7097 }
0x11a3   :  { %v7100_v62 = vpop.eup %7099  ;;  %v4024_v55 = vmul.f32 %v7098_v26, %v7096_v57  ;;  %v4254_v57 = vld [vmem:[#allocation10 + $0x30] sm:$0xff] }
0x11a4   :  { %v4023_v37 = vmul.f32 %v7100_v62, %v4021_v22  ;;  %v7102_v41 = vpop.eup %7101  ;;  %v6750_v26 = vpack.c.bf16 %v4254_v57, %v4250_v49  ;;  %v4257_v22 = vld [vmem:[#allocation10 + $0x48] sm:$0xff] }
0x11a5   :  { %v4261_v62 = vld [vmem:[#allocation10 + $0x68] sm:$0xff] }
0x11a6   :  { %v4025_v27 = vadd.f32 %v4024_v55, %v4023_v37  ;;  %v4259_v55 = vld [vmem:[#allocation10 + $0x58] sm:$0xff]  ;;  %v6736_v59 = vpack.c.bf16 %v4261_v62, %v4257_v22  ;;  %v4459_v49 = vld [vmem:[%s8885_s12 + $0x58] sm:$0xff]  ;;  %v8670_v22 = vpack.c.bf16 %v4452_v15, %v4448_v12  ;;  %v8672_v62 = vpack.c.bf16 %v4454_v17, %v4450_v24 }
0x11a7   :  { %v4263_v37 = vld [vmem:[#allocation10 + $0x78] sm:$0xff]  ;;  %v4463_v57 = vld [vmem:[%s8885_s12 + $0x78] sm:$0xff] }
0x11a8   :  { %7103 = vtanh.f32 %v4025_v27  ;;  %v4210_v45 = vrot.slane %v4025_v27, 6  ;;  %v4256_v27 = vld [vmem:[#allocation10 + $0x40] sm:$0xff] }
0x11b2   :  { %v7104_v35 = vpop.eup %7103 }
0x11b3   :  { %v4027_v47 = vmul.f32 %v7104_v35, %v7102_v41  ;;  %v4260_v41 = vld [vmem:[#allocation10 + $0x60] sm:$0xff]  ;;  %v6752_v35 = vpack.c.bf16 %v4263_v37, %v4259_v55  ;;  %v4456_v55 = vld [vmem:[%s8885_s12 + $0x40] sm:$0xff] }
0x11b5   :  { %v4029_v44 = vrot.slane %v4027_v47, 4  ;;  %v6738_v47 = vpack.c.bf16 %v4260_v41, %v4256_v27  ;;  %v8679_v27 = vpack.c.bf16 %v4463_v57, %v4459_v49  ;;  %v4460_v41 = vld [vmem:[%s8885_s12 + $0x60] sm:$0xff]  ;;  %v7507_v57 = vmov 0.0|0.0  }
0x11b7   :  { %5776 = vmatmul.mubr.msk.f32.vlgmr.msra.gmra.mrb[38].mxu0 %vm2734_vm2, %v4029_v44  ;;  %5777 = vmatmul.mubr.msk.f32.vlgmr.msra.gmra.mrb[38].mxu1 %vm2734_vm2, %v4029_v44  ;;  %v4258_v44 = vld [vmem:[#allocation10 + $0x50] sm:$0xff] }
0x11b8   :  { %4370 = vmatprep.mubr.f32.mxu0 %v7506_v0  ;;  %4441 = vmatprep.mubr.f32.mxu1 %v7506_v0 }
0x11b9   :  { %6735 = vmatpush1.bf16.msra.mxu0 %v6734_v51  ;;  %6751 = vmatpush1.bf16.msra.mxu1 %v6750_v26  ;;  %v4461_v51 = vld [vmem:[%s8885_s12 + $0x68] sm:$0xff] }
0x11ba   :  { %6737 = vmatprep.subr.bf16.mxu0 %v6736_v59  ;;  %6753 = vmatprep.subr.bf16.mxu1 %v6752_v35  ;;  %v4458_v35 = vld [vmem:[%s8885_s12 + $0x50] sm:$0xff] }
0x11bd   :  { %6739 = vmatpush1.bf16.msra.mxu0 %v6738_v47  ;;  %v4462_v47 = vld [vmem:[%s8885_s12 + $0x70] sm:$0xff] }
0x128a   :  { %v4098_v39 = vpop.f32.mrb[38].mxu0  ;;  %v4169_v32 = vpop.f32.mrb[38].mxu1 }
0x128b   :  { %v4178_v33 = vrot.slane %v4098_v39, 2  ;;  %v4100_v10 = vpop.f32.mrb[39].mxu0  ;;  %v4171_v16 = vpop.f32.mrb[39].mxu1  ;;  %v4180_v11 = vrot.slane %v4169_v32, 2  ;;  %v4262_v39 = vld [vmem:[#allocation10 + $0x70] sm:$0xff] }
0x128c   :  { %v4179_v21 = vrot.slane %v4100_v10, 2  ;;  %v4181_v61 = vrot.slane %v4171_v16, 2  ;;  %v6754_v32 = vpack.c.bf16 %v4262_v39, %v4258_v44  ;;  %v4269_v10 = vld [vmem:[#allocation10 + $0xa8] sm:$0xff]  ;;  %v4267_v16 = vld [vmem:[#allocation10 + $0x98] sm:$0xff]  ;;  %v8694_v44 = vpack.c.bf16 %v4460_v41, %v4456_v55 }
0x128d   :  { %v4186_v29 = vadd.f32 %v4178_v33, %v8548_v13  ;;  %v4188_v23 = vadd.f32 %v4180_v11, %v8563_v60  ;;  %v4265_v33 = vld [vmem:[#allocation10 + $0x88] sm:$0xff]  ;;  %v4270_v11 = vld [vmem:[#allocation10 + $0xb0] sm:$0xff]  ;;  %v8696_v39 = vpack.c.bf16 %v4462_v47, %v4458_v35 }
0x128e   :  { %v4187_v53 = vadd.f32 %v4179_v21, %v8552_v20  ;;  %v4189_v46 = vadd.f32 %v4181_v61, %v8558_v25  ;;  %6755 = vmatpush1.bf16.msra.mxu1 %v6754_v32  ;;  %v6740_v21 = vpack.c.bf16 %v4269_v10, %v4265_v33  ;;  %v4280_v32 = vld [vmem:[#allocation11] sm:$0xf]  ;;  %v4671_v55 = vld [vmem:[%s8889_s16 + $0x18] sm:$0xff] }
0x128f   :  { %v5778_v54 = vmul.f32 -1.442695, %v4186_v29  ;;  %v4271_v29 = vld [vmem:[#allocation10 + $0xb8] sm:$0xff] }
0x1290   :  { %v5779_v43 = vmul.f32 -1.442695, %v4187_v53  ;;  %v5780_v48 = vmul.f32 -1.442695, %v4189_v46  ;;  %v4264_v53 = vld [vmem:[#allocation10 + $0x80] sm:$0xff]  ;;  %v4266_v46 = vld [vmem:[#allocation10 + $0x90] sm:$0xff]  ;;  %6741 = vmatprep.subr.bf16.mxu0 %v6740_v21 }
0x1291   :  { %7105 = vpow2.f32 %v5778_v54  ;;  %v4268_v54 = vld [vmem:[#allocation10 + $0xa0] sm:$0xff] }
0x1292   :  { %7107 = vpow2.f32 %v5779_v43  ;;  %v6756_v43 = vpack.c.bf16 %v4271_v29, %v4267_v16  ;;  %v6742_v61 = vpack.c.bf16 %v4268_v54, %v4264_v53  ;;  %v4285_v29 = vrot.slane %v4280_v32, %v7974_v1 }
0x1293   :  { %7109 = vpow2.f32 %v5780_v48  ;;  %v6758_v48 = vpack.c.bf16 %v4270_v11, %v4266_v46  ;;  %v4289_v53 = vrot.slane %v4280_v32, %v7981_v4  ;;  %v4293_v4 = vrot.slane %v4280_v32, %v7976_v2 }
0x1294   :  { %7111 = vtanh.f32 %v4188_v23  ;;  %v4273_v23 = vld [vmem:[#allocation10 + $0xc8] sm:$0xff]  ;;  %6757 = vmatprep.subr.bf16.mxu1 %v6756_v43  ;;  %6743 = vmatpush1.bf16.msra.mxu0 %v6742_v61 }
0x1295   :  { %6759 = vmatpush1.bf16.msra.mxu1 %v6758_v48 }
0x129b   :  { %v7106_v3 = vpop.eup %7105 }
0x129c   :  { %v7108_v19 = vpop.eup %7107  ;;  %v4193_v34 = vadd.f32 1.0, %v7106_v3  ;;  %v4277_v3 = vld [vmem:[#allocation10 + $0xe8] sm:$0xff] }
0x129d   :  { %v4199_v58 = vadd.f32 1.0, %v7108_v19  ;;  %v7110_v13 = vpop.eup %7109  ;;  %v4275_v19 = vld [vmem:[#allocation10 + $0xd8] sm:$0xff] }
0x129e   :  { %7113 = vrcp.f32 %v4193_v34  ;;  %v7112_v20 = vpop.eup %7111  ;;  %v4206_v36 = vadd.f32 1.0, %v7110_v13  ;;  %v6744_v34 = vpack.c.bf16 %v4277_v3, %v4273_v23  ;;  %v4272_v13 = vld [vmem:[#allocation10 + $0xc0] sm:$0xff]  ;;  %v4297_v3 = vrot.slane %v4280_v32, %v7983_v7 }
0x129f   :  { %7115 = vrcp.f32 %v4199_v58  ;;  %v4279_v58 = vld [vmem:[#allocation10 + $0xf8] sm:$0xff] }
0x12a0   :  { %7117 = vrcp.f32 %v4206_v36  ;;  %v4449_v36 = vld [vmem:[%s8885_s12 + $0x8] sm:$0xff]  ;;  %6745 = vmatprep.subr.bf16.mxu0 %v6744_v34 }
0x12a8   :  { %v7114_v31 = vpop.eup %7113 }
0x12a9   :  { %v7116_v28 = vpop.eup %7115  ;;  %v4213_v56 = vmul.f32 %v7114_v31, %v7112_v20  ;;  %v4276_v20 = vld [vmem:[#allocation10 + $0xe0] sm:$0xff]  ;;  %v6760_v31 = vpack.c.bf16 %v4279_v58, %v4275_v19 }
0x12aa   :  { %v4212_v25 = vmul.f32 %v7116_v28, %v4210_v45  ;;  %v7118_v60 = vpop.eup %7117  ;;  %v6746_v45 = vpack.c.bf16 %v4276_v20, %v4272_v13  ;;  %v4274_v28 = vld [vmem:[#allocation10 + $0xd0] sm:$0xff] }
0x12ab   :  { %6761 = vmatprep.subr.bf16.mxu1 %v6760_v31 }
0x12ac   :  { %v4214_v18 = vadd.f32 %v4213_v56, %v4212_v25  ;;  %v4278_v56 = vld [vmem:[#allocation10 + $0xf0] sm:$0xff]  ;;  %6747 = vmatpush1.bf16.msra.mxu0 %v6746_v45 }
0x12ad   :  { %v6762_v25 = vpack.c.bf16 %v4278_v56, %v4274_v28 }
0x12ae   :  { %7119 = vtanh.f32 %v4214_v18  ;;  %v4453_v18 = vld [vmem:[%s8885_s12 + $0x28] sm:$0xff] }
0x12af   :  { %6763 = vmatpush1.bf16.msra.mxu1 %v6762_v25 }
0x12b8   :  { %v7120_v52 = vpop.eup %7119 }
0x12b9   :  { %v4216_v50 = vmul.f32 %v7120_v52, %v7118_v60  ;;  %v4451_v60 = vld [vmem:[%s8885_s12 + $0x18] sm:$0xff] }
0x12ba   :  { %v4455_v52 = vld [vmem:[%s8885_s12 + $0x38] sm:$0xff] }
0x12bb   :  { %v4220_v9 = vsel %vm4219_vm3, %v4216_v50, 0.0 }
0x12bc   :  { %4221 = vadd.xlane.f32.xlu0 %v4220_v9  ;;  %v8638_v9 = vpack.c.bf16 %v4455_v52, %v4451_v60 }
0x12be   :  { %6773 = vmatprep.subr.bf16.mxu1 %v8638_v9 }
0x1349   :  { %v4222_v14 = vpop.xlane.xlu0 %4221 }
0x134a   :  { %v4224_v30 = vmul.f32 0.015625, %v4222_v14 }
0x134c   :  { %v8620_v5 = vsub.f32 %v4216_v50, %v4224_v30  ;;  %v8636_v50 = vpack.c.bf16 %v4453_v18, %v4449_v36 }
0x134e   :  { %v4226_v40 = vmul.f32 %v8620_v5, %v8620_v5  ;;  %6765 = vmatprep.subr.bf16.mxu0 %v8636_v50 }
0x1350   :  { %v4227_v63 = vsel %vm4219_vm3, %v4226_v40, 0.0 }
0x1351   :  { %4228 = vadd.xlane.f32.xlu1 %v4227_v63 }
0x13de   :  { %v4229_v14 = vpop.xlane.xlu1 %4228 }
0x13df   :  { %v4230_v30 = vmul.f32 0.015625, %v4229_v14 }
0x13e1   :  { %v4231_v40 = vadd.f32 1e-05, %v4230_v30 }
0x13e3   :  { %7121 = vrsqrt.f32 %v4231_v40 }
0x13ed   :  { %v7122_v63 = vpop.eup %7121 }
0x13ee   :  { %v4233_v8 = vmul.f32 %v7122_v63, %v8620_v5  ;;  %v4457_v5 = vld [vmem:[%s8885_s12 + $0x48] sm:$0xff] }
0x13ef   :  { %v8677_v37 = vpack.c.bf16 %v4461_v51, %v4457_v5  ;;  %v4668_v5 = vld [vmem:[%s8889_s16] sm:$0xff]  ;;  %v4669_v51 = vld [vmem:[%s8889_s16 + $0x8] sm:$0xff] }
0x13f0   :  { %v4240_v6 = vmul.f32 %v5781_v38, %v4233_v8  ;;  %v8737_v49 = vpack.c.bf16 %v4669_v51, %v4668_v5 }
0x13f2   :  { %v4247_v26 = vadd.f32 %v5782_v42, %v4240_v6 }
0x13f4   :  { %v4303_v59 = vrot.slane %v4247_v26, 6  ;;  %v4670_v26 = vld [vmem:[%s8889_s16 + $0x10] sm:$0xff] }
0x13f6   :  { %5783 = vmatmul.mubr.msk.f32.vlgmr.msra.gmra.mrb[40].mxu0 %vm2734_vm2, %v4303_v59  ;;  %5784 = vmatmul.mubr.msk.f32.vlgmr.msra.gmra.mrb[40].mxu1 %vm2734_vm2, %v4303_v59  ;;  %v8749_v59 = vpack.c.bf16 %v4671_v55, %v4670_v26 }
0x13f7   :  { %6767 = vmatpush1.bf16.msra.mxu0 %v8670_v22  ;;  %6775 = vmatpush1.bf16.msra.mxu1 %v8672_v62 }
0x13f8   :  { %6769 = vmatprep.subr.bf16.mxu0 %v8677_v37  ;;  %6777 = vmatprep.subr.bf16.mxu1 %v8679_v27 }
0x13f9   :  { %4531 = vmatprep.mubr.f32.mxu0 %v7506_v0  ;;  %4602 = vmatprep.mubr.f32.mxu1 %v7506_v0 }
0x13fb   :  { %6771 = vmatpush1.bf16.msra.mxu0 %v8694_v44  ;;  %6779 = vmatpush1.bf16.msra.mxu1 %v8696_v39 }
0x13fc   :  { %6780 = vmatprep.subr.bf16.mxu0 %v7507_v57  ;;  %6786 = vmatprep.subr.bf16.mxu1 %v7507_v57 }
0x13fe   :  { %4532 = vmatmul.mubr.f32.vlgmr.msra.gmra.mrb[42].mxu0 %v7506_v0  ;;  %4603 = vmatmul.mubr.f32.vlgmr.msra.gmra.mrb[42].mxu1 %v7506_v0 }
0x13ff   :  { %6782 = vmatpush3.bf16.msra.mxu0 %v8737_v49  ;;  %5854 = vmatprep.mubr.msk.f32.mxu0 %vm7508_vm5, %v7506_v0 }
0x1400   :  { %6783 = vmatprep.subr.bf16.mxu0 %v7507_v57  ;;  %5861 = vmatprep.mubr.msk.f32.mxu1 %vm7508_vm5, %v7506_v0 }
0x1403   :  { %6785 = vmatpush3.bf16.msra.mxu0 %v8749_v59 }
0x1404   :  { %6798 = vmatprep.subr.bf16.mxu0 %v8638_v9 }
0x14c9   :  { %v4372_v33 = vpop.f32.mrb[40].mxu0  ;;  %v4443_v10 = vpop.f32.mrb[40].mxu1 }
0x14ca   :  { %v4374_v16 = vpop.f32.mrb[41].mxu0  ;;  %v4445_v21 = vpop.f32.mrb[41].mxu1  ;;  %v8708_v54 = vadd.f32 %v4372_v33, %v4285_v29  ;;  %v8719_v20 = vadd.f32 %v4443_v10, %v4293_v4  ;;  %v8757_v33 = vld [vmem:[#allocation13] ss:$0 sm:$0xff] }
0x14cb   :  { %v8710_v43 = vadd.f32 %v4374_v16, %v4289_v53  ;;  %v8715_v1 = vadd.f32 %v4445_v21, %v4297_v3  ;;  %v8759_v16 = vld [vmem:[#allocation14] ss:$0 sm:$0xff]  ;;  %v8773_v53 = vld [vmem:[#allocation16] ss:$0 sm:$0xff] }
0x14d1   :  { %v4533_v61 = vpop.f32.mrb[42].mxu0  ;;  %v4604_v46 = vpop.f32.mrb[42].mxu1 }
0x14d2   :  { %v4609_v11 = vadd.f32 %v4533_v61, %v8708_v54  ;;  %v4535_v48 = vpop.f32.mrb[43].mxu0  ;;  %v4606_v23 = vpop.f32.mrb[43].mxu1  ;;  %v4611_v45 = vadd.f32 %v4604_v46, %v8719_v20 }
0x14d3   :  { %v4610_v19 = vadd.f32 %v4535_v48, %v8710_v43  ;;  %v4612_v13 = vadd.f32 %v4606_v23, %v8715_v1 }
0x14d4   :  { %v5785_v34 = vmul.f32 -1.442695, %v4609_v11 }
0x14d5   :  { %v5786_v58 = vmul.f32 -1.442695, %v4610_v19  ;;  %v5787_v31 = vmul.f32 -1.442695, %v4612_v13 }
0x14d6   :  { %7123 = vpow2.f32 %v5785_v34 }
0x14d7   :  { %7125 = vpow2.f32 %v5786_v58 }
0x14d8   :  { %7127 = vpow2.f32 %v5787_v31 }
0x14d9   :  { %7129 = vtanh.f32 %v4611_v45  ;;  %v4784_v45 = vld [vmem:[#allocation20] sm:$0xff] }
0x14e0   :  { %v7124_v28 = vpop.eup %7123 }
0x14e1   :  { %v7126_v56 = vpop.eup %7125  ;;  %v4616_v7 = vadd.f32 1.0, %v7124_v28  ;;  %v4785_v28 = vld [vmem:[#allocation20 + $0x8] sm:$0xff] }
0x14e2   :  { %v4622_v36 = vadd.f32 1.0, %v7126_v56  ;;  %v7128_v25 = vpop.eup %7127  ;;  %v8778_v56 = vpack.c.bf16 %v4785_v28, %v4784_v45 }
0x14e3   :  { %7131 = vrcp.f32 %v4616_v7  ;;  %v7130_v18 = vpop.eup %7129  ;;  %v4629_v14 = vadd.f32 1.0, %v7128_v25 }
0x14e4   :  { %7133 = vrcp.f32 %v4622_v36  ;;  %6788 = vmatpush3.bf16.msra.mxu1 %v8778_v56 }
0x14e5   :  { %7135 = vrcp.f32 %v4629_v14  ;;  %6790 = vmatprep.subr.bf16.mxu1 %v8636_v50 }
0x14ed   :  { %v7132_v60 = vpop.eup %7131 }
0x14ee   :  { %v7134_v52 = vpop.eup %7133  ;;  %v4633_v2 = vmul.f32 %v7132_v60, %v7130_v18  ;;  %v8784_v60 = vld [vmem:[#allocation17] ss:$0 sm:$0xff] }
0x14ef   :  { %v4632_v30 = vmul.f32 0.0, %v7134_v52  ;;  %v7136_v63 = vpop.eup %7135 }
0x14f1   :  { %v8722_v40 = vadd.f32 %v4633_v2, %v4632_v30  ;;  %v8786_v2 = vld [vmem:[#allocation19] ss:$0 sm:$0xff] }
0x14f3   :  { %7137 = vtanh.f32 %v8722_v40 }
0x14fd   :  { %v7138_v38 = vpop.eup %7137 }
0x14fe   :  { %v8725_v8 = vmul.f32 %v7138_v38, %v7136_v63 }
0x1500   :  { %v4640_v42 = vsel %vm4639_vm4, %v8725_v8, 0.0 }
0x1501   :  { %4641 = vadd.xlane.f32.xlu0 %v4640_v42 }
0x158e   :  { %v4642_v12 = vpop.xlane.xlu0 %4641 }
0x158f   :  { %v4644_v15 = vmul.f32 0.03125, %v4642_v12 }
0x1591   :  { %v4645_v6 = vsub.f32 %v8725_v8, %v4644_v15 }
0x1593   :  { %v4646_v24 = vmul.f32 %v4645_v6, %v4645_v6 }
0x1595   :  { %v4647_v17 = vsel %vm4639_vm4, %v4646_v24, 0.0 }
0x1596   :  { %4648 = vadd.xlane.f32.xlu1 %v4647_v17 }
0x1623   :  { %v4649_v41 = vpop.xlane.xlu1 %4648 }
0x1624   :  { %v4650_v35 = vmul.f32 0.03125, %v4649_v41 }
0x1626   :  { %v4651_v47 = vadd.f32 1e-05, %v4650_v35 }
0x1628   :  { %7139 = vrsqrt.f32 %v4651_v47 }
0x1632   :  { %v7140_v32 = vpop.eup %7139 }
0x1633   :  { %v4653_v10 = vmul.f32 %v7140_v32, %v4645_v6 }
0x1635   :  { %v4660_v21 = vmul.f32 %v8757_v33, %v4653_v10 }
0x1637   :  { %v4667_v29 = vadd.f32 %v8759_v16, %v4660_v21 }
0x1639   :  { %5855 = vmatmul.mubr.msk.f32.vlgmr.msra.gmra.mrb[44].mxu0 %vm4464_vm6, %v4667_v29 }
0x163a   :  { %6800 = vmatpush1.bf16.msra.mxu0 %v8672_v62  ;;  %5022 = vmatprep.mubr.f32.mxu0 %v7506_v0 }
0x163b   :  { %6802 = vmatprep.subr.bf16.mxu0 %v8679_v27 }
0x163e   :  { %6804 = vmatpush1.bf16.msra.mxu0 %v8696_v39 }
0x163f   :  { %6811 = vmatprep.subr.bf16.mxu0 %v7507_v57 }
0x1641   :  { %5797 = vmatmul.mubr.msk.f32.vlgmr.msra.gmra.mrb[46].mxu0 %vm4464_vm6, %v8725_v8 }
0x1642   :  { %5879 = vmatprep.mubr.msk.f32.mxu0 %vm7508_vm5, %v7506_v0  ;;  %6813 = vmatpush3.bf16.msra.mxu0 %v8778_v56 }
0x1643   :  { %6815 = vmatprep.subr.bf16.mxu0 %v8636_v50  ;;  %v8804_v50 = vld [vmem:[#allocation22] ss:$0 sm:$0xff] }
0x170c   :  { %v4748_v61 = vpop.f32.mrb[44].mxu0 }
0x170d   :  { %v4749_v46 = vadd.f32 %v8773_v53, %v4748_v61  ;;  %v5856_v11 = vpop.f32.mrb[45].mxu0 }
0x170f   :  { %7141 = vtanh.f32 %v4749_v46 }
0x1714   :  { %v5024_v48 = vpop.f32.mrb[46].mxu0 }
0x1715   :  { %v5026_v23 = vpop.f32.mrb[47].mxu0  ;;  %v5031_v51 = vadd.f32 %v5024_v48, %v8719_v20 }
0x1719   :  { %v7142_v3 = vpop.eup %7141 }
0x171a   :  { %v4756_v19 = vsel %vm4755_vm7, %v7142_v3, 0.0 }
0x171b   :  { %4757 = vadd.xlane.f32.xlu0 %v4756_v19 }
0x17a8   :  { %v4758_v34 = vpop.xlane.xlu0 %4757 }
0x17a9   :  { %v4760_v58 = vmul.f32 0.0625, %v4758_v34 }
0x17ab   :  { %v4761_v4 = vsub.f32 %v7142_v3, %v4760_v58 }
0x17ad   :  { %v4762_v13 = vmul.f32 %v4761_v4, %v4761_v4 }
0x17af   :  { %v4763_v31 = vsel %vm4755_vm7, %v4762_v13, 0.0 }
0x17b0   :  { %4764 = vadd.xlane.f32.xlu1 %v4763_v31 }
0x183d   :  { %v4765_v7 = vpop.xlane.xlu1 %4764 }
0x183e   :  { %v4766_v36 = vmul.f32 0.0625, %v4765_v7 }
0x1840   :  { %v4767_v25 = vadd.f32 1e-05, %v4766_v36 }
0x1842   :  { %7143 = vrsqrt.f32 %v4767_v25 }
0x184c   :  { %v7144_v18 = vpop.eup %7143 }
0x184d   :  { %v4769_v52 = vmul.f32 %v7144_v18, %v4761_v4 }
0x184f   :  { %v4776_v14 = vmul.f32 %v8784_v60, %v4769_v52 }
0x1851   :  { %v4783_v30 = vadd.f32 %v8786_v2, %v4776_v14 }
0x1853   :  { %5862 = vmatmul.mubr.msk.f32.vlgmr.msra.gmra.mrb[44].mxu1 %vm4793_vm8, %v4783_v30 }
0x1854   :  { %6792 = vmatpush1.bf16.msra.mxu1 %v8670_v22  ;;  %4951 = vmatprep.mubr.f32.mxu1 %v7506_v0 }
0x1855   :  { %6794 = vmatprep.subr.bf16.mxu1 %v8677_v37 }
0x1858   :  { %6796 = vmatpush1.bf16.msra.mxu1 %v8694_v44 }
0x1859   :  { %6805 = vmatprep.subr.bf16.mxu1 %v7507_v57 }
0x185b   :  { %5796 = vmatmul.mubr.msk.f32.vlgmr.msra.gmra.mrb[46].mxu1 %vm4464_vm6, %v8725_v8 }
0x185c   :  { %6807 = vmatpush3.bf16.msra.mxu1 %v8737_v49  ;;  %5872 = vmatprep.mubr.msk.f32.mxu1 %vm7508_vm5, %v7506_v0 }
0x185d   :  { %6808 = vmatprep.subr.bf16.mxu1 %v7507_v57 }
0x1860   :  { %6810 = vmatpush3.bf16.msra.mxu1 %v8749_v59 }
0x1861   :  { %6823 = vmatprep.subr.bf16.mxu1 %v8638_v9  ;;  %v5032_v9 = vadd.f32 %v5026_v23, %v8715_v1 }
0x1863   :  { %v5800_v5 = vmul.f32 -1.442695, %v5032_v9 }
0x1926   :  { %v4863_v63 = vpop.f32.mrb[44].mxu1 }
0x1927   :  { %v4864_v38 = vadd.f32 %v8804_v50, %v4863_v63  ;;  %v5863_v42 = vpop.f32.mrb[45].mxu1 }
0x1929   :  { %4867 = vst [vmem:[%s8895_s22] sm:$0x3] %v4864_v38 }
0x192e   :  { %v4953_v8 = vpop.f32.mrb[46].mxu1 }
0x192f   :  { %v5029_v12 = vadd.f32 %v4953_v8, %v8708_v54  ;;  %v4955_v15 = vpop.f32.mrb[47].mxu1 }
0x1930   :  { %v5030_v6 = vadd.f32 %v4955_v15, %v8710_v43 }
0x1931   :  { %v5798_v24 = vmul.f32 -1.442695, %v5029_v12 }
0x1932   :  { %v5799_v17 = vmul.f32 -1.442695, %v5030_v6 }
0x1933   :  { %7145 = vpow2.f32 %v5798_v24 }
0x1934   :  { %7147 = vpow2.f32 %v5799_v17 }
0x1935   :  { %7149 = vpow2.f32 %v5800_v5 }
0x1936   :  { %7151 = vtanh.f32 %v5031_v51 }
0x193d   :  { %v7146_v26 = vpop.eup %7145 }
0x193e   :  { %v7148_v55 = vpop.eup %7147  ;;  %v5036_v41 = vadd.f32 1.0, %v7146_v26 }
0x193f   :  { %v5042_v35 = vadd.f32 1.0, %v7148_v55  ;;  %v7150_v47 = vpop.eup %7149 }
0x1940   :  { %7153 = vrcp.f32 %v5036_v41  ;;  %v7152_v32 = vpop.eup %7151  ;;  %v5049_v29 = vadd.f32 1.0, %v7150_v47 }
0x1941   :  { %7155 = vrcp.f32 %v5042_v35 }
0x1942   :  { %7157 = vrcp.f32 %v5049_v29 }
0x194a   :  { %v7154_v10 = vpop.eup %7153 }
0x194b   :  { %v7156_v21 = vpop.eup %7155  ;;  %v5053_v61 = vmul.f32 %v7154_v10, %v7152_v32 }
0x194c   :  { %v5052_v46 = vmul.f32 %v7156_v21, %v8722_v40  ;;  %v7158_v48 = vpop.eup %7157 }
0x194e   :  { %v8815_v11 = vadd.f32 %v5053_v61, %v5052_v46 }
0x1950   :  { %7159 = vtanh.f32 %v8815_v11 }
0x195a   :  { %v7160_v23 = vpop.eup %7159 }
0x195b   :  { %v5056_v3 = vmul.f32 %v7160_v23, %v7158_v48 }
0x195d   :  { %v5059_v19 = vsel %vm4639_vm4, %v5056_v3, 0.0 }
0x195e   :  { %5060 = vadd.xlane.f32.xlu0 %v5059_v19 }
0x19eb   :  { %v5061_v34 = vpop.xlane.xlu0 %5060 }
0x19ec   :  { %v5062_v58 = vmul.f32 0.03125, %v5061_v34 }
0x19ee   :  { %v5063_v4 = vsub.f32 %v5056_v3, %v5062_v58 }
0x19f0   :  { %v5064_v13 = vmul.f32 %v5063_v4, %v5063_v4 }
0x19f2   :  { %v5065_v31 = vsel %vm4639_vm4, %v5064_v13, 0.0 }
0x19f3   :  { %5066 = vadd.xlane.f32.xlu1 %v5065_v31 }
0x1a80   :  { %v5067_v45 = vpop.xlane.xlu1 %5066 }
0x1a81   :  { %v5068_v40 = vmul.f32 0.03125, %v5067_v45 }
0x1a83   :  { %v5069_v28 = vadd.f32 1e-05, %v5068_v40 }
0x1a85   :  { %7161 = vrsqrt.f32 %v5069_v28 }
0x1a8f   :  { %v7162_v7 = vpop.eup %7161 }
0x1a90   :  { %v5071_v36 = vmul.f32 %v7162_v7, %v5063_v4 }
0x1a92   :  { %v5078_v25 = vmul.f32 %v8757_v33, %v5071_v36 }
0x1a94   :  { %v5085_v18 = vadd.f32 %v8759_v16, %v5078_v25 }
0x1a96   :  { %5873 = vmatmul.mubr.msk.f32.vlgmr.msra.gmra.mrb[48].mxu1 %vm4464_vm6, %v5085_v18 }
0x1a97   :  { %6825 = vmatpush1.bf16.msra.mxu1 %v8672_v62  ;;  %5437 = vmatprep.mubr.f32.mxu1 %v7506_v0 }
0x1a98   :  { %6827 = vmatprep.subr.bf16.mxu1 %v8679_v27 }
0x1a9b   :  { %6829 = vmatpush1.bf16.msra.mxu1 %v8696_v39 }
0x1a9c   :  { %6836 = vmatprep.subr.bf16.mxu1 %v7507_v57 }
0x1a9e   :  { %5810 = vmatmul.mubr.msk.f32.vlgmr.msra.gmra.mrb[50].mxu1 %vm4464_vm6, %v5056_v3 }
0x1a9f   :  { %6838 = vmatpush3.bf16.msra.mxu1 %v8778_v56  ;;  %5897 = vmatprep.mubr.msk.f32.mxu1 %vm7508_vm5, %v7506_v0 }
0x1b69   :  { %v5166_v52 = vpop.f32.mrb[48].mxu1 }
0x1b6a   :  { %v5167_v14 = vadd.f32 %v8773_v53, %v5166_v52  ;;  %v5874_v30 = vpop.f32.mrb[49].mxu1 }
0x1b6c   :  { %7163 = vtanh.f32 %v5167_v14 }
0x1b71   :  { %v5439_v62 = vpop.f32.mrb[50].mxu1 }
0x1b72   :  { %v5441_v63 = vpop.f32.mrb[51].mxu1  ;;  %v5446_v47 = vadd.f32 %v5439_v62, %v8719_v20 }
0x1b76   :  { %v7164_v38 = vpop.eup %7163 }
0x1b77   :  { %v5173_v27 = vsel %vm4755_vm7, %v7164_v38, 0.0 }
0x1b78   :  { %5174 = vadd.xlane.f32.xlu0 %v5173_v27 }
0x1c05   :  { %v5175_v39 = vpop.xlane.xlu0 %5174 }
0x1c06   :  { %v5176_v42 = vmul.f32 0.0625, %v5175_v39 }
0x1c08   :  { %v5177_v8 = vsub.f32 %v7164_v38, %v5176_v42 }
0x1c0a   :  { %v5178_v12 = vmul.f32 %v5177_v8, %v5177_v8 }
0x1c0c   :  { %v5179_v56 = vsel %vm4755_vm7, %v5178_v12, 0.0 }
0x1c0d   :  { %5180 = vadd.xlane.f32.xlu1 %v5179_v56 }
0x1c9a   :  { %v5181_v15 = vpop.xlane.xlu1 %5180 }
0x1c9b   :  { %v5182_v6 = vmul.f32 0.0625, %v5181_v15 }
0x1c9d   :  { %v5183_v24 = vadd.f32 1e-05, %v5182_v6 }
0x1c9f   :  { %7165 = vrsqrt.f32 %v5183_v24 }
0x1ca9   :  { %v7166_v17 = vpop.eup %7165 }
0x1caa   :  { %v5185_v9 = vmul.f32 %v7166_v17, %v5177_v8 }
0x1cac   :  { %v5192_v5 = vmul.f32 %v8784_v60, %v5185_v9 }
0x1cae   :  { %v5199_v51 = vadd.f32 %v8786_v2, %v5192_v5 }
0x1cb0   :  { %5880 = vmatmul.mubr.msk.f32.vlgmr.msra.gmra.mrb[48].mxu0 %vm4793_vm8, %v5199_v51 }
0x1cb1   :  { %6817 = vmatpush1.bf16.msra.mxu0 %v8670_v22  ;;  %5366 = vmatprep.mubr.f32.mxu0 %v7506_v0 }
0x1cb2   :  { %6819 = vmatprep.subr.bf16.mxu0 %v8677_v37 }
0x1cb5   :  { %6821 = vmatpush1.bf16.msra.mxu0 %v8694_v44 }
0x1cb6   :  { %6830 = vmatprep.subr.bf16.mxu0 %v7507_v57 }
0x1cb8   :  { %5809 = vmatmul.mubr.msk.f32.vlgmr.msra.gmra.mrb[50].mxu0 %vm4464_vm6, %v5056_v3 }
0x1cb9   :  { %6832 = vmatpush3.bf16.msra.mxu0 %v8737_v49  ;;  %5890 = vmatprep.mubr.msk.f32.mxu0 %vm7508_vm5, %v7506_v0 }
0x1cba   :  { %6833 = vmatprep.subr.bf16.mxu0 %v7507_v57  ;;  %v5447_v57 = vadd.f32 %v5441_v63, %v8715_v1 }
0x1cbd   :  { %6835 = vmatpush3.bf16.msra.mxu0 %v8749_v59  ;;  %v5813_v59 = vmul.f32 -1.442695, %v5447_v57 }
0x1d83   :  { %v5278_v22 = vpop.f32.mrb[48].mxu0 }
0x1d84   :  { %v5279_v26 = vadd.f32 %v8804_v50, %v5278_v22  ;;  %v5881_v55 = vpop.f32.mrb[49].mxu0 }
0x1d86   :  { %5282 = vst [vmem:[%s8895_s22 + $0x2] sm:$0x3] %v5279_v26 }
0x1d8b   :  { %v5368_v37 = vpop.f32.mrb[50].mxu0 }
0x1d8c   :  { %v5444_v44 = vadd.f32 %v5368_v37, %v8708_v54  ;;  %v5370_v41 = vpop.f32.mrb[51].mxu0 }
0x1d8d   :  { %v5445_v49 = vadd.f32 %v5370_v41, %v8710_v43 }
0x1d8e   :  { %v5811_v35 = vmul.f32 -1.442695, %v5444_v44 }
0x1d8f   :  { %v5812_v0 = vmul.f32 -1.442695, %v5445_v49 }
0x1d90   :  { %7167 = vpow2.f32 %v5811_v35 }
0x1d91   :  { %7169 = vpow2.f32 %v5812_v0 }
0x1d92   :  { %7171 = vpow2.f32 %v5813_v59 }
0x1d93   :  { %7173 = vtanh.f32 %v5446_v47 }
0x1d9a   :  { %v7168_v32 = vpop.eup %7167 }
0x1d9b   :  { %v7170_v10 = vpop.eup %7169  ;;  %v5451_v21 = vadd.f32 1.0, %v7168_v32 }
0x1d9c   :  { %v5457_v29 = vadd.f32 1.0, %v7170_v10  ;;  %v7172_v54 = vpop.eup %7171 }
0x1d9d   :  { %7175 = vrcp.f32 %v5451_v21  ;;  %v7174_v61 = vpop.eup %7173  ;;  %v5464_v48 = vadd.f32 1.0, %v7172_v54 }
0x1d9e   :  { %7177 = vrcp.f32 %v5457_v29 }
0x1d9f   :  { %7179 = vrcp.f32 %v5464_v48 }
0x1da7   :  { %v7176_v43 = vpop.eup %7175 }
0x1da8   :  { %v7178_v46 = vpop.eup %7177  ;;  %v5468_v23 = vmul.f32 %v7176_v43, %v7174_v61 }
0x1da9   :  { %v5467_v3 = vmul.f32 %v7178_v46, %v8815_v11  ;;  %v7180_v20 = vpop.eup %7179 }
0x1dab   :  { %v5469_v1 = vadd.f32 %v5468_v23, %v5467_v3 }
0x1dad   :  { %7181 = vtanh.f32 %v5469_v1 }
0x1db7   :  { %v7182_v19 = vpop.eup %7181 }
0x1db8   :  { %v5471_v34 = vmul.f32 %v7182_v19, %v7180_v20 }
0x1dba   :  { %v5474_v58 = vsel %vm4639_vm4, %v5471_v34, 0.0 }
0x1dbb   :  { %5475 = vadd.xlane.f32.xlu0 %v5474_v58 }
0x1e48   :  { %v5476_v4 = vpop.xlane.xlu0 %5475 }
0x1e49   :  { %v5477_v13 = vmul.f32 0.03125, %v5476_v4 }
0x1e4b   :  { %v5478_v31 = vsub.f32 %v5471_v34, %v5477_v13 }
0x1e4d   :  { %v5479_v45 = vmul.f32 %v5478_v31, %v5478_v31 }
0x1e4f   :  { %v5480_v40 = vsel %vm4639_vm4, %v5479_v45, 0.0 }
0x1e50   :  { %5481 = vadd.xlane.f32.xlu1 %v5480_v40 }
0x1edd   :  { %v5482_v28 = vpop.xlane.xlu1 %5481 }
0x1ede   :  { %v5483_v7 = vmul.f32 0.03125, %v5482_v28 }
0x1ee0   :  { %v5484_v36 = vadd.f32 1e-05, %v5483_v7 }
0x1ee2   :  { %7183 = vrsqrt.f32 %v5484_v36 }
0x1eec   :  { %v7184_v11 = vpop.eup %7183 }
0x1eed   :  { %v5486_v25 = vmul.f32 %v7184_v11, %v5478_v31 }
0x1eef   :  { %v5493_v18 = vmul.f32 %v8757_v33, %v5486_v25 }
0x1ef1   :  { %v5500_v52 = vadd.f32 %v8759_v16, %v5493_v18 }
0x1ef3   :  { %5891 = vmatmul.mubr.msk.f32.vlgmr.msra.gmra.mrb[52].mxu0 %vm4464_vm6, %v5500_v52 }
0x1fc6   :  { %v5581_v14 = vpop.f32.mrb[52].mxu0 }
0x1fc7   :  { %v5582_v30 = vadd.f32 %v8773_v53, %v5581_v14  ;;  %v5892_v62 = vpop.f32.mrb[53].mxu0 }
0x1fc9   :  { %7185 = vtanh.f32 %v5582_v30 }
0x1fd3   :  { %v7186_v63 = vpop.eup %7185 }
0x1fd4   :  { %v5588_v38 = vsel %vm4755_vm7, %v7186_v63, 0.0 }
0x1fd5   :  { %5589 = vadd.xlane.f32.xlu0 %v5588_v38 }
0x2062   :  { %v5590_v27 = vpop.xlane.xlu0 %5589 }
0x2063   :  { %v5591_v39 = vmul.f32 0.0625, %v5590_v27 }
0x2065   :  { %v5592_v42 = vsub.f32 %v7186_v63, %v5591_v39 }
0x2067   :  { %v5593_v8 = vmul.f32 %v5592_v42, %v5592_v42 }
0x2069   :  { %v5594_v12 = vsel %vm4755_vm7, %v5593_v8, 0.0 }
0x206a   :  { %5595 = vadd.xlane.f32.xlu1 %v5594_v12 }
0x20f7   :  { %v5596_v33 = vpop.xlane.xlu1 %5595 }
0x20f8   :  { %v5597_v16 = vmul.f32 0.0625, %v5596_v33 }
0x20fa   :  { %v5598_v56 = vadd.f32 1e-05, %v5597_v16 }
0x20fc   :  { %7187 = vrsqrt.f32 %v5598_v56 }
0x2106   :  { %v7188_v15 = vpop.eup %7187 }
0x2107   :  { %v5600_v6 = vmul.f32 %v7188_v15, %v5592_v42 }
0x2109   :  { %v5607_v53 = vmul.f32 %v8784_v60, %v5600_v6 }
0x210b   :  { %v5614_v24 = vadd.f32 %v8786_v2, %v5607_v53 }
0x210d   :  { %5898 = vmatmul.mubr.msk.f32.vlgmr.msra.gmra.mrb[52].mxu1 %vm4793_vm8, %v5614_v24 }
0x21e0   :  { %v5693_v17 = vpop.f32.mrb[52].mxu1 }
0x21e1   :  { %v5694_v9 = vadd.f32 %v8804_v50, %v5693_v17  ;;  %v5899_v5 = vpop.f32.mrb[53].mxu1 }
0x21e3   :  { %5697 = vst [vmem:[%s8895_s22 + $0x4] sm:$0x3] %v5694_v9 }
0x21e4   :  { %5702 = vsyncpa [#allocation4], 1 }
0x21e5   :  { %5703 = vsyncpa [#allocation6], 1 }
0x21e6   :  { %5704 = vsyncpa [#allocation9], 1 }
0x21e7   :  { %5705 = vsyncpa [#allocation12], 1 }
0x21e8   :  { %5706 = vsyncpa [#allocation15], 1 }
0x21e9   :  { %5707 = vsyncpa [#allocation18], 1 }
0x21ea   :  { %5708 = vsyncpa [#allocation21], 1 }

</bundles_post_ra>
